<compile_context>
chip_gen: v6e
topology: v6e:2x2x1
jax: 0.10.0
libtpu: 0.0.40
codegen_flags: <defaults>
</compile_context>

<pallas_src>
import functools
import math

import jax
import jax.numpy as jnp
from jax.experimental import pallas as pl
from jax.experimental.pallas import tpu as pltpu


def conv_out_len(t, k, s, p=0):
    # integer arithmetic mirror of conv_L in the reference code
    return (t - k + 2 * p) // s + 1


# ---------------------------------------------------------------------------
# Pallas kernel (whole MultiEncoders forward, eval mode)
# ---------------------------------------------------------------------------
_BLOCK_FIELDS = ("w1", "b1", "w2", "b2", "bn_scale", "bn_shift", "sel")


def _cnn_block(x, w1, b1, w2, b2, scale, shift, sel):
    """cnn_block: Conv1x1 -> ReLU -> Conv_k(stride) -> ReLU -> BN(eval) -> Dropout(id).

    x:   (c_in, L_in)  batch folded into lanes (per-sample contiguous segments)
    sel: (k, L_in, L_out) constant one-hot column selects encoding the strided
         per-sample windows (precomputed outside the kernel).
    """
    h = jnp.dot(w1, x, preferred_element_type=jnp.float32) + b1
    h = jnp.maximum(h, 0.0)                                  # (c_out, L_in)

    k = w2.shape[0]
    c_out, l_out = w2.shape[1], sel.shape[2]
    acc = jnp.zeros((c_out, l_out), jnp.float32)
    for j in range(k):                                       # k is static (3 or 5)
        zj = jnp.dot(w2[j], h, preferred_element_type=jnp.float32)
        acc = acc + jnp.dot(zj, sel[j], preferred_element_type=jnp.float32)

    y = jnp.maximum(acc + b2, 0.0)
    return y * scale + shift                                 # eval-mode BN


def _encoder(x, refs):
    """One CNN1d (3 cnn_blocks + fused Linear). Returns y^T of shape (out_dim, B*N)."""
    idx = 0
    h = x
    for _ in range(3):
        w1, b1, w2, b2, sc, sh, sel = (r[...] for r in refs[idx:idx + 7])
        idx += 7
        h = _cnn_block(h, w1, b1, w2, b2, sc, sh, sel)

    # Fused Linear(out_dim*width_len -> out_dim) on the flat (c_out, B*N*wl)
    # activation.  wtile[o*co + c, n*wl + t] = W[o, c*wl + t]; smat sums groups
    # of co rows; dmat sums each sample segment.  => y^T = S (Wtile * rep) D + b
    wtile, smat, dmat, l1b = (r[...] for r in refs[idx:idx + 4])
    out_dim = smat.shape[0]
    rep = jnp.concatenate([h] * out_dim, axis=0)             # (out_dim*c_out, L)
    p = rep * wtile
    y_t = jnp.dot(smat, jnp.dot(p, dmat, preferred_element_type=jnp.float32),
                  preferred_element_type=jnp.float32) + l1b  # (out_dim, B*N)
    return y_t


def _multi_encoders_kernel(n_per_enc, x_ref, *refs):
    o_ref = refs[-1]                                         # (1, out_dim, B*N)
    enc_refs = (refs[:n_per_enc], refs[n_per_enc:2 * n_per_enc])
    x = x_ref[...]                                           # (C, B*N*T)
    e = pl.program_id(0)
    for i in range(2):
        @pl.when(e == i)
        def _(i=i):
            o_ref[0] = _encoder(x, enc_refs[i])


# ---------------------------------------------------------------------------
# Parameter / constant construction (deterministic, synthetic)
# ---------------------------------------------------------------------------
def make_select(bxn, t_in, k, s):
    """sel[j, l, m] = 1 iff l == (m // t_out)*t_in + s*(m % t_out) + j."""
    t_out = conv_out_len(t_in, k, s)
    l_in, l_out = bxn * t_in, bxn * t_out
    m = jnp.arange(l_out, dtype=jnp.int32)
    base = (m // t_out) * t_in + s * (m % t_out)             # (l_out,)
    l = jnp.arange(l_in, dtype=jnp.int32)
    j = jnp.arange(k, dtype=jnp.int32)
    sel = (l[None, :, None] == (base[None, None, :] + j[:, None, None]))
    return sel.astype(jnp.float32), t_out


def init_cnn_block(key, c_in, c_out, k):
    k1, k2, k3, k4 = jax.random.split(key, 4)
    lim1 = 1.0 / math.sqrt(c_in)                 # Conv1d(c_in, c_out, 1)
    lim2 = 1.0 / math.sqrt(c_out * k)            # Conv1d(c_out, c_out, k)
    return dict(
        w1=jax.random.uniform(k1, (c_out, c_in), jnp.float32, -lim1, lim1),
        b1=jax.random.uniform(k2, (c_out, 1), jnp.float32, -lim1, lim1),
        # tap-major conv weight: w2[j, o, c] == torch_weight[o, c, j]
        w2=jax.random.uniform(k3, (k, c_out, c_out), jnp.float32, -lim2, lim2),
        b2=jax.random.uniform(k4, (c_out, 1), jnp.float32, -lim2, lim2),
        # fresh BatchNorm1d (eval): gamma=1, beta=0, running_mean=0, running_var=1
        bn_scale=jnp.full((c_out, 1), 1.0 / math.sqrt(1.0 + 1e-5), jnp.float32),
        bn_shift=jnp.zeros((c_out, 1), jnp.float32),
    )


def init_cnn1d(key, in_dim, hid_dim, out_dim, height, kernel, stride, bxn):
    """CNN1d(layers=3, linear=True): b1(in->hid/2, k3, s1), bx0(hid/2->hid, k, 2),
    bn(hid->out, k, stride), l1(out*width_len -> out).  Also builds the constant
    select / tiling matrices consumed by the fused Pallas kernel."""
    b1_dim = hid_dim // 2
    keys = jax.random.split(key, 5)
    cfg = [(in_dim, b1_dim, 3, 1),
           (b1_dim, hid_dim, kernel, 2),
           (hid_dim, out_dim, kernel, stride)]
    blocks, t = [], height
    for i, (ci, co, k, s) in enumerate(cfg):
        p = init_cnn_block(keys[i], ci, co, k)
        t = conv_out_len(t, 1, 1)                            # the 1x1 conv
        p["sel"], t = make_select(bxn, t, k, s)
        blocks.append(p)
    width_len = t

    lim = 1.0 / math.sqrt(out_dim * width_len)
    l1_w = jax.random.uniform(keys[3], (out_dim, out_dim * width_len),
                              jnp.float32, -lim, lim)
    l1_b = jax.random.uniform(keys[4], (out_dim,), jnp.float32, -lim, lim)

    # Constants for the fused linear (pre-laid-out once; no per-call transpose):
    L = bxn * width_len
    wtile = jnp.tile(l1_w.reshape(out_dim * out_dim, width_len), (1, bxn))
    smat = (jnp.arange(out_dim)[:, None] ==
            (jnp.arange(out_dim * out_dim) // out_dim)[None, :]).astype(jnp.float32)
    dmat = ((jnp.arange(L) // width_len)[:, None] ==
            jnp.arange(bxn)[None, :]).astype(jnp.float32)

    return dict(blocks=blocks, wtile=wtile, smat=smat, dmat=dmat,
                l1_w=l1_w, l1_b=l1_b.reshape(out_dim, 1),
                strides=(1, 2, stride), width_len=width_len)


def flatten_encoder(p):
    flat = []
    for blk in p["blocks"]:
        flat.extend(blk[name] for name in _BLOCK_FIELDS)
    flat.extend([p["wtile"], p["smat"], p["dmat"], p["l1_b"]])
    return flat


# ---------------------------------------------------------------------------
# Forward pass: one fused pallas_call
# ---------------------------------------------------------------------------
def multi_encoders_forward(x, params):
    B, C, N, T = x.shape
    bxn = B * N
    # (B, C, N, T) -> (C, B*N*T), per-sample time segments contiguous on lanes
    x_flat = jnp.transpose(x, (1, 0, 2, 3)).reshape(C, bxn * T)

    flat1 = flatten_encoder(params["encoder1"])
    flat2 = flatten_encoder(params["encoder2"])
    n_per_enc = len(flat1)
    out_dim = params["encoder1"]["smat"].shape[0]
    inputs = [x_flat] + flat1 + flat2

    def full_spec(a):
        nd = a.ndim
        return pl.BlockSpec(a.shape, lambda e, _nd=nd: (0,) * _nd)

    kern = functools.partial(_multi_encoders_kernel, n_per_enc)
    out = pl.pallas_call(
        kern,
        out_shape=jax.ShapeDtypeStruct((2, out_dim, bxn), jnp.float32),
        grid=(2,),
        in_specs=[full_spec(a) for a in inputs],
        out_specs=pl.BlockSpec((1, out_dim, bxn), lambda e: (e, 0, 0)),
        compiler_params=pltpu.CompilerParams(
            dimension_semantics=("parallel",)),      # v7x: one encoder per core
    )(*inputs)

    y = jnp.concatenate([out[0].T, out[1].T], axis=-1)       # (B*N, 2*out_dim)
    return y.reshape(B, N, 2 * out_dim)


# ---------------------------------------------------------------------------
# Pure-JAX reference (mirrors the PyTorch module, eval mode) for validation
# ---------------------------------------------------------------------------
def _ref_conv1d(x, w, b, stride):
    # x: (BN, c_in, T), w: (c_out, c_in, k) [torch layout], b: (c_out,)
    k = w.shape[-1]
    t_out = conv_out_len(x.shape[-1], k, stride)
    cols = jnp.stack(
        [x[:, :, j: j + stride * (t_out - 1) + 1: stride] for j in range(k)],
        axis=-1)                                             # (BN, c_in, t_out, k)
    return jnp.einsum("bctk,ock->bot", cols, w) + b[None, :, None]


def _ref_cnn_block(x, p, stride):
    h = _ref_conv1d(x, p["w1"][:, :, None], p["b1"][:, 0], 1)
    h = jnp.maximum(h, 0.0)
    w2 = jnp.transpose(p["w2"], (1, 2, 0))                   # -> (c_out, c_in, k)
    y = _ref_conv1d(h, w2, p["b2"][:, 0], stride)
    y = jnp.maximum(y, 0.0)
    return y * p["bn_scale"][None] + p["bn_shift"][None]


def reference_forward(x, params):
    B, C, N, T = x.shape
    xs = jnp.transpose(x, (0, 2, 1, 3)).reshape(B * N, C, T)
    outs = []
    for name in ("encoder1", "encoder2"):
        p = params[name]
        h = xs
        for blk, s in zip(p["blocks"], p["strides"]):
            h = _ref_cnn_block(h, blk, s)
        flat = h.reshape(h.shape[0], -1)                     # torch.flatten(x, 1)
        outs.append(jnp.dot(flat, p["l1_w"].T) + p["l1_b"][:, 0][None, :])
    return jnp.concatenate(outs, axis=-1).reshape(B, N, -1)


# ---------------------------------------------------------------------------
if __name__ == "__main__":
    key = jax.random.PRNGKey(0)
    kx, k1, k2 = jax.random.split(key, 3)

    # T must equal 34: the module hard-codes height=34 for the linear layer.
    B, C, N, T = 2, 4, 3, 34
    hid_dim, out_dim = 16, 8          # hid_dim/2 = 8 keeps channels 8-aligned

    x = jax.random.normal(kx, (B, C, N, T), jnp.float32)
    params = dict(
        encoder1=init_cnn1d(k1, C, hid_dim, out_dim, 34, kernel=3, stride=1,
                            bxn=B * N),
        encoder2=init_cnn1d(k2, C, hid_dim, out_dim, 34, kernel=5, stride=2,
                            bxn=B * N),
    )

    fwd = jax.jit(multi_encoders_forward)
    out = fwd(x, params)
    jax.block_until_ready(out)
    assert out.shape == (B, N, 2 * out_dim), out.shape

    ref = reference_forward(x, params)
    err = float(jnp.max(jnp.abs(out - ref)))
    assert jnp.allclose(out, ref, rtol=2e-2, atol=2e-2), err

    print("KERNEL_OK")
</pallas_src>

<mosaic_0001>
module attributes {stable_mosaic.version = 11 : i64} {
  func.func @_multi_encoders_kernel(%arg0: i32, %arg1: memref<4x204xf32, #tpu.memory_space<vmem>>, %arg2: memref<8x4xf32, #tpu.memory_space<vmem>>, %arg3: memref<8x1xf32, #tpu.memory_space<vmem>>, %arg4: memref<3x8x8xf32, #tpu.memory_space<vmem>>, %arg5: memref<8x1xf32, #tpu.memory_space<vmem>>, %arg6: memref<8x1xf32, #tpu.memory_space<vmem>>, %arg7: memref<8x1xf32, #tpu.memory_space<vmem>>, %arg8: memref<3x204x192xf32, #tpu.memory_space<vmem>>, %arg9: memref<16x8xf32, #tpu.memory_space<vmem>>, %arg10: memref<16x1xf32, #tpu.memory_space<vmem>>, %arg11: memref<3x16x16xf32, #tpu.memory_space<vmem>>, %arg12: memref<16x1xf32, #tpu.memory_space<vmem>>, %arg13: memref<16x1xf32, #tpu.memory_space<vmem>>, %arg14: memref<16x1xf32, #tpu.memory_space<vmem>>, %arg15: memref<3x192x90xf32, #tpu.memory_space<vmem>>, %arg16: memref<8x16xf32, #tpu.memory_space<vmem>>, %arg17: memref<8x1xf32, #tpu.memory_space<vmem>>, %arg18: memref<3x8x8xf32, #tpu.memory_space<vmem>>, %arg19: memref<8x1xf32, #tpu.memory_space<vmem>>, %arg20: memref<8x1xf32, #tpu.memory_space<vmem>>, %arg21: memref<8x1xf32, #tpu.memory_space<vmem>>, %arg22: memref<3x90x78xf32, #tpu.memory_space<vmem>>, %arg23: memref<64x78xf32, #tpu.memory_space<vmem>>, %arg24: memref<8x64xf32, #tpu.memory_space<vmem>>, %arg25: memref<78x6xf32, #tpu.memory_space<vmem>>, %arg26: memref<8x1xf32, #tpu.memory_space<vmem>>, %arg27: memref<8x4xf32, #tpu.memory_space<vmem>>, %arg28: memref<8x1xf32, #tpu.memory_space<vmem>>, %arg29: memref<3x8x8xf32, #tpu.memory_space<vmem>>, %arg30: memref<8x1xf32, #tpu.memory_space<vmem>>, %arg31: memref<8x1xf32, #tpu.memory_space<vmem>>, %arg32: memref<8x1xf32, #tpu.memory_space<vmem>>, %arg33: memref<3x204x192xf32, #tpu.memory_space<vmem>>, %arg34: memref<16x8xf32, #tpu.memory_space<vmem>>, %arg35: memref<16x1xf32, #tpu.memory_space<vmem>>, %arg36: memref<5x16x16xf32, #tpu.memory_space<vmem>>, %arg37: memref<16x1xf32, #tpu.memory_space<vmem>>, %arg38: memref<16x1xf32, #tpu.memory_space<vmem>>, %arg39: memref<16x1xf32, #tpu.memory_space<vmem>>, %arg40: memref<5x192x84xf32, #tpu.memory_space<vmem>>, %arg41: memref<8x16xf32, #tpu.memory_space<vmem>>, %arg42: memref<8x1xf32, #tpu.memory_space<vmem>>, %arg43: memref<5x8x8xf32, #tpu.memory_space<vmem>>, %arg44: memref<8x1xf32, #tpu.memory_space<vmem>>, %arg45: memref<8x1xf32, #tpu.memory_space<vmem>>, %arg46: memref<8x1xf32, #tpu.memory_space<vmem>>, %arg47: memref<5x84x30xf32, #tpu.memory_space<vmem>>, %arg48: memref<64x30xf32, #tpu.memory_space<vmem>>, %arg49: memref<8x64xf32, #tpu.memory_space<vmem>>, %arg50: memref<30x6xf32, #tpu.memory_space<vmem>>, %arg51: memref<8x1xf32, #tpu.memory_space<vmem>>, %arg52: memref<1x8x6xf32, #tpu.memory_space<vmem>>) attributes {dimension_semantics = [#tpu.dimension_semantics<parallel>], iteration_bounds = array<i64: 2>, scalar_prefetch = 0 : i64, scratch_operands = 0 : i64, tpu.core_type = #tpu.core_type<tc>, window_params = [{pipeline_mode = #tpu.pipeline_mode<synchronous>, transform_indices = @transform_0, window_bounds = array<i64: 4, 204>}, {pipeline_mode = #tpu.pipeline_mode<synchronous>, transform_indices = @transform_1, window_bounds = array<i64: 8, 4>}, {pipeline_mode = #tpu.pipeline_mode<synchronous>, transform_indices = @transform_2, window_bounds = array<i64: 8, 1>}, {pipeline_mode = #tpu.pipeline_mode<synchronous>, transform_indices = @transform_3, window_bounds = array<i64: 3, 8, 8>}, {pipeline_mode = #tpu.pipeline_mode<synchronous>, transform_indices = @transform_4, window_bounds = array<i64: 8, 1>}, {pipeline_mode = #tpu.pipeline_mode<synchronous>, transform_indices = @transform_5, window_bounds = array<i64: 8, 1>}, {pipeline_mode = #tpu.pipeline_mode<synchronous>, transform_indices = @transform_6, window_bounds = array<i64: 8, 1>}, {pipeline_mode = #tpu.pipeline_mode<synchronous>, transform_indices = @transform_7, window_bounds = array<i64: 3, 204, 192>}, {pipeline_mode = #tpu.pipeline_mode<synchronous>, transform_indices = @transform_8, window_bounds = array<i64: 16, 8>}, {pipeline_mode = #tpu.pipeline_mode<synchronous>, transform_indices = @transform_9, window_bounds = array<i64: 16, 1>}, {pipeline_mode = #tpu.pipeline_mode<synchronous>, transform_indices = @transform_10, window_bounds = array<i64: 3, 16, 16>}, {pipeline_mode = #tpu.pipeline_mode<synchronous>, transform_indices = @transform_11, window_bounds = array<i64: 16, 1>}, {pipeline_mode = #tpu.pipeline_mode<synchronous>, transform_indices = @transform_12, window_bounds = array<i64: 16, 1>}, {pipeline_mode = #tpu.pipeline_mode<synchronous>, transform_indices = @transform_13, window_bounds = array<i64: 16, 1>}, {pipeline_mode = #tpu.pipeline_mode<synchronous>, transform_indices = @transform_14, window_bounds = array<i64: 3, 192, 90>}, {pipeline_mode = #tpu.pipeline_mode<synchronous>, transform_indices = @transform_15, window_bounds = array<i64: 8, 16>}, {pipeline_mode = #tpu.pipeline_mode<synchronous>, transform_indices = @transform_16, window_bounds = array<i64: 8, 1>}, {pipeline_mode = #tpu.pipeline_mode<synchronous>, transform_indices = @transform_17, window_bounds = array<i64: 3, 8, 8>}, {pipeline_mode = #tpu.pipeline_mode<synchronous>, transform_indices = @transform_18, window_bounds = array<i64: 8, 1>}, {pipeline_mode = #tpu.pipeline_mode<synchronous>, transform_indices = @transform_19, window_bounds = array<i64: 8, 1>}, {pipeline_mode = #tpu.pipeline_mode<synchronous>, transform_indices = @transform_20, window_bounds = array<i64: 8, 1>}, {pipeline_mode = #tpu.pipeline_mode<synchronous>, transform_indices = @transform_21, window_bounds = array<i64: 3, 90, 78>}, {pipeline_mode = #tpu.pipeline_mode<synchronous>, transform_indices = @transform_22, window_bounds = array<i64: 64, 78>}, {pipeline_mode = #tpu.pipeline_mode<synchronous>, transform_indices = @transform_23, window_bounds = array<i64: 8, 64>}, {pipeline_mode = #tpu.pipeline_mode<synchronous>, transform_indices = @transform_24, window_bounds = array<i64: 78, 6>}, {pipeline_mode = #tpu.pipeline_mode<synchronous>, transform_indices = @transform_25, window_bounds = array<i64: 8, 1>}, {pipeline_mode = #tpu.pipeline_mode<synchronous>, transform_indices = @transform_26, window_bounds = array<i64: 8, 4>}, {pipeline_mode = #tpu.pipeline_mode<synchronous>, transform_indices = @transform_27, window_bounds = array<i64: 8, 1>}, {pipeline_mode = #tpu.pipeline_mode<synchronous>, transform_indices = @transform_28, window_bounds = array<i64: 3, 8, 8>}, {pipeline_mode = #tpu.pipeline_mode<synchronous>, transform_indices = @transform_29, window_bounds = array<i64: 8, 1>}, {pipeline_mode = #tpu.pipeline_mode<synchronous>, transform_indices = @transform_30, window_bounds = array<i64: 8, 1>}, {pipeline_mode = #tpu.pipeline_mode<synchronous>, transform_indices = @transform_31, window_bounds = array<i64: 8, 1>}, {pipeline_mode = #tpu.pipeline_mode<synchronous>, transform_indices = @transform_32, window_bounds = array<i64: 3, 204, 192>}, {pipeline_mode = #tpu.pipeline_mode<synchronous>, transform_indices = @transform_33, window_bounds = array<i64: 16, 8>}, {pipeline_mode = #tpu.pipeline_mode<synchronous>, transform_indices = @transform_34, window_bounds = array<i64: 16, 1>}, {pipeline_mode = #tpu.pipeline_mode<synchronous>, transform_indices = @transform_35, window_bounds = array<i64: 5, 16, 16>}, {pipeline_mode = #tpu.pipeline_mode<synchronous>, transform_indices = @transform_36, window_bounds = array<i64: 16, 1>}, {pipeline_mode = #tpu.pipeline_mode<synchronous>, transform_indices = @transform_37, window_bounds = array<i64: 16, 1>}, {pipeline_mode = #tpu.pipeline_mode<synchronous>, transform_indices = @transform_38, window_bounds = array<i64: 16, 1>}, {pipeline_mode = #tpu.pipeline_mode<synchronous>, transform_indices = @transform_39, window_bounds = array<i64: 5, 192, 84>}, {pipeline_mode = #tpu.pipeline_mode<synchronous>, transform_indices = @transform_40, window_bounds = array<i64: 8, 16>}, {pipeline_mode = #tpu.pipeline_mode<synchronous>, transform_indices = @transform_41, window_bounds = array<i64: 8, 1>}, {pipeline_mode = #tpu.pipeline_mode<synchronous>, transform_indices = @transform_42, window_bounds = array<i64: 5, 8, 8>}, {pipeline_mode = #tpu.pipeline_mode<synchronous>, transform_indices = @transform_43, window_bounds = array<i64: 8, 1>}, {pipeline_mode = #tpu.pipeline_mode<synchronous>, transform_indices = @transform_44, window_bounds = array<i64: 8, 1>}, {pipeline_mode = #tpu.pipeline_mode<synchronous>, transform_indices = @transform_45, window_bounds = array<i64: 8, 1>}, {pipeline_mode = #tpu.pipeline_mode<synchronous>, transform_indices = @transform_46, window_bounds = array<i64: 5, 84, 30>}, {pipeline_mode = #tpu.pipeline_mode<synchronous>, transform_indices = @transform_47, window_bounds = array<i64: 64, 30>}, {pipeline_mode = #tpu.pipeline_mode<synchronous>, transform_indices = @transform_48, window_bounds = array<i64: 8, 64>}, {pipeline_mode = #tpu.pipeline_mode<synchronous>, transform_indices = @transform_49, window_bounds = array<i64: 30, 6>}, {pipeline_mode = #tpu.pipeline_mode<synchronous>, transform_indices = @transform_50, window_bounds = array<i64: 8, 1>}, {transform_indices = @transform_51, window_bounds = array<i64: 1, 8, 6>}]} {
    %c0 = arith.constant 0 : index
    %c0_0 = arith.constant 0 : index
    %0 = vector.load %arg1[%c0, %c0_0] : memref<4x204xf32, #tpu.memory_space<vmem>>, vector<4x204xf32>
    %c0_i32 = arith.constant 0 : i32
    %1 = arith.cmpi eq, %arg0, %c0_i32 : i32
    %2 = arith.extui %1 : i1 to i32
    %c0_i32_1 = arith.constant 0 : i32
    %3 = arith.cmpi ne, %2, %c0_i32_1 : i32
    scf.if %3 {
      %c0_3 = arith.constant 0 : index
      %c0_4 = arith.constant 0 : index
      %7 = vector.load %arg2[%c0_3, %c0_4] : memref<8x4xf32, #tpu.memory_space<vmem>>, vector<8x4xf32>
      %c0_5 = arith.constant 0 : index
      %c0_6 = arith.constant 0 : index
      %8 = vector.load %arg3[%c0_5, %c0_6] : memref<8x1xf32, #tpu.memory_space<vmem>>, vector<8x1xf32>
      %c0_7 = arith.constant 0 : index
      %c0_8 = arith.constant 0 : index
      %c0_9 = arith.constant 0 : index
      %9 = vector.load %arg4[%c0_7, %c0_8, %c0_9] : memref<3x8x8xf32, #tpu.memory_space<vmem>>, vector<3x8x8xf32>
      %c0_10 = arith.constant 0 : index
      %c0_11 = arith.constant 0 : index
      %10 = vector.load %arg5[%c0_10, %c0_11] : memref<8x1xf32, #tpu.memory_space<vmem>>, vector<8x1xf32>
      %c0_12 = arith.constant 0 : index
      %c0_13 = arith.constant 0 : index
      %11 = vector.load %arg6[%c0_12, %c0_13] : memref<8x1xf32, #tpu.memory_space<vmem>>, vector<8x1xf32>
      %c0_14 = arith.constant 0 : index
      %c0_15 = arith.constant 0 : index
      %12 = vector.load %arg7[%c0_14, %c0_15] : memref<8x1xf32, #tpu.memory_space<vmem>>, vector<8x1xf32>
      %c0_16 = arith.constant 0 : index
      %c0_17 = arith.constant 0 : index
      %c0_18 = arith.constant 0 : index
      %13 = vector.load %arg8[%c0_16, %c0_17, %c0_18] : memref<3x204x192xf32, #tpu.memory_space<vmem>>, vector<3x204x192xf32>
      %cst = arith.constant dense<0.000000e+00> : vector<8x204xf32>
      %14 = tpu.matmul %7, %0, %cst {dimension_numbers = #tpu.dot_dimension_numbers<[1], [0], [0], [1], [0, 0, 1, 1], [], []>} : vector<8x4xf32>, vector<4x204xf32>, vector<8x204xf32> -> vector<8x204xf32>
      %15 = vector.broadcast %8 : vector<8x1xf32> to vector<8x204xf32>
      %16 = arith.addf %14, %15 : vector<8x204xf32>
      %cst_19 = arith.constant 0.000000e+00 : f32
      %17 = vector.broadcast %cst_19 : f32 to vector<8x204xf32>
      %18 = arith.maximumf %16, %17 : vector<8x204xf32>
      %cst_20 = arith.constant 0.000000e+00 : f32
      %19 = vector.broadcast %cst_20 : f32 to vector<8x192xf32>
      %20 = vector.extract_strided_slice %9 {offsets = [0, 0, 0], sizes = [1, 8, 8], strides = [1, 1, 1]} : vector<3x8x8xf32> to vector<1x8x8xf32>
      %21 = vector.shape_cast %20 : vector<1x8x8xf32> to vector<8x8xf32>
      %cst_21 = arith.constant dense<0.000000e+00> : vector<8x204xf32>
      %22 = tpu.matmul %21, %18, %cst_21 {dimension_numbers = #tpu.dot_dimension_numbers<[1], [0], [0], [1], [0, 0, 1, 1], [], []>} : vector<8x8xf32>, vector<8x204xf32>, vector<8x204xf32> -> vector<8x204xf32>
      %23 = vector.extract_strided_slice %13 {offsets = [0, 0, 0], sizes = [1, 204, 192], strides = [1, 1, 1]} : vector<3x204x192xf32> to vector<1x204x192xf32>
      %24 = vector.shape_cast %23 : vector<1x204x192xf32> to vector<204x192xf32>
      %cst_22 = arith.constant dense<0.000000e+00> : vector<8x192xf32>
      %25 = tpu.matmul %22, %24, %cst_22 {dimension_numbers = #tpu.dot_dimension_numbers<[1], [0], [0], [1], [0, 0, 1, 1], [], []>} : vector<8x204xf32>, vector<204x192xf32>, vector<8x192xf32> -> vector<8x192xf32>
      %26 = arith.addf %19, %25 : vector<8x192xf32>
      %27 = vector.extract_strided_slice %9 {offsets = [1, 0, 0], sizes = [1, 8, 8], strides = [1, 1, 1]} : vector<3x8x8xf32> to vector<1x8x8xf32>
      %28 = vector.shape_cast %27 : vector<1x8x8xf32> to vector<8x8xf32>
      %cst_23 = arith.constant dense<0.000000e+00> : vector<8x204xf32>
      %29 = tpu.matmul %28, %18, %cst_23 {dimension_numbers = #tpu.dot_dimension_numbers<[1], [0], [0], [1], [0, 0, 1, 1], [], []>} : vector<8x8xf32>, vector<8x204xf32>, vector<8x204xf32> -> vector<8x204xf32>
      %30 = vector.extract_strided_slice %13 {offsets = [1, 0, 0], sizes = [1, 204, 192], strides = [1, 1, 1]} : vector<3x204x192xf32> to vector<1x204x192xf32>
      %31 = vector.shape_cast %30 : vector<1x204x192xf32> to vector<204x192xf32>
      %cst_24 = arith.constant dense<0.000000e+00> : vector<8x192xf32>
      %32 = tpu.matmul %29, %31, %cst_24 {dimension_numbers = #tpu.dot_dimension_numbers<[1], [0], [0], [1], [0, 0, 1, 1], [], []>} : vector<8x204xf32>, vector<204x192xf32>, vector<8x192xf32> -> vector<8x192xf32>
      %33 = arith.addf %26, %32 : vector<8x192xf32>
      %34 = vector.extract_strided_slice %9 {offsets = [2, 0, 0], sizes = [1, 8, 8], strides = [1, 1, 1]} : vector<3x8x8xf32> to vector<1x8x8xf32>
      %35 = vector.shape_cast %34 : vector<1x8x8xf32> to vector<8x8xf32>
      %cst_25 = arith.constant dense<0.000000e+00> : vector<8x204xf32>
      %36 = tpu.matmul %35, %18, %cst_25 {dimension_numbers = #tpu.dot_dimension_numbers<[1], [0], [0], [1], [0, 0, 1, 1], [], []>} : vector<8x8xf32>, vector<8x204xf32>, vector<8x204xf32> -> vector<8x204xf32>
      %37 = vector.extract_strided_slice %13 {offsets = [2, 0, 0], sizes = [1, 204, 192], strides = [1, 1, 1]} : vector<3x204x192xf32> to vector<1x204x192xf32>
      %38 = vector.shape_cast %37 : vector<1x204x192xf32> to vector<204x192xf32>
      %cst_26 = arith.constant dense<0.000000e+00> : vector<8x192xf32>
      %39 = tpu.matmul %36, %38, %cst_26 {dimension_numbers = #tpu.dot_dimension_numbers<[1], [0], [0], [1], [0, 0, 1, 1], [], []>} : vector<8x204xf32>, vector<204x192xf32>, vector<8x192xf32> -> vector<8x192xf32>
      %40 = arith.addf %33, %39 : vector<8x192xf32>
      %41 = vector.broadcast %10 : vector<8x1xf32> to vector<8x192xf32>
      %42 = arith.addf %40, %41 : vector<8x192xf32>
      %cst_27 = arith.constant 0.000000e+00 : f32
      %43 = vector.broadcast %cst_27 : f32 to vector<8x192xf32>
      %44 = arith.maximumf %42, %43 : vector<8x192xf32>
      %45 = vector.broadcast %11 : vector<8x1xf32> to vector<8x192xf32>
      %46 = arith.mulf %44, %45 : vector<8x192xf32>
      %47 = vector.broadcast %12 : vector<8x1xf32> to vector<8x192xf32>
      %48 = arith.addf %46, %47 : vector<8x192xf32>
      %c0_28 = arith.constant 0 : index
      %c0_29 = arith.constant 0 : index
      %49 = vector.load %arg9[%c0_28, %c0_29] : memref<16x8xf32, #tpu.memory_space<vmem>>, vector<16x8xf32>
      %c0_30 = arith.constant 0 : index
      %c0_31 = arith.constant 0 : index
      %50 = vector.load %arg10[%c0_30, %c0_31] : memref<16x1xf32, #tpu.memory_space<vmem>>, vector<16x1xf32>
      %c0_32 = arith.constant 0 : index
      %c0_33 = arith.constant 0 : index
      %c0_34 = arith.constant 0 : index
      %51 = vector.load %arg11[%c0_32, %c0_33, %c0_34] : memref<3x16x16xf32, #tpu.memory_space<vmem>>, vector<3x16x16xf32>
      %c0_35 = arith.constant 0 : index
      %c0_36 = arith.constant 0 : index
      %52 = vector.load %arg12[%c0_35, %c0_36] : memref<16x1xf32, #tpu.memory_space<vmem>>, vector<16x1xf32>
      %c0_37 = arith.constant 0 : index
      %c0_38 = arith.constant 0 : index
      %53 = vector.load %arg13[%c0_37, %c0_38] : memref<16x1xf32, #tpu.memory_space<vmem>>, vector<16x1xf32>
      %c0_39 = arith.constant 0 : index
      %c0_40 = arith.constant 0 : index
      %54 = vector.load %arg14[%c0_39, %c0_40] : memref<16x1xf32, #tpu.memory_space<vmem>>, vector<16x1xf32>
      %c0_41 = arith.constant 0 : index
      %c0_42 = arith.constant 0 : index
      %c0_43 = arith.constant 0 : index
      %55 = vector.load %arg15[%c0_41, %c0_42, %c0_43] : memref<3x192x90xf32, #tpu.memory_space<vmem>>, vector<3x192x90xf32>
      %cst_44 = arith.constant dense<0.000000e+00> : vector<16x192xf32>
      %56 = tpu.matmul %49, %48, %cst_44 {dimension_numbers = #tpu.dot_dimension_numbers<[1], [0], [0], [1], [0, 0, 1, 1], [], []>} : vector<16x8xf32>, vector<8x192xf32>, vector<16x192xf32> -> vector<16x192xf32>
      %57 = vector.broadcast %50 : vector<16x1xf32> to vector<16x192xf32>
      %58 = arith.addf %56, %57 : vector<16x192xf32>
      %cst_45 = arith.constant 0.000000e+00 : f32
      %59 = vector.broadcast %cst_45 : f32 to vector<16x192xf32>
      %60 = arith.maximumf %58, %59 : vector<16x192xf32>
      %cst_46 = arith.constant 0.000000e+00 : f32
      %61 = vector.broadcast %cst_46 : f32 to vector<16x90xf32>
      %62 = vector.extract_strided_slice %51 {offsets = [0, 0, 0], sizes = [1, 16, 16], strides = [1, 1, 1]} : vector<3x16x16xf32> to vector<1x16x16xf32>
      %63 = vector.shape_cast %62 : vector<1x16x16xf32> to vector<16x16xf32>
      %cst_47 = arith.constant dense<0.000000e+00> : vector<16x192xf32>
      %64 = tpu.matmul %63, %60, %cst_47 {dimension_numbers = #tpu.dot_dimension_numbers<[1], [0], [0], [1], [0, 0, 1, 1], [], []>} : vector<16x16xf32>, vector<16x192xf32>, vector<16x192xf32> -> vector<16x192xf32>
      %65 = vector.extract_strided_slice %55 {offsets = [0, 0, 0], sizes = [1, 192, 90], strides = [1, 1, 1]} : vector<3x192x90xf32> to vector<1x192x90xf32>
      %66 = vector.shape_cast %65 : vector<1x192x90xf32> to vector<192x90xf32>
      %cst_48 = arith.constant dense<0.000000e+00> : vector<16x90xf32>
      %67 = tpu.matmul %64, %66, %cst_48 {dimension_numbers = #tpu.dot_dimension_numbers<[1], [0], [0], [1], [0, 0, 1, 1], [], []>} : vector<16x192xf32>, vector<192x90xf32>, vector<16x90xf32> -> vector<16x90xf32>
      %68 = arith.addf %61, %67 : vector<16x90xf32>
      %69 = vector.extract_strided_slice %51 {offsets = [1, 0, 0], sizes = [1, 16, 16], strides = [1, 1, 1]} : vector<3x16x16xf32> to vector<1x16x16xf32>
      %70 = vector.shape_cast %69 : vector<1x16x16xf32> to vector<16x16xf32>
      %cst_49 = arith.constant dense<0.000000e+00> : vector<16x192xf32>
      %71 = tpu.matmul %70, %60, %cst_49 {dimension_numbers = #tpu.dot_dimension_numbers<[1], [0], [0], [1], [0, 0, 1, 1], [], []>} : vector<16x16xf32>, vector<16x192xf32>, vector<16x192xf32> -> vector<16x192xf32>
      %72 = vector.extract_strided_slice %55 {offsets = [1, 0, 0], sizes = [1, 192, 90], strides = [1, 1, 1]} : vector<3x192x90xf32> to vector<1x192x90xf32>
      %73 = vector.shape_cast %72 : vector<1x192x90xf32> to vector<192x90xf32>
      %cst_50 = arith.constant dense<0.000000e+00> : vector<16x90xf32>
      %74 = tpu.matmul %71, %73, %cst_50 {dimension_numbers = #tpu.dot_dimension_numbers<[1], [0], [0], [1], [0, 0, 1, 1], [], []>} : vector<16x192xf32>, vector<192x90xf32>, vector<16x90xf32> -> vector<16x90xf32>
      %75 = arith.addf %68, %74 : vector<16x90xf32>
      %76 = vector.extract_strided_slice %51 {offsets = [2, 0, 0], sizes = [1, 16, 16], strides = [1, 1, 1]} : vector<3x16x16xf32> to vector<1x16x16xf32>
      %77 = vector.shape_cast %76 : vector<1x16x16xf32> to vector<16x16xf32>
      %cst_51 = arith.constant dense<0.000000e+00> : vector<16x192xf32>
      %78 = tpu.matmul %77, %60, %cst_51 {dimension_numbers = #tpu.dot_dimension_numbers<[1], [0], [0], [1], [0, 0, 1, 1], [], []>} : vector<16x16xf32>, vector<16x192xf32>, vector<16x192xf32> -> vector<16x192xf32>
      %79 = vector.extract_strided_slice %55 {offsets = [2, 0, 0], sizes = [1, 192, 90], strides = [1, 1, 1]} : vector<3x192x90xf32> to vector<1x192x90xf32>
      %80 = vector.shape_cast %79 : vector<1x192x90xf32> to vector<192x90xf32>
      %cst_52 = arith.constant dense<0.000000e+00> : vector<16x90xf32>
      %81 = tpu.matmul %78, %80, %cst_52 {dimension_numbers = #tpu.dot_dimension_numbers<[1], [0], [0], [1], [0, 0, 1, 1], [], []>} : vector<16x192xf32>, vector<192x90xf32>, vector<16x90xf32> -> vector<16x90xf32>
      %82 = arith.addf %75, %81 : vector<16x90xf32>
      %83 = vector.broadcast %52 : vector<16x1xf32> to vector<16x90xf32>
      %84 = arith.addf %82, %83 : vector<16x90xf32>
      %cst_53 = arith.constant 0.000000e+00 : f32
      %85 = vector.broadcast %cst_53 : f32 to vector<16x90xf32>
      %86 = arith.maximumf %84, %85 : vector<16x90xf32>
      %87 = vector.broadcast %53 : vector<16x1xf32> to vector<16x90xf32>
      %88 = arith.mulf %86, %87 : vector<16x90xf32>
      %89 = vector.broadcast %54 : vector<16x1xf32> to vector<16x90xf32>
      %90 = arith.addf %88, %89 : vector<16x90xf32>
      %c0_54 = arith.constant 0 : index
      %c0_55 = arith.constant 0 : index
      %91 = vector.load %arg16[%c0_54, %c0_55] : memref<8x16xf32, #tpu.memory_space<vmem>>, vector<8x16xf32>
      %c0_56 = arith.constant 0 : index
      %c0_57 = arith.constant 0 : index
      %92 = vector.load %arg17[%c0_56, %c0_57] : memref<8x1xf32, #tpu.memory_space<vmem>>, vector<8x1xf32>
      %c0_58 = arith.constant 0 : index
      %c0_59 = arith.constant 0 : index
      %c0_60 = arith.constant 0 : index
      %93 = vector.load %arg18[%c0_58, %c0_59, %c0_60] : memref<3x8x8xf32, #tpu.memory_space<vmem>>, vector<3x8x8xf32>
      %c0_61 = arith.constant 0 : index
      %c0_62 = arith.constant 0 : index
      %94 = vector.load %arg19[%c0_61, %c0_62] : memref<8x1xf32, #tpu.memory_space<vmem>>, vector<8x1xf32>
      %c0_63 = arith.constant 0 : index
      %c0_64 = arith.constant 0 : index
      %95 = vector.load %arg20[%c0_63, %c0_64] : memref<8x1xf32, #tpu.memory_space<vmem>>, vector<8x1xf32>
      %c0_65 = arith.constant 0 : index
      %c0_66 = arith.constant 0 : index
      %96 = vector.load %arg21[%c0_65, %c0_66] : memref<8x1xf32, #tpu.memory_space<vmem>>, vector<8x1xf32>
      %c0_67 = arith.constant 0 : index
      %c0_68 = arith.constant 0 : index
      %c0_69 = arith.constant 0 : index
      %97 = vector.load %arg22[%c0_67, %c0_68, %c0_69] : memref<3x90x78xf32, #tpu.memory_space<vmem>>, vector<3x90x78xf32>
      %cst_70 = arith.constant dense<0.000000e+00> : vector<8x90xf32>
      %98 = tpu.matmul %91, %90, %cst_70 {dimension_numbers = #tpu.dot_dimension_numbers<[1], [0], [0], [1], [0, 0, 1, 1], [], []>} : vector<8x16xf32>, vector<16x90xf32>, vector<8x90xf32> -> vector<8x90xf32>
      %99 = vector.broadcast %92 : vector<8x1xf32> to vector<8x90xf32>
      %100 = arith.addf %98, %99 : vector<8x90xf32>
      %cst_71 = arith.constant 0.000000e+00 : f32
      %101 = vector.broadcast %cst_71 : f32 to vector<8x90xf32>
      %102 = arith.maximumf %100, %101 : vector<8x90xf32>
      %cst_72 = arith.constant 0.000000e+00 : f32
      %103 = vector.broadcast %cst_72 : f32 to vector<8x78xf32>
      %104 = vector.extract_strided_slice %93 {offsets = [0, 0, 0], sizes = [1, 8, 8], strides = [1, 1, 1]} : vector<3x8x8xf32> to vector<1x8x8xf32>
      %105 = vector.shape_cast %104 : vector<1x8x8xf32> to vector<8x8xf32>
      %cst_73 = arith.constant dense<0.000000e+00> : vector<8x90xf32>
      %106 = tpu.matmul %105, %102, %cst_73 {dimension_numbers = #tpu.dot_dimension_numbers<[1], [0], [0], [1], [0, 0, 1, 1], [], []>} : vector<8x8xf32>, vector<8x90xf32>, vector<8x90xf32> -> vector<8x90xf32>
      %107 = vector.extract_strided_slice %97 {offsets = [0, 0, 0], sizes = [1, 90, 78], strides = [1, 1, 1]} : vector<3x90x78xf32> to vector<1x90x78xf32>
      %108 = vector.shape_cast %107 : vector<1x90x78xf32> to vector<90x78xf32>
      %cst_74 = arith.constant dense<0.000000e+00> : vector<8x78xf32>
      %109 = tpu.matmul %106, %108, %cst_74 {dimension_numbers = #tpu.dot_dimension_numbers<[1], [0], [0], [1], [0, 0, 1, 1], [], []>} : vector<8x90xf32>, vector<90x78xf32>, vector<8x78xf32> -> vector<8x78xf32>
      %110 = arith.addf %103, %109 : vector<8x78xf32>
      %111 = vector.extract_strided_slice %93 {offsets = [1, 0, 0], sizes = [1, 8, 8], strides = [1, 1, 1]} : vector<3x8x8xf32> to vector<1x8x8xf32>
      %112 = vector.shape_cast %111 : vector<1x8x8xf32> to vector<8x8xf32>
      %cst_75 = arith.constant dense<0.000000e+00> : vector<8x90xf32>
      %113 = tpu.matmul %112, %102, %cst_75 {dimension_numbers = #tpu.dot_dimension_numbers<[1], [0], [0], [1], [0, 0, 1, 1], [], []>} : vector<8x8xf32>, vector<8x90xf32>, vector<8x90xf32> -> vector<8x90xf32>
      %114 = vector.extract_strided_slice %97 {offsets = [1, 0, 0], sizes = [1, 90, 78], strides = [1, 1, 1]} : vector<3x90x78xf32> to vector<1x90x78xf32>
      %115 = vector.shape_cast %114 : vector<1x90x78xf32> to vector<90x78xf32>
      %cst_76 = arith.constant dense<0.000000e+00> : vector<8x78xf32>
      %116 = tpu.matmul %113, %115, %cst_76 {dimension_numbers = #tpu.dot_dimension_numbers<[1], [0], [0], [1], [0, 0, 1, 1], [], []>} : vector<8x90xf32>, vector<90x78xf32>, vector<8x78xf32> -> vector<8x78xf32>
      %117 = arith.addf %110, %116 : vector<8x78xf32>
      %118 = vector.extract_strided_slice %93 {offsets = [2, 0, 0], sizes = [1, 8, 8], strides = [1, 1, 1]} : vector<3x8x8xf32> to vector<1x8x8xf32>
      %119 = vector.shape_cast %118 : vector<1x8x8xf32> to vector<8x8xf32>
      %cst_77 = arith.constant dense<0.000000e+00> : vector<8x90xf32>
      %120 = tpu.matmul %119, %102, %cst_77 {dimension_numbers = #tpu.dot_dimension_numbers<[1], [0], [0], [1], [0, 0, 1, 1], [], []>} : vector<8x8xf32>, vector<8x90xf32>, vector<8x90xf32> -> vector<8x90xf32>
      %121 = vector.extract_strided_slice %97 {offsets = [2, 0, 0], sizes = [1, 90, 78], strides = [1, 1, 1]} : vector<3x90x78xf32> to vector<1x90x78xf32>
      %122 = vector.shape_cast %121 : vector<1x90x78xf32> to vector<90x78xf32>
      %cst_78 = arith.constant dense<0.000000e+00> : vector<8x78xf32>
      %123 = tpu.matmul %120, %122, %cst_78 {dimension_numbers = #tpu.dot_dimension_numbers<[1], [0], [0], [1], [0, 0, 1, 1], [], []>} : vector<8x90xf32>, vector<90x78xf32>, vector<8x78xf32> -> vector<8x78xf32>
      %124 = arith.addf %117, %123 : vector<8x78xf32>
      %125 = vector.broadcast %94 : vector<8x1xf32> to vector<8x78xf32>
      %126 = arith.addf %124, %125 : vector<8x78xf32>
      %cst_79 = arith.constant 0.000000e+00 : f32
      %127 = vector.broadcast %cst_79 : f32 to vector<8x78xf32>
      %128 = arith.maximumf %126, %127 : vector<8x78xf32>
      %129 = vector.broadcast %95 : vector<8x1xf32> to vector<8x78xf32>
      %130 = arith.mulf %128, %129 : vector<8x78xf32>
      %131 = vector.broadcast %96 : vector<8x1xf32> to vector<8x78xf32>
      %132 = arith.addf %130, %131 : vector<8x78xf32>
      %c0_80 = arith.constant 0 : index
      %c0_81 = arith.constant 0 : index
      %133 = vector.load %arg23[%c0_80, %c0_81] : memref<64x78xf32, #tpu.memory_space<vmem>>, vector<64x78xf32>
      %c0_82 = arith.constant 0 : index
      %c0_83 = arith.constant 0 : index
      %134 = vector.load %arg24[%c0_82, %c0_83] : memref<8x64xf32, #tpu.memory_space<vmem>>, vector<8x64xf32>
      %c0_84 = arith.constant 0 : index
      %c0_85 = arith.constant 0 : index
      %135 = vector.load %arg25[%c0_84, %c0_85] : memref<78x6xf32, #tpu.memory_space<vmem>>, vector<78x6xf32>
      %c0_86 = arith.constant 0 : index
      %c0_87 = arith.constant 0 : index
      %136 = vector.load %arg26[%c0_86, %c0_87] : memref<8x1xf32, #tpu.memory_space<vmem>>, vector<8x1xf32>
      %137 = tpu.concatenate %132, %132, %132, %132, %132, %132, %132, %132 in 0 : vector<8x78xf32>, vector<8x78xf32>, vector<8x78xf32>, vector<8x78xf32>, vector<8x78xf32>, vector<8x78xf32>, vector<8x78xf32>, vector<8x78xf32> -> vector<64x78xf32>
      %138 = arith.mulf %137, %133 : vector<64x78xf32>
      %cst_88 = arith.constant dense<0.000000e+00> : vector<64x6xf32>
      %139 = tpu.matmul %138, %135, %cst_88 {dimension_numbers = #tpu.dot_dimension_numbers<[1], [0], [0], [1], [0, 0, 1, 1], [], []>} : vector<64x78xf32>, vector<78x6xf32>, vector<64x6xf32> -> vector<64x6xf32>
      %cst_89 = arith.constant dense<0.000000e+00> : vector<8x6xf32>
      %140 = tpu.matmul %134, %139, %cst_89 {dimension_numbers = #tpu.dot_dimension_numbers<[1], [0], [0], [1], [0, 0, 1, 1], [], []>} : vector<8x64xf32>, vector<64x6xf32>, vector<8x6xf32> -> vector<8x6xf32>
      %141 = vector.broadcast %136 : vector<8x1xf32> to vector<8x6xf32>
      %142 = arith.addf %140, %141 : vector<8x6xf32>
      %c0_90 = arith.constant 0 : index
      %c0_91 = arith.constant 0 : index
      %c0_92 = arith.constant 0 : index
      %143 = vector.load %arg52[%c0_90, %c0_91, %c0_92] : memref<1x8x6xf32, #tpu.memory_space<vmem>>, vector<1x8x6xf32>
      %144 = vector.shape_cast %143 : vector<1x8x6xf32> to vector<8x6xf32>
      %145 = vector.shape_cast %142 : vector<8x6xf32> to vector<1x8x6xf32>
      tpu.vector_store %arg52[%c0_90, %c0_91, %c0_92], %145 {strides = array<i32>} : memref<1x8x6xf32, #tpu.memory_space<vmem>>, vector<1x8x6xf32>,
    } else {
    }
    %c1_i32 = arith.constant 1 : i32
    %4 = arith.cmpi eq, %arg0, %c1_i32 : i32
    %5 = arith.extui %4 : i1 to i32
    %c0_i32_2 = arith.constant 0 : i32
    %6 = arith.cmpi ne, %5, %c0_i32_2 : i32
    scf.if %6 {
      %c0_3 = arith.constant 0 : index
      %c0_4 = arith.constant 0 : index
      %7 = vector.load %arg27[%c0_3, %c0_4] : memref<8x4xf32, #tpu.memory_space<vmem>>, vector<8x4xf32>
      %c0_5 = arith.constant 0 : index
      %c0_6 = arith.constant 0 : index
      %8 = vector.load %arg28[%c0_5, %c0_6] : memref<8x1xf32, #tpu.memory_space<vmem>>, vector<8x1xf32>
      %c0_7 = arith.constant 0 : index
      %c0_8 = arith.constant 0 : index
      %c0_9 = arith.constant 0 : index
      %9 = vector.load %arg29[%c0_7, %c0_8, %c0_9] : memref<3x8x8xf32, #tpu.memory_space<vmem>>, vector<3x8x8xf32>
      %c0_10 = arith.constant 0 : index
      %c0_11 = arith.constant 0 : index
      %10 = vector.load %arg30[%c0_10, %c0_11] : memref<8x1xf32, #tpu.memory_space<vmem>>, vector<8x1xf32>
      %c0_12 = arith.constant 0 : index
      %c0_13 = arith.constant 0 : index
      %11 = vector.load %arg31[%c0_12, %c0_13] : memref<8x1xf32, #tpu.memory_space<vmem>>, vector<8x1xf32>
      %c0_14 = arith.constant 0 : index
      %c0_15 = arith.constant 0 : index
      %12 = vector.load %arg32[%c0_14, %c0_15] : memref<8x1xf32, #tpu.memory_space<vmem>>, vector<8x1xf32>
      %c0_16 = arith.constant 0 : index
      %c0_17 = arith.constant 0 : index
      %c0_18 = arith.constant 0 : index
      %13 = vector.load %arg33[%c0_16, %c0_17, %c0_18] : memref<3x204x192xf32, #tpu.memory_space<vmem>>, vector<3x204x192xf32>
      %cst = arith.constant dense<0.000000e+00> : vector<8x204xf32>
      %14 = tpu.matmul %7, %0, %cst {dimension_numbers = #tpu.dot_dimension_numbers<[1], [0], [0], [1], [0, 0, 1, 1], [], []>} : vector<8x4xf32>, vector<4x204xf32>, vector<8x204xf32> -> vector<8x204xf32>
      %15 = vector.broadcast %8 : vector<8x1xf32> to vector<8x204xf32>
      %16 = arith.addf %14, %15 : vector<8x204xf32>
      %cst_19 = arith.constant 0.000000e+00 : f32
      %17 = vector.broadcast %cst_19 : f32 to vector<8x204xf32>
      %18 = arith.maximumf %16, %17 : vector<8x204xf32>
      %cst_20 = arith.constant 0.000000e+00 : f32
      %19 = vector.broadcast %cst_20 : f32 to vector<8x192xf32>
      %20 = vector.extract_strided_slice %9 {offsets = [0, 0, 0], sizes = [1, 8, 8], strides = [1, 1, 1]} : vector<3x8x8xf32> to vector<1x8x8xf32>
      %21 = vector.shape_cast %20 : vector<1x8x8xf32> to vector<8x8xf32>
      %cst_21 = arith.constant dense<0.000000e+00> : vector<8x204xf32>
      %22 = tpu.matmul %21, %18, %cst_21 {dimension_numbers = #tpu.dot_dimension_numbers<[1], [0], [0], [1], [0, 0, 1, 1], [], []>} : vector<8x8xf32>, vector<8x204xf32>, vector<8x204xf32> -> vector<8x204xf32>
      %23 = vector.extract_strided_slice %13 {offsets = [0, 0, 0], sizes = [1, 204, 192], strides = [1, 1, 1]} : vector<3x204x192xf32> to vector<1x204x192xf32>
      %24 = vector.shape_cast %23 : vector<1x204x192xf32> to vector<204x192xf32>
      %cst_22 = arith.constant dense<0.000000e+00> : vector<8x192xf32>
      %25 = tpu.matmul %22, %24, %cst_22 {dimension_numbers = #tpu.dot_dimension_numbers<[1], [0], [0], [1], [0, 0, 1, 1], [], []>} : vector<8x204xf32>, vector<204x192xf32>, vector<8x192xf32> -> vector<8x192xf32>
      %26 = arith.addf %19, %25 : vector<8x192xf32>
      %27 = vector.extract_strided_slice %9 {offsets = [1, 0, 0], sizes = [1, 8, 8], strides = [1, 1, 1]} : vector<3x8x8xf32> to vector<1x8x8xf32>
      %28 = vector.shape_cast %27 : vector<1x8x8xf32> to vector<8x8xf32>
      %cst_23 = arith.constant dense<0.000000e+00> : vector<8x204xf32>
      %29 = tpu.matmul %28, %18, %cst_23 {dimension_numbers = #tpu.dot_dimension_numbers<[1], [0], [0], [1], [0, 0, 1, 1], [], []>} : vector<8x8xf32>, vector<8x204xf32>, vector<8x204xf32> -> vector<8x204xf32>
      %30 = vector.extract_strided_slice %13 {offsets = [1, 0, 0], sizes = [1, 204, 192], strides = [1, 1, 1]} : vector<3x204x192xf32> to vector<1x204x192xf32>
      %31 = vector.shape_cast %30 : vector<1x204x192xf32> to vector<204x192xf32>
      %cst_24 = arith.constant dense<0.000000e+00> : vector<8x192xf32>
      %32 = tpu.matmul %29, %31, %cst_24 {dimension_numbers = #tpu.dot_dimension_numbers<[1], [0], [0], [1], [0, 0, 1, 1], [], []>} : vector<8x204xf32>, vector<204x192xf32>, vector<8x192xf32> -> vector<8x192xf32>
      %33 = arith.addf %26, %32 : vector<8x192xf32>
      %34 = vector.extract_strided_slice %9 {offsets = [2, 0, 0], sizes = [1, 8, 8], strides = [1, 1, 1]} : vector<3x8x8xf32> to vector<1x8x8xf32>
      %35 = vector.shape_cast %34 : vector<1x8x8xf32> to vector<8x8xf32>
      %cst_25 = arith.constant dense<0.000000e+00> : vector<8x204xf32>
      %36 = tpu.matmul %35, %18, %cst_25 {dimension_numbers = #tpu.dot_dimension_numbers<[1], [0], [0], [1], [0, 0, 1, 1], [], []>} : vector<8x8xf32>, vector<8x204xf32>, vector<8x204xf32> -> vector<8x204xf32>
      %37 = vector.extract_strided_slice %13 {offsets = [2, 0, 0], sizes = [1, 204, 192], strides = [1, 1, 1]} : vector<3x204x192xf32> to vector<1x204x192xf32>
      %38 = vector.shape_cast %37 : vector<1x204x192xf32> to vector<204x192xf32>
      %cst_26 = arith.constant dense<0.000000e+00> : vector<8x192xf32>
      %39 = tpu.matmul %36, %38, %cst_26 {dimension_numbers = #tpu.dot_dimension_numbers<[1], [0], [0], [1], [0, 0, 1, 1], [], []>} : vector<8x204xf32>, vector<204x192xf32>, vector<8x192xf32> -> vector<8x192xf32>
      %40 = arith.addf %33, %39 : vector<8x192xf32>
      %41 = vector.broadcast %10 : vector<8x1xf32> to vector<8x192xf32>
      %42 = arith.addf %40, %41 : vector<8x192xf32>
      %cst_27 = arith.constant 0.000000e+00 : f32
      %43 = vector.broadcast %cst_27 : f32 to vector<8x192xf32>
      %44 = arith.maximumf %42, %43 : vector<8x192xf32>
      %45 = vector.broadcast %11 : vector<8x1xf32> to vector<8x192xf32>
      %46 = arith.mulf %44, %45 : vector<8x192xf32>
      %47 = vector.broadcast %12 : vector<8x1xf32> to vector<8x192xf32>
      %48 = arith.addf %46, %47 : vector<8x192xf32>
      %c0_28 = arith.constant 0 : index
      %c0_29 = arith.constant 0 : index
      %49 = vector.load %arg34[%c0_28, %c0_29] : memref<16x8xf32, #tpu.memory_space<vmem>>, vector<16x8xf32>
      %c0_30 = arith.constant 0 : index
      %c0_31 = arith.constant 0 : index
      %50 = vector.load %arg35[%c0_30, %c0_31] : memref<16x1xf32, #tpu.memory_space<vmem>>, vector<16x1xf32>
      %c0_32 = arith.constant 0 : index
      %c0_33 = arith.constant 0 : index
      %c0_34 = arith.constant 0 : index
      %51 = vector.load %arg36[%c0_32, %c0_33, %c0_34] : memref<5x16x16xf32, #tpu.memory_space<vmem>>, vector<5x16x16xf32>
      %c0_35 = arith.constant 0 : index
      %c0_36 = arith.constant 0 : index
      %52 = vector.load %arg37[%c0_35, %c0_36] : memref<16x1xf32, #tpu.memory_space<vmem>>, vector<16x1xf32>
      %c0_37 = arith.constant 0 : index
      %c0_38 = arith.constant 0 : index
      %53 = vector.load %arg38[%c0_37, %c0_38] : memref<16x1xf32, #tpu.memory_space<vmem>>, vector<16x1xf32>
      %c0_39 = arith.constant 0 : index
      %c0_40 = arith.constant 0 : index
      %54 = vector.load %arg39[%c0_39, %c0_40] : memref<16x1xf32, #tpu.memory_space<vmem>>, vector<16x1xf32>
      %c0_41 = arith.constant 0 : index
      %c0_42 = arith.constant 0 : index
      %c0_43 = arith.constant 0 : index
      %55 = vector.load %arg40[%c0_41, %c0_42, %c0_43] : memref<5x192x84xf32, #tpu.memory_space<vmem>>, vector<5x192x84xf32>
      %cst_44 = arith.constant dense<0.000000e+00> : vector<16x192xf32>
      %56 = tpu.matmul %49, %48, %cst_44 {dimension_numbers = #tpu.dot_dimension_numbers<[1], [0], [0], [1], [0, 0, 1, 1], [], []>} : vector<16x8xf32>, vector<8x192xf32>, vector<16x192xf32> -> vector<16x192xf32>
      %57 = vector.broadcast %50 : vector<16x1xf32> to vector<16x192xf32>
      %58 = arith.addf %56, %57 : vector<16x192xf32>
      %cst_45 = arith.constant 0.000000e+00 : f32
      %59 = vector.broadcast %cst_45 : f32 to vector<16x192xf32>
      %60 = arith.maximumf %58, %59 : vector<16x192xf32>
      %cst_46 = arith.constant 0.000000e+00 : f32
      %61 = vector.broadcast %cst_46 : f32 to vector<16x84xf32>
      %62 = vector.extract_strided_slice %51 {offsets = [0, 0, 0], sizes = [1, 16, 16], strides = [1, 1, 1]} : vector<5x16x16xf32> to vector<1x16x16xf32>
      %63 = vector.shape_cast %62 : vector<1x16x16xf32> to vector<16x16xf32>
      %cst_47 = arith.constant dense<0.000000e+00> : vector<16x192xf32>
      %64 = tpu.matmul %63, %60, %cst_47 {dimension_numbers = #tpu.dot_dimension_numbers<[1], [0], [0], [1], [0, 0, 1, 1], [], []>} : vector<16x16xf32>, vector<16x192xf32>, vector<16x192xf32> -> vector<16x192xf32>
      %65 = vector.extract_strided_slice %55 {offsets = [0, 0, 0], sizes = [1, 192, 84], strides = [1, 1, 1]} : vector<5x192x84xf32> to vector<1x192x84xf32>
      %66 = vector.shape_cast %65 : vector<1x192x84xf32> to vector<192x84xf32>
      %cst_48 = arith.constant dense<0.000000e+00> : vector<16x84xf32>
      %67 = tpu.matmul %64, %66, %cst_48 {dimension_numbers = #tpu.dot_dimension_numbers<[1], [0], [0], [1], [0, 0, 1, 1], [], []>} : vector<16x192xf32>, vector<192x84xf32>, vector<16x84xf32> -> vector<16x84xf32>
      %68 = arith.addf %61, %67 : vector<16x84xf32>
      %69 = vector.extract_strided_slice %51 {offsets = [1, 0, 0], sizes = [1, 16, 16], strides = [1, 1, 1]} : vector<5x16x16xf32> to vector<1x16x16xf32>
      %70 = vector.shape_cast %69 : vector<1x16x16xf32> to vector<16x16xf32>
      %cst_49 = arith.constant dense<0.000000e+00> : vector<16x192xf32>
      %71 = tpu.matmul %70, %60, %cst_49 {dimension_numbers = #tpu.dot_dimension_numbers<[1], [0], [0], [1], [0, 0, 1, 1], [], []>} : vector<16x16xf32>, vector<16x192xf32>, vector<16x192xf32> -> vector<16x192xf32>
      %72 = vector.extract_strided_slice %55 {offsets = [1, 0, 0], sizes = [1, 192, 84], strides = [1, 1, 1]} : vector<5x192x84xf32> to vector<1x192x84xf32>
      %73 = vector.shape_cast %72 : vector<1x192x84xf32> to vector<192x84xf32>
      %cst_50 = arith.constant dense<0.000000e+00> : vector<16x84xf32>
      %74 = tpu.matmul %71, %73, %cst_50 {dimension_numbers = #tpu.dot_dimension_numbers<[1], [0], [0], [1], [0, 0, 1, 1], [], []>} : vector<16x192xf32>, vector<192x84xf32>, vector<16x84xf32> -> vector<16x84xf32>
      %75 = arith.addf %68, %74 : vector<16x84xf32>
      %76 = vector.extract_strided_slice %51 {offsets = [2, 0, 0], sizes = [1, 16, 16], strides = [1, 1, 1]} : vector<5x16x16xf32> to vector<1x16x16xf32>
      %77 = vector.shape_cast %76 : vector<1x16x16xf32> to vector<16x16xf32>
      %cst_51 = arith.constant dense<0.000000e+00> : vector<16x192xf32>
      %78 = tpu.matmul %77, %60, %cst_51 {dimension_numbers = #tpu.dot_dimension_numbers<[1], [0], [0], [1], [0, 0, 1, 1], [], []>} : vector<16x16xf32>, vector<16x192xf32>, vector<16x192xf32> -> vector<16x192xf32>
      %79 = vector.extract_strided_slice %55 {offsets = [2, 0, 0], sizes = [1, 192, 84], strides = [1, 1, 1]} : vector<5x192x84xf32> to vector<1x192x84xf32>
      %80 = vector.shape_cast %79 : vector<1x192x84xf32> to vector<192x84xf32>
      %cst_52 = arith.constant dense<0.000000e+00> : vector<16x84xf32>
      %81 = tpu.matmul %78, %80, %cst_52 {dimension_numbers = #tpu.dot_dimension_numbers<[1], [0], [0], [1], [0, 0, 1, 1], [], []>} : vector<16x192xf32>, vector<192x84xf32>, vector<16x84xf32> -> vector<16x84xf32>
      %82 = arith.addf %75, %81 : vector<16x84xf32>
      %83 = vector.extract_strided_slice %51 {offsets = [3, 0, 0], sizes = [1, 16, 16], strides = [1, 1, 1]} : vector<5x16x16xf32> to vector<1x16x16xf32>
      %84 = vector.shape_cast %83 : vector<1x16x16xf32> to vector<16x16xf32>
      %cst_53 = arith.constant dense<0.000000e+00> : vector<16x192xf32>
      %85 = tpu.matmul %84, %60, %cst_53 {dimension_numbers = #tpu.dot_dimension_numbers<[1], [0], [0], [1], [0, 0, 1, 1], [], []>} : vector<16x16xf32>, vector<16x192xf32>, vector<16x192xf32> -> vector<16x192xf32>
      %86 = vector.extract_strided_slice %55 {offsets = [3, 0, 0], sizes = [1, 192, 84], strides = [1, 1, 1]} : vector<5x192x84xf32> to vector<1x192x84xf32>
      %87 = vector.shape_cast %86 : vector<1x192x84xf32> to vector<192x84xf32>
      %cst_54 = arith.constant dense<0.000000e+00> : vector<16x84xf32>
      %88 = tpu.matmul %85, %87, %cst_54 {dimension_numbers = #tpu.dot_dimension_numbers<[1], [0], [0], [1], [0, 0, 1, 1], [], []>} : vector<16x192xf32>, vector<192x84xf32>, vector<16x84xf32> -> vector<16x84xf32>
      %89 = arith.addf %82, %88 : vector<16x84xf32>
      %90 = vector.extract_strided_slice %51 {offsets = [4, 0, 0], sizes = [1, 16, 16], strides = [1, 1, 1]} : vector<5x16x16xf32> to vector<1x16x16xf32>
      %91 = vector.shape_cast %90 : vector<1x16x16xf32> to vector<16x16xf32>
      %cst_55 = arith.constant dense<0.000000e+00> : vector<16x192xf32>
      %92 = tpu.matmul %91, %60, %cst_55 {dimension_numbers = #tpu.dot_dimension_numbers<[1], [0], [0], [1], [0, 0, 1, 1], [], []>} : vector<16x16xf32>, vector<16x192xf32>, vector<16x192xf32> -> vector<16x192xf32>
      %93 = vector.extract_strided_slice %55 {offsets = [4, 0, 0], sizes = [1, 192, 84], strides = [1, 1, 1]} : vector<5x192x84xf32> to vector<1x192x84xf32>
      %94 = vector.shape_cast %93 : vector<1x192x84xf32> to vector<192x84xf32>
      %cst_56 = arith.constant dense<0.000000e+00> : vector<16x84xf32>
      %95 = tpu.matmul %92, %94, %cst_56 {dimension_numbers = #tpu.dot_dimension_numbers<[1], [0], [0], [1], [0, 0, 1, 1], [], []>} : vector<16x192xf32>, vector<192x84xf32>, vector<16x84xf32> -> vector<16x84xf32>
      %96 = arith.addf %89, %95 : vector<16x84xf32>
      %97 = vector.broadcast %52 : vector<16x1xf32> to vector<16x84xf32>
      %98 = arith.addf %96, %97 : vector<16x84xf32>
      %cst_57 = arith.constant 0.000000e+00 : f32
      %99 = vector.broadcast %cst_57 : f32 to vector<16x84xf32>
      %100 = arith.maximumf %98, %99 : vector<16x84xf32>
      %101 = vector.broadcast %53 : vector<16x1xf32> to vector<16x84xf32>
      %102 = arith.mulf %100, %101 : vector<16x84xf32>
      %103 = vector.broadcast %54 : vector<16x1xf32> to vector<16x84xf32>
      %104 = arith.addf %102, %103 : vector<16x84xf32>
      %c0_58 = arith.constant 0 : index
      %c0_59 = arith.constant 0 : index
      %105 = vector.load %arg41[%c0_58, %c0_59] : memref<8x16xf32, #tpu.memory_space<vmem>>, vector<8x16xf32>
      %c0_60 = arith.constant 0 : index
      %c0_61 = arith.constant 0 : index
      %106 = vector.load %arg42[%c0_60, %c0_61] : memref<8x1xf32, #tpu.memory_space<vmem>>, vector<8x1xf32>
      %c0_62 = arith.constant 0 : index
      %c0_63 = arith.constant 0 : index
      %c0_64 = arith.constant 0 : index
      %107 = vector.load %arg43[%c0_62, %c0_63, %c0_64] : memref<5x8x8xf32, #tpu.memory_space<vmem>>, vector<5x8x8xf32>
      %c0_65 = arith.constant 0 : index
      %c0_66 = arith.constant 0 : index
      %108 = vector.load %arg44[%c0_65, %c0_66] : memref<8x1xf32, #tpu.memory_space<vmem>>, vector<8x1xf32>
      %c0_67 = arith.constant 0 : index
      %c0_68 = arith.constant 0 : index
      %109 = vector.load %arg45[%c0_67, %c0_68] : memref<8x1xf32, #tpu.memory_space<vmem>>, vector<8x1xf32>
      %c0_69 = arith.constant 0 : index
      %c0_70 = arith.constant 0 : index
      %110 = vector.load %arg46[%c0_69, %c0_70] : memref<8x1xf32, #tpu.memory_space<vmem>>, vector<8x1xf32>
      %c0_71 = arith.constant 0 : index
      %c0_72 = arith.constant 0 : index
      %c0_73 = arith.constant 0 : index
      %111 = vector.load %arg47[%c0_71, %c0_72, %c0_73] : memref<5x84x30xf32, #tpu.memory_space<vmem>>, vector<5x84x30xf32>
      %cst_74 = arith.constant dense<0.000000e+00> : vector<8x84xf32>
      %112 = tpu.matmul %105, %104, %cst_74 {dimension_numbers = #tpu.dot_dimension_numbers<[1], [0], [0], [1], [0, 0, 1, 1], [], []>} : vector<8x16xf32>, vector<16x84xf32>, vector<8x84xf32> -> vector<8x84xf32>
      %113 = vector.broadcast %106 : vector<8x1xf32> to vector<8x84xf32>
      %114 = arith.addf %112, %113 : vector<8x84xf32>
      %cst_75 = arith.constant 0.000000e+00 : f32
      %115 = vector.broadcast %cst_75 : f32 to vector<8x84xf32>
      %116 = arith.maximumf %114, %115 : vector<8x84xf32>
      %cst_76 = arith.constant 0.000000e+00 : f32
      %117 = vector.broadcast %cst_76 : f32 to vector<8x30xf32>
      %118 = vector.extract_strided_slice %107 {offsets = [0, 0, 0], sizes = [1, 8, 8], strides = [1, 1, 1]} : vector<5x8x8xf32> to vector<1x8x8xf32>
      %119 = vector.shape_cast %118 : vector<1x8x8xf32> to vector<8x8xf32>
      %cst_77 = arith.constant dense<0.000000e+00> : vector<8x84xf32>
      %120 = tpu.matmul %119, %116, %cst_77 {dimension_numbers = #tpu.dot_dimension_numbers<[1], [0], [0], [1], [0, 0, 1, 1], [], []>} : vector<8x8xf32>, vector<8x84xf32>, vector<8x84xf32> -> vector<8x84xf32>
      %121 = vector.extract_strided_slice %111 {offsets = [0, 0, 0], sizes = [1, 84, 30], strides = [1, 1, 1]} : vector<5x84x30xf32> to vector<1x84x30xf32>
      %122 = vector.shape_cast %121 : vector<1x84x30xf32> to vector<84x30xf32>
      %cst_78 = arith.constant dense<0.000000e+00> : vector<8x30xf32>
      %123 = tpu.matmul %120, %122, %cst_78 {dimension_numbers = #tpu.dot_dimension_numbers<[1], [0], [0], [1], [0, 0, 1, 1], [], []>} : vector<8x84xf32>, vector<84x30xf32>, vector<8x30xf32> -> vector<8x30xf32>
      %124 = arith.addf %117, %123 : vector<8x30xf32>
      %125 = vector.extract_strided_slice %107 {offsets = [1, 0, 0], sizes = [1, 8, 8], strides = [1, 1, 1]} : vector<5x8x8xf32> to vector<1x8x8xf32>
      %126 = vector.shape_cast %125 : vector<1x8x8xf32> to vector<8x8xf32>
      %cst_79 = arith.constant dense<0.000000e+00> : vector<8x84xf32>
      %127 = tpu.matmul %126, %116, %cst_79 {dimension_numbers = #tpu.dot_dimension_numbers<[1], [0], [0], [1], [0, 0, 1, 1], [], []>} : vector<8x8xf32>, vector<8x84xf32>, vector<8x84xf32> -> vector<8x84xf32>
      %128 = vector.extract_strided_slice %111 {offsets = [1, 0, 0], sizes = [1, 84, 30], strides = [1, 1, 1]} : vector<5x84x30xf32> to vector<1x84x30xf32>
      %129 = vector.shape_cast %128 : vector<1x84x30xf32> to vector<84x30xf32>
      %cst_80 = arith.constant dense<0.000000e+00> : vector<8x30xf32>
      %130 = tpu.matmul %127, %129, %cst_80 {dimension_numbers = #tpu.dot_dimension_numbers<[1], [0], [0], [1], [0, 0, 1, 1], [], []>} : vector<8x84xf32>, vector<84x30xf32>, vector<8x30xf32> -> vector<8x30xf32>
      %131 = arith.addf %124, %130 : vector<8x30xf32>
      %132 = vector.extract_strided_slice %107 {offsets = [2, 0, 0], sizes = [1, 8, 8], strides = [1, 1, 1]} : vector<5x8x8xf32> to vector<1x8x8xf32>
      %133 = vector.shape_cast %132 : vector<1x8x8xf32> to vector<8x8xf32>
      %cst_81 = arith.constant dense<0.000000e+00> : vector<8x84xf32>
      %134 = tpu.matmul %133, %116, %cst_81 {dimension_numbers = #tpu.dot_dimension_numbers<[1], [0], [0], [1], [0, 0, 1, 1], [], []>} : vector<8x8xf32>, vector<8x84xf32>, vector<8x84xf32> -> vector<8x84xf32>
      %135 = vector.extract_strided_slice %111 {offsets = [2, 0, 0], sizes = [1, 84, 30], strides = [1, 1, 1]} : vector<5x84x30xf32> to vector<1x84x30xf32>
      %136 = vector.shape_cast %135 : vector<1x84x30xf32> to vector<84x30xf32>
      %cst_82 = arith.constant dense<0.000000e+00> : vector<8x30xf32>
      %137 = tpu.matmul %134, %136, %cst_82 {dimension_numbers = #tpu.dot_dimension_numbers<[1], [0], [0], [1], [0, 0, 1, 1], [], []>} : vector<8x84xf32>, vector<84x30xf32>, vector<8x30xf32> -> vector<8x30xf32>
      %138 = arith.addf %131, %137 : vector<8x30xf32>
      %139 = vector.extract_strided_slice %107 {offsets = [3, 0, 0], sizes = [1, 8, 8], strides = [1, 1, 1]} : vector<5x8x8xf32> to vector<1x8x8xf32>
      %140 = vector.shape_cast %139 : vector<1x8x8xf32> to vector<8x8xf32>
      %cst_83 = arith.constant dense<0.000000e+00> : vector<8x84xf32>
      %141 = tpu.matmul %140, %116, %cst_83 {dimension_numbers = #tpu.dot_dimension_numbers<[1], [0], [0], [1], [0, 0, 1, 1], [], []>} : vector<8x8xf32>, vector<8x84xf32>, vector<8x84xf32> -> vector<8x84xf32>
      %142 = vector.extract_strided_slice %111 {offsets = [3, 0, 0], sizes = [1, 84, 30], strides = [1, 1, 1]} : vector<5x84x30xf32> to vector<1x84x30xf32>
      %143 = vector.shape_cast %142 : vector<1x84x30xf32> to vector<84x30xf32>
      %cst_84 = arith.constant dense<0.000000e+00> : vector<8x30xf32>
      %144 = tpu.matmul %141, %143, %cst_84 {dimension_numbers = #tpu.dot_dimension_numbers<[1], [0], [0], [1], [0, 0, 1, 1], [], []>} : vector<8x84xf32>, vector<84x30xf32>, vector<8x30xf32> -> vector<8x30xf32>
      %145 = arith.addf %138, %144 : vector<8x30xf32>
      %146 = vector.extract_strided_slice %107 {offsets = [4, 0, 0], sizes = [1, 8, 8], strides = [1, 1, 1]} : vector<5x8x8xf32> to vector<1x8x8xf32>
      %147 = vector.shape_cast %146 : vector<1x8x8xf32> to vector<8x8xf32>
      %cst_85 = arith.constant dense<0.000000e+00> : vector<8x84xf32>
      %148 = tpu.matmul %147, %116, %cst_85 {dimension_numbers = #tpu.dot_dimension_numbers<[1], [0], [0], [1], [0, 0, 1, 1], [], []>} : vector<8x8xf32>, vector<8x84xf32>, vector<8x84xf32> -> vector<8x84xf32>
      %149 = vector.extract_strided_slice %111 {offsets = [4, 0, 0], sizes = [1, 84, 30], strides = [1, 1, 1]} : vector<5x84x30xf32> to vector<1x84x30xf32>
      %150 = vector.shape_cast %149 : vector<1x84x30xf32> to vector<84x30xf32>
      %cst_86 = arith.constant dense<0.000000e+00> : vector<8x30xf32>
      %151 = tpu.matmul %148, %150, %cst_86 {dimension_numbers = #tpu.dot_dimension_numbers<[1], [0], [0], [1], [0, 0, 1, 1], [], []>} : vector<8x84xf32>, vector<84x30xf32>, vector<8x30xf32> -> vector<8x30xf32>
      %152 = arith.addf %145, %151 : vector<8x30xf32>
      %153 = vector.broadcast %108 : vector<8x1xf32> to vector<8x30xf32>
      %154 = arith.addf %152, %153 : vector<8x30xf32>
      %cst_87 = arith.constant 0.000000e+00 : f32
      %155 = vector.broadcast %cst_87 : f32 to vector<8x30xf32>
      %156 = arith.maximumf %154, %155 : vector<8x30xf32>
      %157 = vector.broadcast %109 : vector<8x1xf32> to vector<8x30xf32>
      %158 = arith.mulf %156, %157 : vector<8x30xf32>
      %159 = vector.broadcast %110 : vector<8x1xf32> to vector<8x30xf32>
      %160 = arith.addf %158, %159 : vector<8x30xf32>
      %c0_88 = arith.constant 0 : index
      %c0_89 = arith.constant 0 : index
      %161 = vector.load %arg48[%c0_88, %c0_89] : memref<64x30xf32, #tpu.memory_space<vmem>>, vector<64x30xf32>
      %c0_90 = arith.constant 0 : index
      %c0_91 = arith.constant 0 : index
      %162 = vector.load %arg49[%c0_90, %c0_91] : memref<8x64xf32, #tpu.memory_space<vmem>>, vector<8x64xf32>
      %c0_92 = arith.constant 0 : index
      %c0_93 = arith.constant 0 : index
      %163 = vector.load %arg50[%c0_92, %c0_93] : memref<30x6xf32, #tpu.memory_space<vmem>>, vector<30x6xf32>
      %c0_94 = arith.constant 0 : index
      %c0_95 = arith.constant 0 : index
      %164 = vector.load %arg51[%c0_94, %c0_95] : memref<8x1xf32, #tpu.memory_space<vmem>>, vector<8x1xf32>
      %165 = tpu.concatenate %160, %160, %160, %160, %160, %160, %160, %160 in 0 : vector<8x30xf32>, vector<8x30xf32>, vector<8x30xf32>, vector<8x30xf32>, vector<8x30xf32>, vector<8x30xf32>, vector<8x30xf32>, vector<8x30xf32> -> vector<64x30xf32>
      %166 = arith.mulf %165, %161 : vector<64x30xf32>
      %cst_96 = arith.constant dense<0.000000e+00> : vector<64x6xf32>
      %167 = tpu.matmul %166, %163, %cst_96 {dimension_numbers = #tpu.dot_dimension_numbers<[1], [0], [0], [1], [0, 0, 1, 1], [], []>} : vector<64x30xf32>, vector<30x6xf32>, vector<64x6xf32> -> vector<64x6xf32>
      %cst_97 = arith.constant dense<0.000000e+00> : vector<8x6xf32>
      %168 = tpu.matmul %162, %167, %cst_97 {dimension_numbers = #tpu.dot_dimension_numbers<[1], [0], [0], [1], [0, 0, 1, 1], [], []>} : vector<8x64xf32>, vector<64x6xf32>, vector<8x6xf32> -> vector<8x6xf32>
      %169 = vector.broadcast %164 : vector<8x1xf32> to vector<8x6xf32>
      %170 = arith.addf %168, %169 : vector<8x6xf32>
      %c0_98 = arith.constant 0 : index
      %c0_99 = arith.constant 0 : index
      %c0_100 = arith.constant 0 : index
      %171 = vector.load %arg52[%c0_98, %c0_99, %c0_100] : memref<1x8x6xf32, #tpu.memory_space<vmem>>, vector<1x8x6xf32>
      %172 = vector.shape_cast %171 : vector<1x8x6xf32> to vector<8x6xf32>
      %173 = vector.shape_cast %170 : vector<8x6xf32> to vector<1x8x6xf32>
      tpu.vector_store %arg52[%c0_98, %c0_99, %c0_100], %173 {strides = array<i32>} : memref<1x8x6xf32, #tpu.memory_space<vmem>>, vector<1x8x6xf32>,
    } else {
    }
    return
  }
  func.func @transform_0(%arg0: i32) -> (i32, i32) {
    %c0_i32 = arith.constant 0 : i32
    %c0_i32_0 = arith.constant 0 : i32
    %c0_i32_1 = arith.constant 0 : i32
    return %c0_i32, %c0_i32_0 : i32, i32
  }
  func.func @transform_1(%arg0: i32) -> (i32, i32) {
    %c0_i32 = arith.constant 0 : i32
    %c0_i32_0 = arith.constant 0 : i32
    %c0_i32_1 = arith.constant 0 : i32
    return %c0_i32, %c0_i32_0 : i32, i32
  }
  func.func @transform_2(%arg0: i32) -> (i32, i32) {
    %c0_i32 = arith.constant 0 : i32
    %c0_i32_0 = arith.constant 0 : i32
    %c0_i32_1 = arith.constant 0 : i32
    return %c0_i32, %c0_i32_0 : i32, i32
  }
  func.func @transform_3(%arg0: i32) -> (i32, i32, i32) {
    %c0_i32 = arith.constant 0 : i32
    %c0_i32_0 = arith.constant 0 : i32
    %c0_i32_1 = arith.constant 0 : i32
    %c0_i32_2 = arith.constant 0 : i32
    return %c0_i32, %c0_i32_0, %c0_i32_1 : i32, i32, i32
  }
  func.func @transform_4(%arg0: i32) -> (i32, i32) {
    %c0_i32 = arith.constant 0 : i32
    %c0_i32_0 = arith.constant 0 : i32
    %c0_i32_1 = arith.constant 0 : i32
    return %c0_i32, %c0_i32_0 : i32, i32
  }
  func.func @transform_5(%arg0: i32) -> (i32, i32) {
    %c0_i32 = arith.constant 0 : i32
    %c0_i32_0 = arith.constant 0 : i32
    %c0_i32_1 = arith.constant 0 : i32
    return %c0_i32, %c0_i32_0 : i32, i32
  }
  func.func @transform_6(%arg0: i32) -> (i32, i32) {
    %c0_i32 = arith.constant 0 : i32
    %c0_i32_0 = arith.constant 0 : i32
    %c0_i32_1 = arith.constant 0 : i32
    return %c0_i32, %c0_i32_0 : i32, i32
  }
  func.func @transform_7(%arg0: i32) -> (i32, i32, i32) {
    %c0_i32 = arith.constant 0 : i32
    %c0_i32_0 = arith.constant 0 : i32
    %c0_i32_1 = arith.constant 0 : i32
    %c0_i32_2 = arith.constant 0 : i32
    return %c0_i32, %c0_i32_0, %c0_i32_1 : i32, i32, i32
  }
  func.func @transform_8(%arg0: i32) -> (i32, i32) {
    %c0_i32 = arith.constant 0 : i32
    %c0_i32_0 = arith.constant 0 : i32
    %c0_i32_1 = arith.constant 0 : i32
    return %c0_i32, %c0_i32_0 : i32, i32
  }
  func.func @transform_9(%arg0: i32) -> (i32, i32) {
    %c0_i32 = arith.constant 0 : i32
    %c0_i32_0 = arith.constant 0 : i32
    %c0_i32_1 = arith.constant 0 : i32
    return %c0_i32, %c0_i32_0 : i32, i32
  }
  func.func @transform_10(%arg0: i32) -> (i32, i32, i32) {
    %c0_i32 = arith.constant 0 : i32
    %c0_i32_0 = arith.constant 0 : i32
    %c0_i32_1 = arith.constant 0 : i32
    %c0_i32_2 = arith.constant 0 : i32
    return %c0_i32, %c0_i32_0, %c0_i32_1 : i32, i32, i32
  }
  func.func @transform_11(%arg0: i32) -> (i32, i32) {
    %c0_i32 = arith.constant 0 : i32
    %c0_i32_0 = arith.constant 0 : i32
    %c0_i32_1 = arith.constant 0 : i32
    return %c0_i32, %c0_i32_0 : i32, i32
  }
  func.func @transform_12(%arg0: i32) -> (i32, i32) {
    %c0_i32 = arith.constant 0 : i32
    %c0_i32_0 = arith.constant 0 : i32
    %c0_i32_1 = arith.constant 0 : i32
    return %c0_i32, %c0_i32_0 : i32, i32
  }
  func.func @transform_13(%arg0: i32) -> (i32, i32) {
    %c0_i32 = arith.constant 0 : i32
    %c0_i32_0 = arith.constant 0 : i32
    %c0_i32_1 = arith.constant 0 : i32
    return %c0_i32, %c0_i32_0 : i32, i32
  }
  func.func @transform_14(%arg0: i32) -> (i32, i32, i32) {
    %c0_i32 = arith.constant 0 : i32
    %c0_i32_0 = arith.constant 0 : i32
    %c0_i32_1 = arith.constant 0 : i32
    %c0_i32_2 = arith.constant 0 : i32
    return %c0_i32, %c0_i32_0, %c0_i32_1 : i32, i32, i32
  }
  func.func @transform_15(%arg0: i32) -> (i32, i32) {
    %c0_i32 = arith.constant 0 : i32
    %c0_i32_0 = arith.constant 0 : i32
    %c0_i32_1 = arith.constant 0 : i32
    return %c0_i32, %c0_i32_0 : i32, i32
  }
  func.func @transform_16(%arg0: i32) -> (i32, i32) {
    %c0_i32 = arith.constant 0 : i32
    %c0_i32_0 = arith.constant 0 : i32
    %c0_i32_1 = arith.constant 0 : i32
    return %c0_i32, %c0_i32_0 : i32, i32
  }
  func.func @transform_17(%arg0: i32) -> (i32, i32, i32) {
    %c0_i32 = arith.constant 0 : i32
    %c0_i32_0 = arith.constant 0 : i32
    %c0_i32_1 = arith.constant 0 : i32
    %c0_i32_2 = arith.constant 0 : i32
    return %c0_i32, %c0_i32_0, %c0_i32_1 : i32, i32, i32
  }
  func.func @transform_18(%arg0: i32) -> (i32, i32) {
    %c0_i32 = arith.constant 0 : i32
    %c0_i32_0 = arith.constant 0 : i32
    %c0_i32_1 = arith.constant 0 : i32
    return %c0_i32, %c0_i32_0 : i32, i32
  }
  func.func @transform_19(%arg0: i32) -> (i32, i32) {
    %c0_i32 = arith.constant 0 : i32
    %c0_i32_0 = arith.constant 0 : i32
    %c0_i32_1 = arith.constant 0 : i32
    return %c0_i32, %c0_i32_0 : i32, i32
  }
  func.func @transform_20(%arg0: i32) -> (i32, i32) {
    %c0_i32 = arith.constant 0 : i32
    %c0_i32_0 = arith.constant 0 : i32
    %c0_i32_1 = arith.constant 0 : i32
    return %c0_i32, %c0_i32_0 : i32, i32
  }
  func.func @transform_21(%arg0: i32) -> (i32, i32, i32) {
    %c0_i32 = arith.constant 0 : i32
    %c0_i32_0 = arith.constant 0 : i32
    %c0_i32_1 = arith.constant 0 : i32
    %c0_i32_2 = arith.constant 0 : i32
    return %c0_i32, %c0_i32_0, %c0_i32_1 : i32, i32, i32
  }
  func.func @transform_22(%arg0: i32) -> (i32, i32) {
    %c0_i32 = arith.constant 0 : i32
    %c0_i32_0 = arith.constant 0 : i32
    %c0_i32_1 = arith.constant 0 : i32
    return %c0_i32, %c0_i32_0 : i32, i32
  }
  func.func @transform_23(%arg0: i32) -> (i32, i32) {
    %c0_i32 = arith.constant 0 : i32
    %c0_i32_0 = arith.constant 0 : i32
    %c0_i32_1 = arith.constant 0 : i32
    return %c0_i32, %c0_i32_0 : i32, i32
  }
  func.func @transform_24(%arg0: i32) -> (i32, i32) {
    %c0_i32 = arith.constant 0 : i32
    %c0_i32_0 = arith.constant 0 : i32
    %c0_i32_1 = arith.constant 0 : i32
    return %c0_i32, %c0_i32_0 : i32, i32
  }
  func.func @transform_25(%arg0: i32) -> (i32, i32) {
    %c0_i32 = arith.constant 0 : i32
    %c0_i32_0 = arith.constant 0 : i32
    %c0_i32_1 = arith.constant 0 : i32
    return %c0_i32, %c0_i32_0 : i32, i32
  }
  func.func @transform_26(%arg0: i32) -> (i32, i32) {
    %c0_i32 = arith.constant 0 : i32
    %c0_i32_0 = arith.constant 0 : i32
    %c0_i32_1 = arith.constant 0 : i32
    return %c0_i32, %c0_i32_0 : i32, i32
  }
  func.func @transform_27(%arg0: i32) -> (i32, i32) {
    %c0_i32 = arith.constant 0 : i32
    %c0_i32_0 = arith.constant 0 : i32
    %c0_i32_1 = arith.constant 0 : i32
    return %c0_i32, %c0_i32_0 : i32, i32
  }
  func.func @transform_28(%arg0: i32) -> (i32, i32, i32) {
    %c0_i32 = arith.constant 0 : i32
    %c0_i32_0 = arith.constant 0 : i32
    %c0_i32_1 = arith.constant 0 : i32
    %c0_i32_2 = arith.constant 0 : i32
    return %c0_i32, %c0_i32_0, %c0_i32_1 : i32, i32, i32
  }
  func.func @transform_29(%arg0: i32) -> (i32, i32) {
    %c0_i32 = arith.constant 0 : i32
    %c0_i32_0 = arith.constant 0 : i32
    %c0_i32_1 = arith.constant 0 : i32
    return %c0_i32, %c0_i32_0 : i32, i32
  }
  func.func @transform_30(%arg0: i32) -> (i32, i32) {
    %c0_i32 = arith.constant 0 : i32
    %c0_i32_0 = arith.constant 0 : i32
    %c0_i32_1 = arith.constant 0 : i32
    return %c0_i32, %c0_i32_0 : i32, i32
  }
  func.func @transform_31(%arg0: i32) -> (i32, i32) {
    %c0_i32 = arith.constant 0 : i32
    %c0_i32_0 = arith.constant 0 : i32
    %c0_i32_1 = arith.constant 0 : i32
    return %c0_i32, %c0_i32_0 : i32, i32
  }
  func.func @transform_32(%arg0: i32) -> (i32, i32, i32) {
    %c0_i32 = arith.constant 0 : i32
    %c0_i32_0 = arith.constant 0 : i32
    %c0_i32_1 = arith.constant 0 : i32
    %c0_i32_2 = arith.constant 0 : i32
    return %c0_i32, %c0_i32_0, %c0_i32_1 : i32, i32, i32
  }
  func.func @transform_33(%arg0: i32) -> (i32, i32) {
    %c0_i32 = arith.constant 0 : i32
    %c0_i32_0 = arith.constant 0 : i32
    %c0_i32_1 = arith.constant 0 : i32
    return %c0_i32, %c0_i32_0 : i32, i32
  }
  func.func @transform_34(%arg0: i32) -> (i32, i32) {
    %c0_i32 = arith.constant 0 : i32
    %c0_i32_0 = arith.constant 0 : i32
    %c0_i32_1 = arith.constant 0 : i32
    return %c0_i32, %c0_i32_0 : i32, i32
  }
  func.func @transform_35(%arg0: i32) -> (i32, i32, i32) {
    %c0_i32 = arith.constant 0 : i32
    %c0_i32_0 = arith.constant 0 : i32
    %c0_i32_1 = arith.constant 0 : i32
    %c0_i32_2 = arith.constant 0 : i32
    return %c0_i32, %c0_i32_0, %c0_i32_1 : i32, i32, i32
  }
  func.func @transform_36(%arg0: i32) -> (i32, i32) {
    %c0_i32 = arith.constant 0 : i32
    %c0_i32_0 = arith.constant 0 : i32
    %c0_i32_1 = arith.constant 0 : i32
    return %c0_i32, %c0_i32_0 : i32, i32
  }
  func.func @transform_37(%arg0: i32) -> (i32, i32) {
    %c0_i32 = arith.constant 0 : i32
    %c0_i32_0 = arith.constant 0 : i32
    %c0_i32_1 = arith.constant 0 : i32
    return %c0_i32, %c0_i32_0 : i32, i32
  }
  func.func @transform_38(%arg0: i32) -> (i32, i32) {
    %c0_i32 = arith.constant 0 : i32
    %c0_i32_0 = arith.constant 0 : i32
    %c0_i32_1 = arith.constant 0 : i32
    return %c0_i32, %c0_i32_0 : i32, i32
  }
  func.func @transform_39(%arg0: i32) -> (i32, i32, i32) {
    %c0_i32 = arith.constant 0 : i32
    %c0_i32_0 = arith.constant 0 : i32
    %c0_i32_1 = arith.constant 0 : i32
    %c0_i32_2 = arith.constant 0 : i32
    return %c0_i32, %c0_i32_0, %c0_i32_1 : i32, i32, i32
  }
  func.func @transform_40(%arg0: i32) -> (i32, i32) {
    %c0_i32 = arith.constant 0 : i32
    %c0_i32_0 = arith.constant 0 : i32
    %c0_i32_1 = arith.constant 0 : i32
    return %c0_i32, %c0_i32_0 : i32, i32
  }
  func.func @transform_41(%arg0: i32) -> (i32, i32) {
    %c0_i32 = arith.constant 0 : i32
    %c0_i32_0 = arith.constant 0 : i32
    %c0_i32_1 = arith.constant 0 : i32
    return %c0_i32, %c0_i32_0 : i32, i32
  }
  func.func @transform_42(%arg0: i32) -> (i32, i32, i32) {
    %c0_i32 = arith.constant 0 : i32
    %c0_i32_0 = arith.constant 0 : i32
    %c0_i32_1 = arith.constant 0 : i32
    %c0_i32_2 = arith.constant 0 : i32
    return %c0_i32, %c0_i32_0, %c0_i32_1 : i32, i32, i32
  }
  func.func @transform_43(%arg0: i32) -> (i32, i32) {
    %c0_i32 = arith.constant 0 : i32
    %c0_i32_0 = arith.constant 0 : i32
    %c0_i32_1 = arith.constant 0 : i32
    return %c0_i32, %c0_i32_0 : i32, i32
  }
  func.func @transform_44(%arg0: i32) -> (i32, i32) {
    %c0_i32 = arith.constant 0 : i32
    %c0_i32_0 = arith.constant 0 : i32
    %c0_i32_1 = arith.constant 0 : i32
    return %c0_i32, %c0_i32_0 : i32, i32
  }
  func.func @transform_45(%arg0: i32) -> (i32, i32) {
    %c0_i32 = arith.constant 0 : i32
    %c0_i32_0 = arith.constant 0 : i32
    %c0_i32_1 = arith.constant 0 : i32
    return %c0_i32, %c0_i32_0 : i32, i32
  }
  func.func @transform_46(%arg0: i32) -> (i32, i32, i32) {
    %c0_i32 = arith.constant 0 : i32
    %c0_i32_0 = arith.constant 0 : i32
    %c0_i32_1 = arith.constant 0 : i32
    %c0_i32_2 = arith.constant 0 : i32
    return %c0_i32, %c0_i32_0, %c0_i32_1 : i32, i32, i32
  }
  func.func @transform_47(%arg0: i32) -> (i32, i32) {
    %c0_i32 = arith.constant 0 : i32
    %c0_i32_0 = arith.constant 0 : i32
    %c0_i32_1 = arith.constant 0 : i32
    return %c0_i32, %c0_i32_0 : i32, i32
  }
  func.func @transform_48(%arg0: i32) -> (i32, i32) {
    %c0_i32 = arith.constant 0 : i32
    %c0_i32_0 = arith.constant 0 : i32
    %c0_i32_1 = arith.constant 0 : i32
    return %c0_i32, %c0_i32_0 : i32, i32
  }
  func.func @transform_49(%arg0: i32) -> (i32, i32) {
    %c0_i32 = arith.constant 0 : i32
    %c0_i32_0 = arith.constant 0 : i32
    %c0_i32_1 = arith.constant 0 : i32
    return %c0_i32, %c0_i32_0 : i32, i32
  }
  func.func @transform_50(%arg0: i32) -> (i32, i32) {
    %c0_i32 = arith.constant 0 : i32
    %c0_i32_0 = arith.constant 0 : i32
    %c0_i32_1 = arith.constant 0 : i32
    return %c0_i32, %c0_i32_0 : i32, i32
  }
  func.func @transform_51(%arg0: i32) -> (i32, i32, i32) {
    %c0_i32 = arith.constant 0 : i32
    %c0_i32_0 = arith.constant 0 : i32
    %c0_i32_1 = arith.constant 0 : i32
    return %arg0, %c0_i32, %c0_i32_0 : i32, i32, i32
  }
}

</mosaic_0001>

<bundles_post_ra>
// kernel: multi_encoders_forward.1
= control target key start
LH: loop header
LB: loop body
LE: loop exit
PB: predicated region body
PF: predicated region fallthrough
CT: control target
= control target key end

     0   :  { %s7603_s6 = smov 1   ;;  %s7604_s10 = smov 2   ;;  %s9221_s0 = inlined_call_operand.smem [shape: u32[52], index: -1, kind: input, shape index: {}] }
   0x1   :  { %s7668_s5 = sld [smem:[%s9221_s0]]   ;;  %s7605_s14 = smov 3  }
   0x2   :  { %s7673_s9 = sld [smem:[%s9221_s0 + %s7603_s6]]   ;;  %s7606_s18 = smov 4  }
   0x3   :  { %s7678_s13 = sld [smem:[%s9221_s0 + %s7604_s10]]   ;;  %s7607_s22 = smov 5  }
   0x4   :  { %s7683_s17 = sld [smem:[%s9221_s0 + %s7605_s14]]   ;;  %s7608_s26 = smov 6  }
   0x5   :  { %s7688_s21 = sld [smem:[%s9221_s0 + %s7606_s18]]   ;;  %s7609_s30 = smov 7  }
   0x6   :  { %s7693_s25 = sld [smem:[%s9221_s0 + %s7607_s22]]   ;;  %s7610_s4 = smov 8  }
   0x7   :  { %9247 = sst [smem:[#allocation2_spill]] %s7668_s5  ;;  %s7611_s10 = smov 9  }
   0x8   :  { %s7698_s29 = sld [smem:[%s9221_s0 + %s7608_s26]]   ;;  %s7612_s15 = smov 10  }
   0x9   :  { %s7703_s3 = sld [smem:[%s9221_s0 + %s7609_s30]]   ;;  %s7613_s20 = smov 11  }
   0xa   :  { %s7708_s8 = sld [smem:[%s9221_s0 + %s7610_s4]]   ;;  %s7614_s26 = smov 12  }
   0xb   :  { %s7713_s14 = sld [smem:[%s9221_s0 + %s7611_s10]]   ;;  %s7615_s1 = smov 13  }
   0xc   :  { %s7718_s19 = sld [smem:[%s9221_s0 + %s7612_s15]]   ;;  %s7616_s7 = smov 14  }
   0xd   :  { %s7723_s24 = sld [smem:[%s9221_s0 + %s7613_s20]]   ;;  %s7617_s15 = smov 15  }
   0xe   :  { %9248 = sst [smem:[#allocation3_spill]] %s7698_s29  ;;  %s7618_s22 = smov 16  }
   0xf   :  { %9249 = sst [smem:[#allocation4_spill]] %s7703_s3  ;;  %s7619_s28 = smov 17  }
  0x10   :  { %9250 = sst [smem:[#allocation5_spill]] %s7708_s8 }
  0x11   :  { %s7728_s30 = sld [smem:[%s9221_s0 + %s7614_s26]]  }
  0x12   :  { %9251 = sst [smem:[#allocation6_spill]] %s7718_s19 }
  0x13   :  { %s7733_s6 = sld [smem:[%s9221_s0 + %s7615_s1]]  }
  0x14   :  { %s7738_s12 = sld [smem:[%s9221_s0 + %s7616_s7]]   ;;  %s7620_s7 = smov 18  }
  0x15   :  { %s7743_s20 = sld [smem:[%s9221_s0 + %s7617_s15]]   ;;  %s7621_s15 = smov 19  }
  0x16   :  { %s7748_s27 = sld [smem:[%s9221_s0 + %s7618_s22]]   ;;  %s7622_s22 = smov 20  }
  0x17   :  { %s7753_s4 = sld [smem:[%s9221_s0 + %s7619_s28]]   ;;  %s7623_s28 = smov 21  }
  0x18   :  { %s7758_s19 = sld [smem:[%s9221_s0 + %s7620_s7]]   ;;  %s7624_s7 = smov 22  }
  0x19   :  { %9252 = sst [smem:[#allocation7_spill]] %s7733_s6 }
  0x1a   :  { %9253 = sst [smem:[#allocation8_spill]] %s7738_s12 }
  0x1b   :  { %9254 = sst [smem:[#allocation9_spill]] %s7743_s20 }
  0x1c   :  { %s7763_s20 = sld [smem:[%s9221_s0 + %s7621_s15]]   ;;  %s7625_s15 = smov 23  }
  0x1d   :  { %9255 = sst [smem:[#allocation10_spill]] %s7753_s4 }
  0x1e   :  { %9256 = sst [smem:[#allocation11_spill]] %s7758_s19 }
  0x1f   :  { %s7768_s12 = sld [smem:[%s9221_s0 + %s7622_s22]]   ;;  %s7626_s22 = smov 24  }
  0x20   :  { %s7773_s4 = sld [smem:[%s9221_s0 + %s7623_s28]]   ;;  %s7627_s28 = smov 25  }
  0x21   :  { %s7778_s8 = sld [smem:[%s9221_s0 + %s7624_s7]]   ;;  %s7628_s7 = smov 26  }
  0x22   :  { %s7783_s19 = sld [smem:[%s9221_s0 + %s7625_s15]]   ;;  %s7629_s15 = smov 27  }
  0x25   :  { %9257 = sst [smem:[#allocation12_spill]] %s7768_s12 }
  0x26   :  { %9258 = sst [smem:[#allocation13_spill]] %s7773_s4 }
  0x27   :  { %9259 = sst [smem:[#allocation14_spill]] %s7778_s8 }
  0x28   :  { %9260 = sst [smem:[#allocation15_spill]] %s7783_s19 }
  0x29   :  { %s7788_s12 = sld [smem:[%s9221_s0 + %s7626_s22]]   ;;  %s7630_s22 = smov 28  }
  0x2a   :  { %s7793_s4 = sld [smem:[%s9221_s0 + %s7627_s28]]   ;;  %s7631_s28 = smov 29  }
  0x2b   :  { %s7798_s8 = sld [smem:[%s9221_s0 + %s7628_s7]]   ;;  %s7632_s7 = smov 30  }
  0x2c   :  { %s7803_s19 = sld [smem:[%s9221_s0 + %s7629_s15]]   ;;  %s7633_s15 = smov 31  }
  0x2d   :  { %s7813_s29 = sld [smem:[%s9221_s0 + %s7631_s28]]   ;;  %s7635_s28 = smov 33  }
  0x2f   :  { %9261 = sst [smem:[#allocation16_spill]] %s7788_s12 }
  0x30   :  { %9262 = sst [smem:[#allocation17_spill]] %s7793_s4 }
  0x31   :  { %9263 = sst [smem:[#allocation18_spill]] %s7798_s8 }
  0x32   :  { %9264 = sst [smem:[#allocation19_spill]] %s7803_s19 }
  0x33   :  { %s7808_s12 = sld [smem:[%s9221_s0 + %s7630_s22]]   ;;  %s7634_s22 = smov 32  }
  0x34   :  { %9266 = sst [smem:[#allocation21_spill]] %s7813_s29 }
  0x35   :  { %s7818_s8 = sld [smem:[%s9221_s0 + %s7632_s7]]   ;;  %s7636_s7 = smov 34  }
  0x36   :  { %s7823_s19 = sld [smem:[%s9221_s0 + %s7633_s15]]   ;;  %s7637_s15 = smov 35  }
  0x37   :  { %s7833_s29 = sld [smem:[%s9221_s0 + %s7635_s28]]   ;;  %s7639_s28 = smov 37  }
  0x39   :  { %9265 = sst [smem:[#allocation20_spill]] %s7808_s12 }
  0x3a   :  { %s7828_s12 = sld [smem:[%s9221_s0 + %s7634_s22]]   ;;  %s7638_s22 = smov 36  }
  0x3b   :  { %9267 = sst [smem:[#allocation22_spill]] %s7818_s8 }
  0x3c   :  { %9268 = sst [smem:[#allocation23_spill]] %s7823_s19 }
  0x3d   :  { %9270 = sst [smem:[#allocation25_spill]] %s7833_s29 }
  0x3e   :  { %s7838_s8 = sld [smem:[%s9221_s0 + %s7636_s7]]   ;;  %s7640_s7 = smov 38  }
  0x3f   :  { %s7843_s19 = sld [smem:[%s9221_s0 + %s7637_s15]]   ;;  %s7641_s15 = smov 39  }
  0x40   :  { %9269 = sst [smem:[#allocation24_spill]] %s7828_s12 }
  0x41   :  { %s7848_s12 = sld [smem:[%s9221_s0 + %s7638_s22]]   ;;  %s7642_s22 = smov 40  }
  0x42   :  { %s7853_s29 = sld [smem:[%s9221_s0 + %s7639_s28]]   ;;  %s7643_s28 = smov 41  }
  0x44   :  { %9271 = sst [smem:[#allocation26_spill]] %s7838_s8 }
  0x45   :  { %9272 = sst [smem:[#allocation27_spill]] %s7843_s19 }
  0x46   :  { %s7858_s8 = sld [smem:[%s9221_s0 + %s7640_s7]]   ;;  %s7644_s7 = smov 42  }
  0x47   :  { %9273 = sst [smem:[#allocation28_spill]] %s7848_s12 }
  0x48   :  { %9274 = sst [smem:[#allocation29_spill]] %s7853_s29 }
  0x49   :  { %s7863_s19 = sld [smem:[%s9221_s0 + %s7641_s15]]   ;;  %s7645_s15 = smov 43  }
  0x4a   :  { %s7868_s12 = sld [smem:[%s9221_s0 + %s7642_s22]]   ;;  %s7646_s22 = smov 44  }
  0x4b   :  { %s7873_s29 = sld [smem:[%s9221_s0 + %s7643_s28]]   ;;  %s7647_s28 = smov 45  }
  0x4c   :  { %9275 = sst [smem:[#allocation30_spill]] %s7858_s8 }
  0x4d   :  { %s7878_s8 = sld [smem:[%s9221_s0 + %s7644_s7]]   ;;  %s7648_s7 = smov 46  }
  0x4f   :  { %9276 = sst [smem:[#allocation31_spill]] %s7863_s19 }
  0x50   :  { %9277 = sst [smem:[#allocation32_spill]] %s7868_s12 }
  0x51   :  { %9278 = sst [smem:[#allocation33_spill]] %s7873_s29 }
  0x52   :  { %s7883_s19 = sld [smem:[%s9221_s0 + %s7645_s15]]   ;;  %s7649_s15 = smov 47  }
  0x53   :  { %9279 = sst [smem:[#allocation34_spill]] %s7878_s8 }
  0x54   :  { %s7888_s12 = sld [smem:[%s9221_s0 + %s7646_s22]]   ;;  %s7650_s22 = smov 48  }
  0x55   :  { %s7893_s29 = sld [smem:[%s9221_s0 + %s7647_s28]]   ;;  %s7651_s28 = smov 49  }
  0x56   :  { %s7898_s8 = sld [smem:[%s9221_s0 + %s7648_s7]]   ;;  %s7652_s7 = smov 50  }
  0x58   :  { %9280 = sst [smem:[#allocation35_spill]] %s7883_s19 }
  0x59   :  { %s7903_s19 = sld [smem:[%s9221_s0 + %s7649_s15]]   ;;  %s7653_s15 = smov 51  }
  0x5a   :  { %9281 = sst [smem:[#allocation36_spill]] %s7888_s12 }
  0x5b   :  { %9282 = sst [smem:[#allocation37_spill]] %s7893_s29 }
  0x5c   :  { %9283 = sst [smem:[#allocation38_spill]] %s7898_s8 }
  0x5d   :  { %s7908_s12 = sld [smem:[%s9221_s0 + %s7650_s22]]   ;;  %s7925_s22 = smov 0  }
  0x5e   :  { %s7913_s29 = sld [smem:[%s9221_s0 + %s7651_s28]]  }
  0x5f   :  { %9284 = sst [smem:[#allocation39_spill]] %s7903_s19 }
  0x60   :  { %s7918_s8 = sld [smem:[%s9221_s0 + %s7652_s7]]  }
  0x61   :  { %s7923_s19 = sld [smem:[%s9221_s0 + %s7653_s15]]  }
  0x62 LB: > { %s9285_s6 = sld [smem:[#allocation7_spill]]  ;;  %s7931_s23 = sadd.s32 4294967295, %s7601_s22   ;;  %s7601_s22 = sphi %s7925_s22, %s113_s22  }
  0x63   : > { %s9286_s3 = sld [smem:[#allocation4_spill]]  ;;  %p6889_p0 = scmp.ge.s32.totalorder %s7601_s22, 1 }
  0x64   : > { %p1379_p1 = scmp.lt.s32.totalorder %s7601_s22, 3 }
  0x66   : > { %p1380_p2 = pnand %p6889_p0, %p1379_p1 }
  0x67   : > { %s9287_s5 = sld [smem:[#allocation2_spill]] (!%p1380_p2)  ;;  %p1493_p3 = scmp.lt.s32.totalorder (!%p1380_p2), %s7931_s23, 1 }
  0x68   : > { %1383 = sbr.rel (%p1380_p2) target bundleno = 6221 (0x184d), region = 224  ;;  %p6891_p4 = scmp.ne.s32.totalorder (!%p1380_p2), %s7931_s23, 0 }
  0x6d   : > { %v7937_v0 = vld [vmem:[%s9287_s5] sm:$0xff]  ;;  %s1494_s0 = scalar_select %p1493_p3, %s7931_s23, 1 }
  0x6e   : > { %1501 = sbr.rel (%p6891_p4) target bundleno = 2962 (0xb92), region = 228  ;;  %s9288_s4 = sld [smem:[#allocation17_spill]] (!%p6891_p4) }
  0x6f   : > { %s6890_s26 = sshll.u32 %s1494_s0, 3  ;;  %s9289_s1 = sld [smem:[#allocation3_spill]] (!%p6891_p4) }
  0x70   : > { %s7941_s28 = scalar_lea.vmem %s7923_s19, %s6890_s26  ;;  %s9290_s2 = sld [smem:[#allocation11_spill]] (!%p6891_p4) }
  0x71   : > { %s9291_s7 = sld [smem:[#allocation12_spill]] (!%p6891_p4) }
  0x72   : > { %s9292_s10 = sld [smem:[#allocation5_spill]] (!%p6891_p4) }
  0x73   : > { %v1672_v1 = vcombine.high %v7937_v0, %v7937_v0  ;;  %vm1677_vm0 = vcmask 1043456   ;;  %v1503_v2 = vld [vmem:[%s7678_s13] sm:$0xff]  ;;  %v7654_v3 = vmov 0.0   ;;  %vm1673_vm1 = vcmask 31744   ;;  %v2247_v7 = vld [vmem:[%s7713_s14 + $0x8] sm:$0xff]  ;;  %v1593_v23 = vld [vmem:[%s9286_s3 + $0x298] sm:$0xff] }
  0x74   : > { %1746 = vmatprep.mubr.f32.mxu0 %v7654_v3  ;;  %v1502_v4 = vld [vmem:[%s7673_s9] sm:$0xff]  ;;  %1823 = vmatprep.mubr.f32.mxu1 %v7654_v3  ;;  %v7655_v5 = vmov 0   ;;  %v2255_v8 = vld [vmem:[%s7723_s24 + $0x8] sm:$0xff]  ;;  %vm1755_vm2 = vcmask 64512   ;;  %v1541_v24 = vld [vmem:[%s9286_s3 + $0xf8] sm:$0xff]  ;;  %vm1904_vm3 = vcmask 621568  }
  0x75   : > { %6892 = vmatprep.subr.msk.mxu0 %vm1677_vm0, %v1672_v1  ;;  %7591 = vset.pattern.permute.xlu0 %v7655_v5  ;;  %v1507_v6 = vld [vmem:[%s7688_s21] sm:$0xff]  ;;  %v2257_v9 = vld [vmem:[%s7728_s30 + $0x8] sm:$0xff]  ;;  %v1592_v25 = vld [vmem:[%s9286_s3 + $0x290] sm:$0xff]  ;;  %s9293_s11 = sld [smem:[#allocation8_spill]]  ;;  %vm2429_vm4 = vcmask 130048   ;;  %vm2596_vm5 = vcmask 523264  }
  0x76   : > { %6893 = vmatpush1.msk.msra.mxu0 %vm1677_vm0, %v7937_v0  ;;  %1668 = vperm.xlu0 %7591, %v1503_v2   ;;  %v2259_v10 = vld [vmem:[%s9285_s6 + $0x8] sm:$0xff]  ;;  %v2964_v11 = vld [vmem:[%s7748_s27] sm:$0xff]  ;;  %v1540_v26 = vld [vmem:[%s9286_s3 + $0xf0] sm:$0xff]  ;;  %s9294_s15 = sld [smem:[#allocation6_spill]]  ;;  %vm7656_vm6 = vmmov 0   ;;  %vm3236_vm7 = vcmask 1041408  }
  0x77   : > { %6894 = vmatmul.mubr.msk.f32.vlgmr.msra.gmra.mxu0 %vm1673_vm1, %v1502_v4  ;;  %7592 = vset.pattern.permute.xlu1 %v7655_v5  ;;  %v2969_v12 = vld [vmem:[%s7763_s20] sm:$0xff]  ;;  %v1505_v22 = vld [vmem:[%s7683_s17 + $0x8] sm:$0xff]  ;;  %v1589_v31 = vld [vmem:[%s9286_s3 + $0x278] sm:$0xff]  ;;  %s9295_s16 = sld [smem:[#allocation9_spill]]  ;;  %vm3232_vm8 = vcmask 736256   ;;  %vm3608_vm9 = vcmask 1045504  }
  0x78   : > { %1897 = vmatprep.mubr.f32.mxu0 %v7654_v3  ;;  %v3574_v13 = vld [vmem:[%s9288_s4] sm:$0xff]  ;;  %v1591_v27 = vld [vmem:[%s9286_s3 + $0x288] sm:$0xff]  ;;  %v1537_v32 = vld [vmem:[%s9286_s3 + $0xd8] sm:$0xff]  ;;  %s9296_s18 = sld [smem:[#allocation13_spill]]  ;;  %vm3583_vm10 = vcmask 637952   ;;  %vm3795_vm11 = vcmask 48128  }
  0x79   : > { %v1504_v21 = vld [vmem:[%s7683_s17] sm:$0xff]  ;;  %v1539_v28 = vld [vmem:[%s9286_s3 + $0xe8] sm:$0xff]  ;;  %v1588_v33 = vld [vmem:[%s9286_s3 + $0x270] sm:$0xff]  ;;  %s9297_s0 = sld [smem:[#allocation10_spill]] }
  0x7a   : > { %2223 = vperm.xlu0 %7591, %v1507_v6   ;;  %v1590_v29 = vld [vmem:[%s9286_s3 + $0x280] sm:$0xff]  ;;  %v1536_v34 = vld [vmem:[%s9286_s3 + $0xd0] sm:$0xff]  ;;  %v1587_v35 = vld [vmem:[%s9286_s3 + $0x268] sm:$0xff]  ;;  %s9298_s26 = sld [smem:[#allocation16_spill]] }
  0x7b   : > { %v1538_v30 = vld [vmem:[%s9286_s3 + $0xe0] sm:$0xff]  ;;  %v1535_v36 = vld [vmem:[%s9286_s3 + $0xc8] sm:$0xff]  ;;  %v1585_v39 = vld [vmem:[%s9286_s3 + $0x258] sm:$0xff] }
  0x7c   : > { %v1586_v37 = vld [vmem:[%s9286_s3 + $0x260] sm:$0xff]  ;;  %v1533_v40 = vld [vmem:[%s9286_s3 + $0xb8] sm:$0xff]  ;;  %v1584_v41 = vld [vmem:[%s9286_s3 + $0x250] sm:$0xff] }
  0x7d   : > { %v1534_v38 = vld [vmem:[%s9286_s3 + $0xc0] sm:$0xff]  ;;  %v1532_v42 = vld [vmem:[%s9286_s3 + $0xb0] sm:$0xff]  ;;  %v1583_v43 = vld [vmem:[%s9286_s3 + $0x248] sm:$0xff] }
  0x7e   : > { %2339 = vperm.xlu0 %7591, %v2247_v7   ;;  %v1531_v44 = vld [vmem:[%s9286_s3 + $0xa8] sm:$0xff]  ;;  %v1582_v45 = vld [vmem:[%s9286_s3 + $0x240] sm:$0xff]  ;;  %v1581_v47 = vld [vmem:[%s9286_s3 + $0x238] sm:$0xff] }
  0x7f   : > { %v1530_v46 = vld [vmem:[%s9286_s3 + $0xa0] sm:$0xff]  ;;  %v1529_v48 = vld [vmem:[%s9286_s3 + $0x98] sm:$0xff]  ;;  %v1580_v49 = vld [vmem:[%s9286_s3 + $0x230] sm:$0xff] }
  0x80   : > { %v1528_v50 = vld [vmem:[%s9286_s3 + $0x90] sm:$0xff]  ;;  %v1579_v51 = vld [vmem:[%s9286_s3 + $0x228] sm:$0xff]  ;;  %v1578_v53 = vld [vmem:[%s9286_s3 + $0x220] sm:$0xff] }
  0x81   : > { %v1527_v52 = vld [vmem:[%s9286_s3 + $0x88] sm:$0xff]  ;;  %v1526_v54 = vld [vmem:[%s9286_s3 + $0x80] sm:$0xff]  ;;  %v1577_v55 = vld [vmem:[%s9286_s3 + $0x218] sm:$0xff] }
  0x82   : > { %2932 = vperm.xlu0 %7591, %v2255_v8   ;;  %v1525_v56 = vld [vmem:[%s9286_s3 + $0x78] sm:$0xff]  ;;  %v1576_v57 = vld [vmem:[%s9286_s3 + $0x210] sm:$0xff]  ;;  %v1575_v59 = vld [vmem:[%s9286_s3 + $0x208] sm:$0xff] }
  0x83   : > { %v1524_v58 = vld [vmem:[%s9286_s3 + $0x70] sm:$0xff]  ;;  %v1523_v60 = vld [vmem:[%s9286_s3 + $0x68] sm:$0xff]  ;;  %v1574_v61 = vld [vmem:[%s9286_s3 + $0x200] sm:$0xff] }
  0x84   : > { %v1522_v62 = vld [vmem:[%s9286_s3 + $0x60] sm:$0xff]  ;;  %v1573_v63 = vld [vmem:[%s9286_s3 + $0x1f8] sm:$0xff]  ;;  %v1572_v2 = vld [vmem:[%s9286_s3 + $0x1f0] sm:$0xff] }
  0x85   : > { %v1521_v1 = vld [vmem:[%s9286_s3 + $0x58] sm:$0xff]  ;;  %v1520_v4 = vld [vmem:[%s9286_s3 + $0x50] sm:$0xff]  ;;  %v1571_v5 = vld [vmem:[%s9286_s3 + $0x1e8] sm:$0xff] }
  0x86   : > { %2946 = vperm.xlu0 %7591, %v2257_v9   ;;  %v1519_v6 = vld [vmem:[%s9286_s3 + $0x48] sm:$0xff]  ;;  %v1570_v7 = vld [vmem:[%s9286_s3 + $0x1e0] sm:$0xff]  ;;  %v1569_v9 = vld [vmem:[%s9286_s3 + $0x1d8] sm:$0xff] }
  0x87   : > { %v1518_v8 = vld [vmem:[%s9286_s3 + $0x40] sm:$0xff] }
  0x8a   : > { %2958 = vperm.xlu0 %7591, %v2259_v10   ;;  %v1517_v10 = vld [vmem:[%s9286_s3 + $0x38] sm:$0xff] }
  0x8e   : > { %3009 = vperm.xlu0 %7591, %v2964_v11   ;;  %v1568_v11 = vld [vmem:[%s9286_s3 + $0x1d0] sm:$0xff] }
  0x92   : > { %3545 = vperm.xlu0 %7591, %v2969_v12   ;;  %v1516_v12 = vld [vmem:[%s9286_s3 + $0x30] sm:$0xff] }
  0x96   : > { %3719 = vperm.xlu0 %7591, %v3574_v13   ;;  %v1567_v13 = vld [vmem:[%s9286_s3 + $0x1c8] sm:$0xff] }
  0xf1   : > { %v1669_v15 = vpop.permute.xlu0 %1668 }
 0x137   : > { %v1748_v14 = vpop.f32.mrf.mxu0 }
 0x138   : > { %v1749_v16 = vadd.f32 %v1748_v14, %v1669_v15  ;;  %v1515_v14 = vld [vmem:[%s9286_s3 + $0x28] sm:$0xff] }
 0x139   : > { %v1750_v17 = vpop.f32.mrf.mxu0 }
 0x13a   : > { %v1751_v18 = vadd.f32 %v1750_v17, %v1669_v15  ;;  %v7964_v20 = vmax.f32 %v1749_v16, 0.0  ;;  %v1566_v15 = vld [vmem:[%s9286_s3 + $0x1c0] sm:$0xff]  ;;  %v1565_v17 = vld [vmem:[%s9286_s3 + $0x1b8] sm:$0xff] }
 0x13b   : > { %v1514_v16 = vld [vmem:[%s9286_s3 + $0x20] sm:$0xff] }
 0x13c   : > { %v7962_v19 = vmax.f32 %v1751_v18, 0.0  ;;  %v1513_v18 = vld [vmem:[%s9286_s3 + $0x18] sm:$0xff] }
 0x13e   : > { %1789 = vmatprep.subr.mxu1 %v7962_v19  ;;  %1863 = vmatprep.subr.mxu0 %v7962_v19 }
 0x13f   : > { %1790 = vmatpush1.msra.mxu1 %v7964_v20  ;;  %1864 = vmatpush1.msra.mxu0 %v7964_v20 }
 0x140   : > { %6895 = vmatmul.mubr.msk.f32.vlgmr.msra.gmra.mxu1 %vm1755_vm2, %v1504_v21  ;;  %6896 = vmatmul.mubr.msk.f32.vlgmr.msra.gmra.mxu0 %vm1755_vm2, %v1505_v22  ;;  %v1564_v21 = vld [vmem:[%s9286_s3 + $0x1b0] sm:$0xff] }
 0x141   : > { %1914 = vmatprep.subr.mxu1 %v1593_v23  ;;  %1994 = vmatprep.subr.mxu0 %v1541_v24  ;;  %v1512_v22 = vld [vmem:[%s9286_s3 + $0x10] sm:$0xff]  ;;  %v1563_v23 = vld [vmem:[%s9286_s3 + $0x1a8] sm:$0xff] }
 0x142   : > { %1915 = vmatpush1.msra.mxu1 %v1592_v25  ;;  %1995 = vmatpush1.msra.mxu0 %v1540_v26  ;;  %v1511_v24 = vld [vmem:[%s9286_s3 + $0x8] sm:$0xff]  ;;  %v1562_v25 = vld [vmem:[%s9286_s3 + $0x1a0] sm:$0xff] }
 0x143   : > { %1916 = vmatprep.subr.mxu1 %v1591_v27  ;;  %1996 = vmatprep.subr.mxu0 %v1539_v28  ;;  %v1510_v26 = vld [vmem:[%s9286_s3] sm:$0xff]  ;;  %v1613_v27 = vld [vmem:[%s9286_s3 + $0x338] sm:$0xf] }
 0x144   : > { %1917 = vmatpush1.msra.mxu1 %v1590_v29  ;;  %1997 = vmatpush1.msra.mxu0 %v1538_v30  ;;  %v1561_v28 = vld [vmem:[%s9286_s3 + $0x198] sm:$0xf]  ;;  %v1612_v29 = vld [vmem:[%s9286_s3 + $0x330] sm:$0xf] }
 0x145   : > { %1918 = vmatprep.subr.mxu1 %v1589_v31  ;;  %1998 = vmatprep.subr.mxu0 %v1537_v32  ;;  %v1560_v30 = vld [vmem:[%s9286_s3 + $0x190] sm:$0xf]  ;;  %v1611_v31 = vld [vmem:[%s9286_s3 + $0x328] sm:$0xff] }
 0x146   : > { %1919 = vmatpush1.msra.mxu1 %v1588_v33  ;;  %1999 = vmatpush1.msra.mxu0 %v1536_v34  ;;  %v1559_v32 = vld [vmem:[%s9286_s3 + $0x188] sm:$0xff]  ;;  %v1610_v33 = vld [vmem:[%s9286_s3 + $0x320] sm:$0xff] }
 0x147   : > { %1920 = vmatprep.subr.mxu1 %v1587_v35  ;;  %2000 = vmatprep.subr.mxu0 %v1535_v36  ;;  %v1558_v34 = vld [vmem:[%s9286_s3 + $0x180] sm:$0xff]  ;;  %v1609_v35 = vld [vmem:[%s9286_s3 + $0x318] sm:$0xff] }
 0x148   : > { %1921 = vmatpush1.msra.mxu1 %v1586_v37  ;;  %2001 = vmatpush1.msra.mxu0 %v1534_v38  ;;  %v1557_v36 = vld [vmem:[%s9286_s3 + $0x178] sm:$0xff]  ;;  %v1608_v37 = vld [vmem:[%s9286_s3 + $0x310] sm:$0xff] }
 0x149   : > { %1922 = vmatprep.subr.mxu1 %v1585_v39  ;;  %2002 = vmatprep.subr.mxu0 %v1533_v40  ;;  %v1556_v38 = vld [vmem:[%s9286_s3 + $0x170] sm:$0xff]  ;;  %v1607_v39 = vld [vmem:[%s9286_s3 + $0x308] sm:$0xff] }
 0x14a   : > { %1923 = vmatpush1.msra.mxu1 %v1584_v41  ;;  %2003 = vmatpush1.msra.mxu0 %v1532_v42  ;;  %v1555_v40 = vld [vmem:[%s9286_s3 + $0x168] sm:$0xff]  ;;  %v1606_v41 = vld [vmem:[%s9286_s3 + $0x300] sm:$0xff] }
 0x14b   : > { %1924 = vmatprep.subr.mxu1 %v1583_v43  ;;  %2004 = vmatprep.subr.mxu0 %v1531_v44  ;;  %v1554_v42 = vld [vmem:[%s9286_s3 + $0x160] sm:$0xff]  ;;  %v1605_v43 = vld [vmem:[%s9286_s3 + $0x2f8] sm:$0xff] }
 0x14c   : > { %1925 = vmatpush1.msra.mxu1 %v1582_v45  ;;  %2005 = vmatpush1.msra.mxu0 %v1530_v46  ;;  %v1553_v44 = vld [vmem:[%s9286_s3 + $0x158] sm:$0xff]  ;;  %v1604_v45 = vld [vmem:[%s9286_s3 + $0x2f0] sm:$0xff] }
 0x14d   : > { %1926 = vmatprep.subr.mxu1 %v1581_v47  ;;  %2006 = vmatprep.subr.mxu0 %v1529_v48  ;;  %v1552_v46 = vld [vmem:[%s9286_s3 + $0x150] sm:$0xff]  ;;  %v1603_v47 = vld [vmem:[%s9286_s3 + $0x2e8] sm:$0xff] }
 0x14e   : > { %1927 = vmatpush1.msra.mxu1 %v1580_v49  ;;  %2007 = vmatpush1.msra.mxu0 %v1528_v50  ;;  %v1551_v48 = vld [vmem:[%s9286_s3 + $0x148] sm:$0xff]  ;;  %v1602_v49 = vld [vmem:[%s9286_s3 + $0x2e0] sm:$0xff] }
 0x14f   : > { %1928 = vmatprep.subr.mxu1 %v1579_v51  ;;  %2008 = vmatprep.subr.mxu0 %v1527_v52  ;;  %v1550_v50 = vld [vmem:[%s9286_s3 + $0x140] sm:$0xff]  ;;  %v1601_v51 = vld [vmem:[%s9286_s3 + $0x2d8] sm:$0xff] }
 0x150   : > { %1929 = vmatpush1.msra.mxu1 %v1578_v53  ;;  %2009 = vmatpush1.msra.mxu0 %v1526_v54  ;;  %v1549_v52 = vld [vmem:[%s9286_s3 + $0x138] sm:$0xff]  ;;  %v1600_v53 = vld [vmem:[%s9286_s3 + $0x2d0] sm:$0xff] }
 0x151   : > { %1930 = vmatprep.subr.mxu1 %v1577_v55  ;;  %2010 = vmatprep.subr.mxu0 %v1525_v56  ;;  %v1548_v54 = vld [vmem:[%s9286_s3 + $0x130] sm:$0xff]  ;;  %v1599_v55 = vld [vmem:[%s9286_s3 + $0x2c8] sm:$0xff] }
 0x152   : > { %1931 = vmatpush1.msra.mxu1 %v1576_v57  ;;  %2011 = vmatpush1.msra.mxu0 %v1524_v58  ;;  %v1547_v56 = vld [vmem:[%s9286_s3 + $0x128] sm:$0xff]  ;;  %v1598_v57 = vld [vmem:[%s9286_s3 + $0x2c0] sm:$0xff] }
 0x153   : > { %1932 = vmatprep.subr.mxu1 %v1575_v59  ;;  %2012 = vmatprep.subr.mxu0 %v1523_v60  ;;  %v1546_v58 = vld [vmem:[%s9286_s3 + $0x120] sm:$0xff]  ;;  %v1597_v59 = vld [vmem:[%s9286_s3 + $0x2b8] sm:$0xff]  ;;  %v1596_v60 = vld [vmem:[%s9286_s3 + $0x2b0] sm:$0xff] }
 0x154   : > { %1933 = vmatpush1.msra.mxu1 %v1574_v61  ;;  %2013 = vmatpush1.msra.mxu0 %v1522_v62  ;;  %v1595_v61 = vld [vmem:[%s9286_s3 + $0x2a8] sm:$0xff]  ;;  %v1594_v62 = vld [vmem:[%s9286_s3 + $0x2a0] sm:$0xff] }
 0x155   : > { %1934 = vmatprep.subr.mxu1 %v1573_v63  ;;  %2014 = vmatprep.subr.mxu0 %v1521_v1  ;;  %v1545_v63 = vld [vmem:[%s9286_s3 + $0x118] sm:$0xff]  ;;  %v1544_v1 = vld [vmem:[%s9286_s3 + $0x110] sm:$0xff] }
 0x156   : > { %1935 = vmatpush1.msra.mxu1 %v1572_v2  ;;  %2015 = vmatpush1.msra.mxu0 %v1520_v4  ;;  %v1543_v2 = vld [vmem:[%s9286_s3 + $0x108] sm:$0xff]  ;;  %v1542_v4 = vld [vmem:[%s9286_s3 + $0x100] sm:$0xff] }
 0x157   : > { %1936 = vmatprep.subr.mxu1 %v1571_v5  ;;  %2016 = vmatprep.subr.mxu0 %v1519_v6  ;;  %v1645_v5 = vld [vmem:[%s9286_s3 + $0x438] sm:$0xff] }
 0x158   : > { %1937 = vmatpush1.msra.mxu1 %v1570_v7  ;;  %2017 = vmatpush1.msra.mxu0 %v1518_v8 }
 0x159   : > { %1938 = vmatprep.subr.mxu1 %v1569_v9  ;;  %2018 = vmatprep.subr.mxu0 %v1517_v10  ;;  %v1644_v9 = vld [vmem:[%s9286_s3 + $0x430] sm:$0xff]  ;;  %v1643_v10 = vld [vmem:[%s9286_s3 + $0x428] sm:$0xff] }
 0x15a   : > { %1939 = vmatpush1.msra.mxu1 %v1568_v11  ;;  %2019 = vmatpush1.msra.mxu0 %v1516_v12  ;;  %v1506_v11 = vld [vmem:[%s7683_s17 + $0x10] sm:$0xff]  ;;  %v1642_v12 = vld [vmem:[%s9286_s3 + $0x420] sm:$0xff] }
 0x15b   : > { %1940 = vmatprep.subr.mxu1 %v1567_v13  ;;  %2020 = vmatprep.subr.mxu0 %v1515_v14  ;;  %v1641_v13 = vld [vmem:[%s9286_s3 + $0x418] sm:$0xff]  ;;  %v1640_v14 = vld [vmem:[%s9286_s3 + $0x410] sm:$0xff] }
 0x15c   : > { %1941 = vmatpush1.msra.mxu1 %v1566_v15  ;;  %2021 = vmatpush1.msra.mxu0 %v1514_v16  ;;  %v1639_v15 = vld [vmem:[%s9286_s3 + $0x408] sm:$0xff]  ;;  %v1637_v16 = vld [vmem:[%s9286_s3 + $0x3f8] sm:$0xff] }
 0x15d   : > { %1942 = vmatprep.subr.mxu1 %v1565_v17  ;;  %2022 = vmatprep.subr.mxu0 %v1513_v18  ;;  %v1636_v17 = vld [vmem:[%s9286_s3 + $0x3f0] sm:$0xff]  ;;  %v1635_v18 = vld [vmem:[%s9286_s3 + $0x3e8] sm:$0xff] }
 0x15e   : > { %1943 = vmatpush1.msra.mxu1 %v1564_v21  ;;  %2023 = vmatpush1.msra.mxu0 %v1512_v22  ;;  %v1634_v21 = vld [vmem:[%s9286_s3 + $0x3e0] sm:$0xff]  ;;  %v1633_v22 = vld [vmem:[%s9286_s3 + $0x3d8] sm:$0xff] }
 0x15f   : > { %1944 = vmatprep.subr.mxu1 %v1563_v23  ;;  %2024 = vmatprep.subr.mxu0 %v1511_v24  ;;  %v1632_v23 = vld [vmem:[%s9286_s3 + $0x3d0] sm:$0xff]  ;;  %v1631_v24 = vld [vmem:[%s9286_s3 + $0x3c8] sm:$0xff] }
 0x160   : > { %1945 = vmatpush1.msra.mxu1 %v1562_v25  ;;  %2025 = vmatpush1.msra.mxu0 %v1510_v26  ;;  %v1630_v25 = vld [vmem:[%s9286_s3 + $0x3c0] sm:$0xff]  ;;  %v1629_v26 = vld [vmem:[%s9286_s3 + $0x3b8] sm:$0xff] }
 0x161   : > { %6897 = vmatprep.subr.msk.mxu1 %vm1677_vm0, %v1613_v27  ;;  %6900 = vmatprep.subr.msk.mxu0 %vm1677_vm0, %v1561_v28  ;;  %v1628_v27 = vld [vmem:[%s9286_s3 + $0x3b0] sm:$0xff]  ;;  %v1627_v28 = vld [vmem:[%s9286_s3 + $0x3a8] sm:$0xff] }
 0x162   : > { %6898 = vmatpush2.msk.msra.mxu1 %vm1677_vm0, %v1612_v29  ;;  %6901 = vmatpush2.msk.msra.mxu0 %vm1677_vm0, %v1560_v30  ;;  %v1626_v29 = vld [vmem:[%s9286_s3 + $0x3a0] sm:$0xff]  ;;  %v1625_v30 = vld [vmem:[%s9286_s3 + $0x398] sm:$0xff] }
 0x163   : > { %1960 = vmatprep.subr.mxu1 %v1611_v31  ;;  %2040 = vmatprep.subr.mxu0 %v1559_v32  ;;  %v1624_v31 = vld [vmem:[%s9286_s3 + $0x390] sm:$0xff]  ;;  %v1623_v32 = vld [vmem:[%s9286_s3 + $0x388] sm:$0xff] }
 0x164   : > { %1961 = vmatpush2.msra.mxu1 %v1610_v33  ;;  %2041 = vmatpush2.msra.mxu0 %v1558_v34  ;;  %v1622_v33 = vld [vmem:[%s9286_s3 + $0x380] sm:$0xff]  ;;  %v1621_v34 = vld [vmem:[%s9286_s3 + $0x378] sm:$0xff] }
 0x165   : > { %1962 = vmatprep.subr.mxu1 %v1609_v35  ;;  %2042 = vmatprep.subr.mxu0 %v1557_v36  ;;  %v1620_v35 = vld [vmem:[%s9286_s3 + $0x370] sm:$0xff]  ;;  %v1619_v36 = vld [vmem:[%s9286_s3 + $0x368] sm:$0xff] }
 0x166   : > { %1963 = vmatpush2.msra.mxu1 %v1608_v37  ;;  %2043 = vmatpush2.msra.mxu0 %v1556_v38  ;;  %v1618_v37 = vld [vmem:[%s9286_s3 + $0x360] sm:$0xff]  ;;  %v1617_v38 = vld [vmem:[%s9286_s3 + $0x358] sm:$0xff] }
 0x167   : > { %1964 = vmatprep.subr.mxu1 %v1607_v39  ;;  %2044 = vmatprep.subr.mxu0 %v1555_v40  ;;  %v1616_v39 = vld [vmem:[%s9286_s3 + $0x350] sm:$0xff]  ;;  %v1615_v40 = vld [vmem:[%s9286_s3 + $0x348] sm:$0xff] }
 0x168   : > { %1965 = vmatpush2.msra.mxu1 %v1606_v41  ;;  %2045 = vmatpush2.msra.mxu0 %v1554_v42  ;;  %v1614_v41 = vld [vmem:[%s9286_s3 + $0x340] sm:$0xff]  ;;  %v1665_v42 = vld [vmem:[%s9286_s3 + $0x4d8] sm:$0xf] }
 0x169   : > { %1966 = vmatprep.subr.mxu1 %v1605_v43  ;;  %2046 = vmatprep.subr.mxu0 %v1553_v44  ;;  %v1664_v43 = vld [vmem:[%s9286_s3 + $0x4d0] sm:$0xf]  ;;  %v1663_v44 = vld [vmem:[%s9286_s3 + $0x4c8] sm:$0xff] }
 0x16a   : > { %1967 = vmatpush2.msra.mxu1 %v1604_v45  ;;  %2047 = vmatpush2.msra.mxu0 %v1552_v46  ;;  %v1662_v45 = vld [vmem:[%s9286_s3 + $0x4c0] sm:$0xff]  ;;  %v1661_v46 = vld [vmem:[%s9286_s3 + $0x4b8] sm:$0xff] }
 0x16b   : > { %1968 = vmatprep.subr.mxu1 %v1603_v47  ;;  %2048 = vmatprep.subr.mxu0 %v1551_v48  ;;  %v1660_v47 = vld [vmem:[%s9286_s3 + $0x4b0] sm:$0xff]  ;;  %v1659_v48 = vld [vmem:[%s9286_s3 + $0x4a8] sm:$0xff] }
 0x16c   : > { %1969 = vmatpush2.msra.mxu1 %v1602_v49  ;;  %2049 = vmatpush2.msra.mxu0 %v1550_v50  ;;  %v1658_v49 = vld [vmem:[%s9286_s3 + $0x4a0] sm:$0xff]  ;;  %v1657_v50 = vld [vmem:[%s9286_s3 + $0x498] sm:$0xff] }
 0x16d   : > { %1970 = vmatprep.subr.mxu1 %v1601_v51  ;;  %2050 = vmatprep.subr.mxu0 %v1549_v52  ;;  %v1656_v51 = vld [vmem:[%s9286_s3 + $0x490] sm:$0xff]  ;;  %v1655_v52 = vld [vmem:[%s9286_s3 + $0x488] sm:$0xff] }
 0x16e   : > { %1971 = vmatpush2.msra.mxu1 %v1600_v53  ;;  %2051 = vmatpush2.msra.mxu0 %v1548_v54  ;;  %v1654_v53 = vld [vmem:[%s9286_s3 + $0x480] sm:$0xff]  ;;  %v1653_v54 = vld [vmem:[%s9286_s3 + $0x478] sm:$0xff] }
 0x16f   : > { %1972 = vmatprep.subr.mxu1 %v1599_v55  ;;  %2052 = vmatprep.subr.mxu0 %v1547_v56  ;;  %v1652_v55 = vld [vmem:[%s9286_s3 + $0x470] sm:$0xff]  ;;  %v1651_v56 = vld [vmem:[%s9286_s3 + $0x468] sm:$0xff] }
 0x170   : > { %1973 = vmatpush2.msra.mxu1 %v1598_v57  ;;  %2053 = vmatpush2.msra.mxu0 %v1546_v58  ;;  %v1650_v57 = vld [vmem:[%s9286_s3 + $0x460] sm:$0xff]  ;;  %v1649_v58 = vld [vmem:[%s9286_s3 + $0x458] sm:$0xff] }
 0x171   : > { %1974 = vmatprep.subr.mxu1 %v1597_v59  ;;  %2054 = vmatprep.subr.mxu0 %v1545_v63  ;;  %v1648_v59 = vld [vmem:[%s9286_s3 + $0x450] sm:$0xff]  ;;  %v1509_v63 = vld [vmem:[%s9289_s1] sm:$0xff]  ;;  %s9299_s1 = sld [smem:[#allocation14_spill]] }
 0x172   : > { %1975 = vmatpush2.msra.mxu1 %v1596_v60  ;;  %2055 = vmatpush2.msra.mxu0 %v1544_v1  ;;  %v1647_v60 = vld [vmem:[%s9286_s3 + $0x448] sm:$0xff]  ;;  %v2246_v1 = vld [vmem:[%s7713_s14] sm:$0xff] }
 0x173   : > { %1976 = vmatprep.subr.mxu1 %v1595_v61  ;;  %2056 = vmatprep.subr.mxu0 %v1543_v2  ;;  %v1646_v61 = vld [vmem:[%s9286_s3 + $0x440] sm:$0xff] }
 0x174   : > { %1977 = vmatpush2.msra.mxu1 %v1594_v62  ;;  %2057 = vmatpush2.msra.mxu0 %v1542_v4  ;;  %v1508_v62 = vld [vmem:[%s7693_s25] sm:$0xff] }
 0x175   : > { %2098 = vmatprep.subr.mxu1 %v7962_v19  ;;  %2148 = vmatprep.subr.mxu0 %v1645_v5  ;;  %v2254_v2 = vld [vmem:[%s7723_s24] sm:$0xff] }
 0x176   : > { %2232 = vperm.xlu1 %7592, %v1508_v62   ;;  %v2256_v4 = vld [vmem:[%s7728_s30] sm:$0xff] }
 0x177   : > { %v2258_v5 = vld [vmem:[%s9285_s6] sm:$0xff] }
 0x17a   : > { %2239 = vperm.xlu1 %7592, %v1509_v63  }
 0x17e   : > { %2334 = vperm.xlu1 %7592, %v2246_v1  }
 0x182   : > { %2927 = vperm.xlu1 %7592, %v2254_v2  }
 0x186   : > { %2941 = vperm.xlu1 %7592, %v2256_v4  }
 0x18a   : > { %2953 = vperm.xlu1 %7592, %v2258_v5  }
 0x200   : > { %v1825_v6 = vpop.f32.mrf.mxu1  ;;  %v1899_v7 = vpop.f32.mrf.mxu0 }
 0x202   : > { %v1827_v19 = vpop.f32.mrf.mxu1  ;;  %v1901_v8 = vpop.f32.mrf.mxu0 }
 0x203   : > { %6899 = vmatprep.mubr.msk.f32.mxu1 %vm1904_vm3, %v1901_v8  ;;  %6902 = vmatprep.mubr.msk.f32.mxu0 %vm1904_vm3, %v1827_v19 }
 0x204   : > { %1979 = vmatmul.mubr.f32.vlgmr.msra.gmra.mxu1 %v1899_v7  ;;  %2059 = vmatmul.mubr.f32.vlgmr.msra.gmra.mxu0 %v1825_v6  ;;  %v2968_v6 = vld [vmem:[%s9290_s2] sm:$0xff]  ;;  %s9300_s2 = sld [smem:[#allocation15_spill]] }
 0x205   : > { %2099 = vmatpush1.msra.mxu1 %v7964_v20  ;;  %2132 = vmatprep.mubr.f32.mxu1 %v7654_v3  ;;  %v1638_v20 = vld [vmem:[%s9286_s3 + $0x400] sm:$0xff] }
 0x206   : > { %2149 = vmatpush1.msra.mxu0 %v1644_v9  ;;  %3538 = vperm.xlu1 %7592, %v2968_v6   ;;  %v2970_v7 = vld [vmem:[%s9291_s7] sm:$0xff] }
 0x207   : > { %2150 = vmatprep.subr.mxu0 %v1643_v10 }
 0x208   : > { %6903 = vmatmul.mubr.msk.f32.vlgmr.msra.gmra.mxu1 %vm1755_vm2, %v1506_v11  ;;  %2151 = vmatpush1.msra.mxu0 %v1642_v12 }
 0x209   : > { %2152 = vmatprep.subr.mxu0 %v1641_v13  ;;  %2412 = vmatprep.mubr.f32.mxu1 %v7654_v3 }
 0x20a   : > { %2153 = vmatpush1.msra.mxu0 %v1640_v14  ;;  %3551 = vperm.xlu1 %7592, %v2970_v7   ;;  %v2248_v7 = vld [vmem:[%s9294_s15] sm:$0xff] }
 0x20b   : > { %2154 = vmatprep.subr.mxu0 %v1639_v15 }
 0x20c   : > { %2155 = vmatpush1.msra.mxu0 %v1638_v20 }
 0x20d   : > { %2156 = vmatprep.subr.mxu0 %v1637_v16  ;;  %v2224_v16 = vpop.permute.xlu0 %2223 }
 0x20e   : > { %2157 = vmatpush1.msra.mxu0 %v1636_v17 }
 0x20f   : > { %2158 = vmatprep.subr.mxu0 %v1635_v18 }
 0x210   : > { %2159 = vmatpush1.msra.mxu0 %v1634_v21 }
 0x211   : > { %2160 = vmatprep.subr.mxu0 %v1633_v22  ;;  %v2233_v22 = vpop.permute.xlu1 %2232 }
 0x212   : > { %2161 = vmatpush1.msra.mxu0 %v1632_v23 }
 0x213   : > { %2162 = vmatprep.subr.mxu0 %v1631_v24 }
 0x214   : > { %2163 = vmatpush1.msra.mxu0 %v1630_v25 }
 0x215   : > { %2164 = vmatprep.subr.mxu0 %v1629_v26 }
 0x216   : > { %2165 = vmatpush1.msra.mxu0 %v1628_v27 }
 0x217   : > { %2166 = vmatprep.subr.mxu0 %v1627_v28  ;;  %v2240_v28 = vpop.permute.xlu1 %2239 }
 0x218   : > { %2167 = vmatpush1.msra.mxu0 %v1626_v29 }
 0x219   : > { %2168 = vmatprep.subr.mxu0 %v1625_v30 }
 0x21a   : > { %2169 = vmatpush1.msra.mxu0 %v1624_v31  ;;  %v2244_v31 = vld [vmem:[%s9292_s10] sm:$0xff] }
 0x21b   : > { %2170 = vmatprep.subr.mxu0 %v1623_v32  ;;  %v2245_v32 = vld [vmem:[%s9292_s10 + $0x8] sm:$0xff] }
 0x21c   : > { %2171 = vmatpush1.msra.mxu0 %v1622_v33  ;;  %v2275_v33 = vld [vmem:[%s9293_s11 + $0x78] sm:$0xff] }
 0x21d   : > { %2172 = vmatprep.subr.mxu0 %v1621_v34  ;;  %v2274_v34 = vld [vmem:[%s9293_s11 + $0x70] sm:$0xff] }
 0x21e   : > { %2173 = vmatpush1.msra.mxu0 %v1620_v35  ;;  %v2273_v35 = vld [vmem:[%s9293_s11 + $0x68] sm:$0xff] }
 0x21f   : > { %2174 = vmatprep.subr.mxu0 %v1619_v36  ;;  %v2272_v36 = vld [vmem:[%s9293_s11 + $0x60] sm:$0xff] }
 0x220   : > { %2175 = vmatpush1.msra.mxu0 %v1618_v37  ;;  %v2271_v37 = vld [vmem:[%s9293_s11 + $0x58] sm:$0xff] }
 0x221   : > { %2176 = vmatprep.subr.mxu0 %v1617_v38  ;;  %v2270_v38 = vld [vmem:[%s9293_s11 + $0x50] sm:$0xff] }
 0x222   : > { %2177 = vmatpush1.msra.mxu0 %v1616_v39  ;;  %v2269_v39 = vld [vmem:[%s9293_s11 + $0x48] sm:$0xff] }
 0x223   : > { %2178 = vmatprep.subr.mxu0 %v1615_v40  ;;  %v2268_v40 = vld [vmem:[%s9293_s11 + $0x40] sm:$0xff] }
 0x224   : > { %2179 = vmatpush1.msra.mxu0 %v1614_v41  ;;  %v2267_v41 = vld [vmem:[%s9293_s11 + $0x38] sm:$0xff] }
 0x225   : > { %6904 = vmatprep.subr.msk.mxu0 %vm1677_vm0, %v1665_v42  ;;  %v2266_v42 = vld [vmem:[%s9293_s11 + $0x30] sm:$0xff] }
 0x226   : > { %6905 = vmatpush2.msk.msra.mxu0 %vm1677_vm0, %v1664_v43  ;;  %v2265_v43 = vld [vmem:[%s9293_s11 + $0x28] sm:$0xff] }
 0x227   : > { %2194 = vmatprep.subr.mxu0 %v1663_v44  ;;  %v2264_v44 = vld [vmem:[%s9293_s11 + $0x20] sm:$0xff] }
 0x228   : > { %2195 = vmatpush2.msra.mxu0 %v1662_v45  ;;  %v2263_v45 = vld [vmem:[%s9293_s11 + $0x18] sm:$0xff] }
 0x229   : > { %2196 = vmatprep.subr.mxu0 %v1661_v46  ;;  %v2262_v46 = vld [vmem:[%s9293_s11 + $0x10] sm:$0xff] }
 0x22a   : > { %2197 = vmatpush2.msra.mxu0 %v1660_v47  ;;  %v2261_v47 = vld [vmem:[%s9293_s11 + $0x8] sm:$0xff] }
 0x22b   : > { %2198 = vmatprep.subr.mxu0 %v1659_v48  ;;  %v2260_v48 = vld [vmem:[%s9293_s11] sm:$0xff] }
 0x22c   : > { %2199 = vmatpush2.msra.mxu0 %v1658_v49  ;;  %v2283_v49 = vld [vmem:[%s9293_s11 + $0xb8] sm:$0xff] }
 0x22d   : > { %2200 = vmatprep.subr.mxu0 %v1657_v50  ;;  %v2282_v50 = vld [vmem:[%s9293_s11 + $0xb0] sm:$0xff] }
 0x22e   : > { %2201 = vmatpush2.msra.mxu0 %v1656_v51  ;;  %v2281_v51 = vld [vmem:[%s9293_s11 + $0xa8] sm:$0xff] }
 0x22f   : > { %2202 = vmatprep.subr.mxu0 %v1655_v52  ;;  %v2280_v52 = vld [vmem:[%s9293_s11 + $0xa0] sm:$0xff] }
 0x230   : > { %2203 = vmatpush2.msra.mxu0 %v1654_v53  ;;  %v2279_v53 = vld [vmem:[%s9293_s11 + $0x98] sm:$0xff] }
 0x231   : > { %2204 = vmatprep.subr.mxu0 %v1653_v54  ;;  %v2278_v54 = vld [vmem:[%s9293_s11 + $0x90] sm:$0xff] }
 0x232   : > { %2205 = vmatpush2.msra.mxu0 %v1652_v55 }
 0x233   : > { %2206 = vmatprep.subr.mxu0 %v1651_v56 }
 0x234   : > { %2207 = vmatpush2.msra.mxu0 %v1650_v57 }
 0x235   : > { %2208 = vmatprep.subr.mxu0 %v1649_v58  ;;  %v2340_v58 = vpop.permute.xlu0 %2339 }
 0x236   : > { %2209 = vmatpush2.msra.mxu0 %v1648_v59  ;;  %v2335_v59 = vpop.permute.xlu1 %2334 }
 0x237   : > { %2210 = vmatprep.subr.mxu0 %v1647_v60 }
 0x238   : > { %2211 = vmatpush2.msra.mxu0 %v1646_v61 }
 0x239   : > { %2684 = vmatprep.subr.mxu0 %v7654_v3 }
 0x2c4   : > { %v1980_v19 = vpop.f32.mrf.mxu1  ;;  %v2060_v11 = vpop.f32.mrf.mxu0 }
 0x2c5   : > { %v2061_v13 = vadd.f32 %v2060_v11, %v1980_v19  ;;  %v2249_v19 = vld [vmem:[%s9294_s15 + $0x8] sm:$0xff]  ;;  %v2251_v11 = vld [vmem:[%s9294_s15 + $0x18] sm:$0xff] }
 0x2c6   : > { %v1982_v8 = vpop.f32.mrf.mxu1  ;;  %v2062_v12 = vpop.f32.mrf.mxu0 }
 0x2c7   : > { %v2063_v15 = vadd.f32 %v2062_v12, %v1982_v8  ;;  %v2250_v8 = vld [vmem:[%s9294_s15 + $0x10] sm:$0xff]  ;;  %v2297_v12 = vld [vmem:[%s9293_s11 + $0x128] sm:$0xff] }
 0x2c8   : > { %v2134_v9 = vpop.f32.mrf.mxu1 }
 0x2ca   : > { %v2136_v10 = vpop.f32.mrf.mxu1 }
 0x2cb   : > { %6906 = vmatprep.mubr.msk.f32.mxu0 %vm1904_vm3, %v2136_v10  ;;  %v2298_v10 = vld [vmem:[%s9293_s11 + $0x130] sm:$0xff] }
 0x2cc   : > { %2213 = vmatmul.mubr.f32.vlgmr.msra.gmra.mxu0 %v2134_v9  ;;  %v2299_v9 = vld [vmem:[%s9293_s11 + $0x138] sm:$0xff] }
 0x2cd   : > { %2685 = vmatpush1.msra.mxu0 %v2275_v33  ;;  %v2301_v33 = vld [vmem:[%s9293_s11 + $0x148] sm:$0xff] }
 0x2ce   : > { %2686 = vmatprep.subr.mxu0 %v7654_v3 }
 0x2cf   : > { %2687 = vmatpush1.msra.mxu0 %v2274_v34  ;;  %v2300_v34 = vld [vmem:[%s9293_s11 + $0x140] sm:$0xff] }
 0x2d0   : > { %2688 = vmatprep.subr.mxu0 %v7654_v3 }
 0x2d1   : > { %2689 = vmatpush1.msra.mxu0 %v2273_v35  ;;  %v2277_v35 = vld [vmem:[%s9293_s11 + $0x88] sm:$0xff] }
 0x2d2   : > { %2690 = vmatprep.subr.mxu0 %v7654_v3 }
 0x2d3   : > { %2691 = vmatpush1.msra.mxu0 %v2272_v36  ;;  %v2276_v36 = vld [vmem:[%s9293_s11 + $0x80] sm:$0xff] }
 0x2d4   : > { %2692 = vmatprep.subr.mxu0 %v7654_v3 }
 0x2d5   : > { %2693 = vmatpush1.msra.mxu0 %v2271_v37 }
 0x2d6   : > { %2694 = vmatprep.subr.mxu0 %v7654_v3 }
 0x2d7   : > { %2695 = vmatpush1.msra.mxu0 %v2270_v38 }
 0x2d8   : > { %2696 = vmatprep.subr.mxu0 %v7654_v3 }
 0x2d9   : > { %2697 = vmatpush1.msra.mxu0 %v2269_v39 }
 0x2da   : > { %2698 = vmatprep.subr.mxu0 %v7654_v3 }
 0x2db   : > { %2699 = vmatpush1.msra.mxu0 %v2268_v40 }
 0x2dc   : > { %2700 = vmatprep.subr.mxu0 %v7654_v3 }
 0x2dd   : > { %2701 = vmatpush1.msra.mxu0 %v2267_v41 }
 0x2de   : > { %2702 = vmatprep.subr.mxu0 %v7654_v3 }
 0x2df   : > { %2703 = vmatpush1.msra.mxu0 %v2266_v42 }
 0x2e0   : > { %2704 = vmatprep.subr.mxu0 %v7654_v3 }
 0x2e1   : > { %2705 = vmatpush1.msra.mxu0 %v2265_v43 }
 0x2e2   : > { %2706 = vmatprep.subr.mxu0 %v7654_v3 }
 0x2e3   : > { %2707 = vmatpush1.msra.mxu0 %v2264_v44 }
 0x2e4   : > { %2708 = vmatprep.subr.mxu0 %v7654_v3 }
 0x2e5   : > { %2709 = vmatpush1.msra.mxu0 %v2263_v45  ;;  %v2252_v45 = vld [vmem:[%s9294_s15 + $0x20] sm:$0xff] }
 0x2e6   : > { %2710 = vmatprep.subr.mxu0 %v7654_v3 }
 0x2e7   : > { %2711 = vmatpush1.msra.mxu0 %v2262_v46  ;;  %v2323_v46 = vld [vmem:[%s9293_s11 + $0x1f8] sm:$0xff] }
 0x2e8   : > { %2712 = vmatprep.subr.mxu0 %v7654_v3 }
 0x2e9   : > { %2713 = vmatpush1.msra.mxu0 %v2261_v47  ;;  %v2322_v47 = vld [vmem:[%s9293_s11 + $0x1f0] sm:$0xff] }
 0x2ea   : > { %2714 = vmatprep.subr.mxu0 %v7654_v3 }
 0x2eb   : > { %2715 = vmatpush1.msra.mxu0 %v2260_v48  ;;  %v2253_v48 = vld [vmem:[%s9294_s15 + $0x28] sm:$0xff] }
 0x2ec   : > { %2732 = vmatprep.subr.mxu0 %v7654_v3 }
 0x2ed   : > { %2733 = vmatpush2.msra.mxu0 %v2283_v49  ;;  %v2321_v49 = vld [vmem:[%s9293_s11 + $0x1e8] sm:$0xff] }
 0x2ee   : > { %2734 = vmatprep.subr.mxu0 %v7654_v3 }
 0x2ef   : > { %2735 = vmatpush2.msra.mxu0 %v2282_v50  ;;  %v2320_v50 = vld [vmem:[%s9293_s11 + $0x1e0] sm:$0xff] }
 0x2f0   : > { %2736 = vmatprep.subr.mxu0 %v7654_v3 }
 0x2f1   : > { %2737 = vmatpush2.msra.mxu0 %v2281_v51  ;;  %v2319_v51 = vld [vmem:[%s9293_s11 + $0x1d8] sm:$0xff] }
 0x2f2   : > { %2738 = vmatprep.subr.mxu0 %v7654_v3 }
 0x2f3   : > { %2739 = vmatpush2.msra.mxu0 %v2280_v52  ;;  %v2318_v52 = vld [vmem:[%s9293_s11 + $0x1d0] sm:$0xff] }
 0x2f4   : > { %2740 = vmatprep.subr.mxu0 %v7654_v3 }
 0x2f5   : > { %2741 = vmatpush2.msra.mxu0 %v2279_v53  ;;  %v2317_v53 = vld [vmem:[%s9293_s11 + $0x1c8] sm:$0xff] }
 0x2f6   : > { %2742 = vmatprep.subr.mxu0 %v7654_v3 }
 0x2f7   : > { %2743 = vmatpush2.msra.mxu0 %v2278_v54  ;;  %v2316_v54 = vld [vmem:[%s9293_s11 + $0x1c0] sm:$0xff] }
 0x2f8   : > { %2744 = vmatprep.subr.mxu0 %v7654_v3 }
 0x2f9   : > { %2745 = vmatpush2.msra.mxu0 %v2277_v35 }
 0x2fa   : > { %2746 = vmatprep.subr.mxu0 %v7654_v3 }
 0x2fb   : > { %2747 = vmatpush2.msra.mxu0 %v2276_v36 }
 0x2fc   : > { %7176 = vmatprep.subr.mxu0 %v7654_v3 }
 0x38c   : > { %v2214_v14 = vpop.f32.mrf.mxu0 }
 0x38d   : > { %v2219_v20 = vadd.f32 %v2214_v14, %v2061_v13  ;;  %v2296_v13 = vld [vmem:[%s9293_s11 + $0x120] sm:$0xff]  ;;  %v2295_v14 = vld [vmem:[%s9293_s11 + $0x118] sm:$0xff] }
 0x38e   : > { %v2216_v17 = vpop.f32.mrf.mxu0 }
 0x38f   : > { %v2226_v18 = vadd.f32 %v2224_v16, %v2219_v20  ;;  %v2220_v21 = vadd.f32 %v2216_v17, %v2063_v15  ;;  %v2294_v15 = vld [vmem:[%s9293_s11 + $0x110] sm:$0xff]  ;;  %v2293_v20 = vld [vmem:[%s9293_s11 + $0x108] sm:$0xff]  ;;  %v2291_v17 = vld [vmem:[%s9293_s11 + $0xf8] sm:$0xff] }
 0x391   : > { %v2228_v23 = vmax.f32 %v2226_v18, 0.0  ;;  %v2227_v24 = vadd.f32 %v2224_v16, %v2220_v21  ;;  %v2292_v16 = vld [vmem:[%s9293_s11 + $0x100] sm:$0xff]  ;;  %v2290_v18 = vld [vmem:[%s9293_s11 + $0xf0] sm:$0xff]  ;;  %v2289_v21 = vld [vmem:[%s9293_s11 + $0xe8] sm:$0xff] }
 0x393   : > { %v2229_v25 = vmax.f32 %v2227_v24, 0.0  ;;  %v2235_v26 = vmul.f32 %v2233_v22, %v2228_v23  ;;  %v2287_v23 = vld [vmem:[%s9293_s11 + $0xd8] sm:$0xff]  ;;  %v2286_v24 = vld [vmem:[%s9293_s11 + $0xd0] sm:$0xff] }
 0x395   : > { %v2236_v27 = vmul.f32 %v2233_v22, %v2229_v25  ;;  %v2242_v30 = vadd.f32 %v2240_v28, %v2235_v26  ;;  %v2288_v22 = vld [vmem:[%s9293_s11 + $0xe0] sm:$0xff]  ;;  %v2285_v25 = vld [vmem:[%s9293_s11 + $0xc8] sm:$0xff] }
 0x396   : > { %v2284_v26 = vld [vmem:[%s9293_s11 + $0xc0] sm:$0xff] }
 0x397   : > { %v2243_v29 = vadd.f32 %v2240_v28, %v2236_v27  ;;  %v2307_v27 = vld [vmem:[%s9293_s11 + $0x178] sm:$0xff]  ;;  %v2306_v28 = vld [vmem:[%s9293_s11 + $0x170] sm:$0xff] }
 0x399   : > { %2378 = vmatprep.subr.mxu1 %v2243_v29  ;;  %v2305_v29 = vld [vmem:[%s9293_s11 + $0x168] sm:$0xff] }
 0x39a   : > { %2379 = vmatpush1.msra.mxu1 %v2242_v30  ;;  %v2304_v30 = vld [vmem:[%s9293_s11 + $0x160] sm:$0xff] }
 0x39b   : > { %6907 = vmatmul.mubr.msk.f32.vlgmr.msra.gmra.mxu1 %vm1755_vm2, %v2244_v31  ;;  %v2303_v31 = vld [vmem:[%s9293_s11 + $0x158] sm:$0xff] }
 0x39c   : > { %2418 = vmatprep.mubr.f32.mxu1 %v7654_v3 }
 0x39f   : > { %6908 = vmatmul.mubr.msk.f32.gmra.mxu1 %vm1755_vm2, %v2245_v32  ;;  %v2302_v32 = vld [vmem:[%s9293_s11 + $0x150] sm:$0xff] }
 0x3a0   : > { %2500 = vmatprep.mubr.f32.mxu1 %v7654_v3 }
 0x45b   : > { %v2414_v55 = vpop.f32.mrf.mxu1 }
 0x45c   : > { %v2415_v1 = vadd.f32 %v2414_v55, %v2335_v59  ;;  %v2315_v55 = vld [vmem:[%s9293_s11 + $0x1b8] sm:$0xff] }
 0x45d   : > { %v2416_v56 = vpop.f32.mrf.mxu1 }
 0x45e   : > { %v2417_v62 = vadd.f32 %v2416_v56, %v2335_v59  ;;  %v8211_v6 = vmax.f32 %v2415_v1, 0.0  ;;  %v2314_v56 = vld [vmem:[%s9293_s11 + $0x1b0] sm:$0xff]  ;;  %v2311_v59 = vld [vmem:[%s9293_s11 + $0x198] sm:$0xff] }
 0x45f   : > { %v2420_v57 = vpop.f32.mrf.mxu1  ;;  %v2330_v1 = vld [vmem:[%s9293_s11 + $0x230] sm:$0xff] }
 0x460   : > { %v2421_v60 = vadd.f32 %v2420_v57, %v2340_v58  ;;  %v8208_v5 = vmax.f32 %v2417_v62, 0.0  ;;  %v2313_v57 = vld [vmem:[%s9293_s11 + $0x1a8] sm:$0xff]  ;;  %v2308_v62 = vld [vmem:[%s9293_s11 + $0x180] sm:$0xff] }
 0x461   : > { %v2422_v61 = vpop.f32.mrf.mxu1 }
 0x462   : > { %v2423_v63 = vadd.f32 %v2422_v61, %v2340_v58  ;;  %v8206_v4 = vmax.f32 %v2421_v60, 0.0  ;;  %v2312_v58 = vld [vmem:[%s9293_s11 + $0x1a0] sm:$0xff]  ;;  %v2310_v60 = vld [vmem:[%s9293_s11 + $0x190] sm:$0xff]  ;;  %v2309_v61 = vld [vmem:[%s9293_s11 + $0x188] sm:$0xff] }
 0x464   : > { %v8204_v2 = vmax.f32 %v2423_v63, 0.0  ;;  %v2331_v63 = vld [vmem:[%s9293_s11 + $0x238] sm:$0xff] }
 0x466   : > { %2464 = vmatprep.subr.mxu1 %v8204_v2 }
 0x467   : > { %2465 = vmatpush1.msra.mxu1 %v8206_v4 }
 0x468   : > { %2466 = vmatprep.subr.mxu1 %v8208_v5 }
 0x469   : > { %2467 = vmatpush1.msra.mxu1 %v8211_v6 }
 0x46a   : > { %6909 = vmatmul.mubr.msk.f32.vlgmr.msra.gmra.mxu1 %vm2429_vm4, %v2248_v7  ;;  %2547 = vmatprep.subr.mxu1 %v8204_v2  ;;  %v2325_v7 = vld [vmem:[%s9293_s11 + $0x208] sm:$0xff] }
 0x46b   : > { %2548 = vmatpush1.msra.mxu1 %v8206_v4  ;;  %2506 = vmatprep.mubr.f32.mxu1 %v7654_v3 }
 0x46c   : > { %2549 = vmatprep.subr.mxu1 %v8208_v5 }
 0x46d   : > { %2550 = vmatpush1.msra.mxu1 %v8211_v6 }
 0x46e   : > { %6910 = vmatmul.mubr.msk.f32.gmra.mxu1 %vm2429_vm4, %v2249_v19  ;;  %2603 = vmatprep.subr.mxu1 %v7654_v3  ;;  %v2324_v19 = vld [vmem:[%s9293_s11 + $0x200] sm:$0xff] }
 0x46f   : > { %2583 = vmatprep.mubr.f32.mxu1 %v7654_v3 }
 0x472   : > { %6911 = vmatmul.mubr.msk.f32.vlgmr.msra.gmra.mxu1 %vm2429_vm4, %v2250_v8 }
 0x473   : > { %2604 = vmatpush1.msra.mxu1 %v2299_v9  ;;  %2589 = vmatprep.mubr.f32.mxu1 %v7654_v3 }
 0x474   : > { %2605 = vmatprep.subr.mxu1 %v7654_v3 }
 0x475   : > { %2606 = vmatpush1.msra.mxu1 %v2298_v10 }
 0x476   : > { %2607 = vmatprep.subr.mxu1 %v7654_v3  ;;  %6912 = vmatmul.mubr.msk.f32.gmra.mxu1 %vm2429_vm4, %v2251_v11 }
 0x477   : > { %2608 = vmatpush1.msra.mxu1 %v2297_v12 }
 0x478   : > { %2609 = vmatprep.subr.mxu1 %v7654_v3 }
 0x479   : > { %2610 = vmatpush1.msra.mxu1 %v2296_v13 }
 0x47a   : > { %2611 = vmatprep.subr.mxu1 %v7654_v3 }
 0x47b   : > { %2612 = vmatpush1.msra.mxu1 %v2295_v14 }
 0x47c   : > { %2613 = vmatprep.subr.mxu1 %v7654_v3 }
 0x47d   : > { %2614 = vmatpush1.msra.mxu1 %v2294_v15 }
 0x47e   : > { %2615 = vmatprep.subr.mxu1 %v7654_v3 }
 0x47f   : > { %2616 = vmatpush1.msra.mxu1 %v2293_v20 }
 0x480   : > { %2617 = vmatprep.subr.mxu1 %v7654_v3 }
 0x481   : > { %2618 = vmatpush1.msra.mxu1 %v2292_v16 }
 0x482   : > { %2619 = vmatprep.subr.mxu1 %v7654_v3 }
 0x483   : > { %2620 = vmatpush1.msra.mxu1 %v2291_v17 }
 0x484   : > { %2621 = vmatprep.subr.mxu1 %v7654_v3 }
 0x485   : > { %2622 = vmatpush1.msra.mxu1 %v2290_v18 }
 0x486   : > { %2623 = vmatprep.subr.mxu1 %v7654_v3 }
 0x487   : > { %2624 = vmatpush1.msra.mxu1 %v2289_v21 }
 0x488   : > { %2625 = vmatprep.subr.mxu1 %v7654_v3 }
 0x489   : > { %2626 = vmatpush1.msra.mxu1 %v2288_v22 }
 0x48a   : > { %2627 = vmatprep.subr.mxu1 %v7654_v3 }
 0x48b   : > { %2628 = vmatpush1.msra.mxu1 %v2287_v23  ;;  %v2933_v23 = vpop.permute.xlu0 %2932 }
 0x48c   : > { %2629 = vmatprep.subr.mxu1 %v7654_v3 }
 0x48d   : > { %2630 = vmatpush1.msra.mxu1 %v2286_v24 }
 0x48e   : > { %2631 = vmatprep.subr.mxu1 %v7654_v3 }
 0x48f   : > { %2632 = vmatpush1.msra.mxu1 %v2285_v25 }
 0x490   : > { %2633 = vmatprep.subr.mxu1 %v7654_v3 }
 0x491   : > { %2634 = vmatpush1.msra.mxu1 %v2284_v26  ;;  %v2928_v26 = vpop.permute.xlu1 %2927 }
 0x492   : > { %2651 = vmatprep.subr.mxu1 %v7654_v3 }
 0x493   : > { %2652 = vmatpush2.msra.mxu1 %v2307_v27 }
 0x494   : > { %2653 = vmatprep.subr.mxu1 %v7654_v3 }
 0x495   : > { %2654 = vmatpush2.msra.mxu1 %v2306_v28  ;;  %v2942_v35 = vpop.permute.xlu1 %2941 }
 0x496   : > { %2655 = vmatprep.subr.mxu1 %v7654_v3 }
 0x497   : > { %2656 = vmatpush2.msra.mxu1 %v2305_v29 }
 0x498   : > { %2657 = vmatprep.subr.mxu1 %v7654_v3 }
 0x499   : > { %2658 = vmatpush2.msra.mxu1 %v2304_v30 }
 0x49a   : > { %2659 = vmatprep.subr.mxu1 %v7654_v3 }
 0x49b   : > { %2660 = vmatpush2.msra.mxu1 %v2303_v31  ;;  %v2947_v31 = vpop.permute.xlu0 %2946 }
 0x49c   : > { %2661 = vmatprep.subr.mxu1 %v7654_v3 }
 0x49d   : > { %2662 = vmatpush2.msra.mxu1 %v2302_v32 }
 0x49e   : > { %2663 = vmatprep.subr.mxu1 %v7654_v3 }
 0x49f   : > { %2664 = vmatpush2.msra.mxu1 %v2301_v33 }
 0x4a0   : > { %2665 = vmatprep.subr.mxu1 %v7654_v3 }
 0x4a1   : > { %2666 = vmatpush2.msra.mxu1 %v2300_v34 }
 0x4a2   : > { %2793 = vmatprep.subr.mxu1 %v8204_v2  ;;  %v2329_v2 = vld [vmem:[%s9293_s11 + $0x228] sm:$0xff] }
 0x52a   : > { %v2502_v37 = vpop.f32.mrf.mxu1 }
 0x52c   : > { %v2504_v38 = vpop.f32.mrf.mxu1 }
 0x52d   : > { %6915 = vmatprep.mubr.msk.f32.mxu0 %vm2596_vm5, %v2504_v38 }
 0x52e   : > { %v2508_v39 = vpop.f32.mrf.mxu1  ;;  %2749 = vmatmul.mubr.f32.vlgmr.msra.gmra.mxu0 %v2502_v37 }
 0x530   : > { %v2510_v40 = vpop.f32.mrf.mxu1 }
 0x531   : > { %6916 = vmatprep.mubr.msk.f32.mxu0 %vm2596_vm5, %v2510_v40 }
 0x532   : > { %v2585_v41 = vpop.f32.mrf.mxu1  ;;  %2754 = vmatmul.mubr.f32.gmra.mxu0 %v2508_v39  ;;  %v2959_v39 = vpop.permute.xlu0 %2958 }
 0x533   : > { %7180 = vmatprep.mubr.msk.f32.mxu0 %vm7656_vm6, %v7654_v3 }
 0x534   : > { %v2587_v42 = vpop.f32.mrf.mxu1 }
 0x535   : > { %6913 = vmatprep.mubr.msk.f32.mxu1 %vm2596_vm5, %v2587_v42 }
 0x536   : > { %v2591_v43 = vpop.f32.mrf.mxu1  ;;  %2668 = vmatmul.mubr.f32.vlgmr.msra.gmra.mxu1 %v2585_v41  ;;  %v2954_v41 = vpop.permute.xlu1 %2953 }
 0x537   : > { %2794 = vmatpush1.msra.mxu1 %v8206_v4  ;;  %v2328_v4 = vld [vmem:[%s9293_s11 + $0x220] sm:$0xff] }
 0x538   : > { %2795 = vmatprep.subr.mxu1 %v8208_v5  ;;  %v2593_v44 = vpop.f32.mrf.mxu1  ;;  %v2327_v5 = vld [vmem:[%s9293_s11 + $0x218] sm:$0xff] }
 0x539   : > { %2796 = vmatpush1.msra.mxu1 %v8211_v6  ;;  %6914 = vmatprep.mubr.msk.f32.mxu1 %vm2596_vm5, %v2593_v44  ;;  %v2326_v6 = vld [vmem:[%s9293_s11 + $0x210] sm:$0xff]  ;;  %v2982_v44 = vld [vmem:[%s9296_s18 + $0x58] sm:$0x3] }
 0x53a   : > { %2673 = vmatmul.mubr.f32.gmra.mxu1 %v2591_v43  ;;  %2848 = vmatprep.subr.mxu1 %v7654_v3  ;;  %v2963_v43 = vld [vmem:[%s9295_s16] sm:$0xff] }
 0x53b   : > { %2829 = vmatprep.mubr.f32.mxu1 %v7654_v3 }
 0x53e   : > { %6917 = vmatmul.mubr.msk.f32.vlgmr.msra.gmra.mxu1 %vm2429_vm4, %v2252_v45  ;;  %v2981_v45 = vld [vmem:[%s9296_s18 + $0x50] sm:$0xff] }
 0x53f   : > { %2835 = vmatprep.mubr.f32.mxu1 %v7654_v3  ;;  %2849 = vmatpush1.msra.mxu1 %v2323_v46  ;;  %v2980_v46 = vld [vmem:[%s9296_s18 + $0x48] sm:$0xff] }
 0x540   : > { %2850 = vmatprep.subr.mxu1 %v7654_v3 }
 0x541   : > { %2851 = vmatpush1.msra.mxu1 %v2322_v47  ;;  %v2979_v47 = vld [vmem:[%s9296_s18 + $0x40] sm:$0xff] }
 0x542   : > { %6918 = vmatmul.mubr.msk.f32.gmra.mxu1 %vm2429_vm4, %v2253_v48  ;;  %2852 = vmatprep.subr.mxu1 %v7654_v3  ;;  %v2978_v48 = vld [vmem:[%s9296_s18 + $0x38] sm:$0xff] }
 0x543   : > { %2853 = vmatpush1.msra.mxu1 %v2321_v49  ;;  %v2977_v49 = vld [vmem:[%s9296_s18 + $0x30] sm:$0xff] }
 0x544   : > { %2854 = vmatprep.subr.mxu1 %v7654_v3 }
 0x545   : > { %2855 = vmatpush1.msra.mxu1 %v2320_v50  ;;  %v2976_v50 = vld [vmem:[%s9296_s18 + $0x28] sm:$0xff] }
 0x546   : > { %2856 = vmatprep.subr.mxu1 %v7654_v3 }
 0x547   : > { %2857 = vmatpush1.msra.mxu1 %v2319_v51  ;;  %v2975_v51 = vld [vmem:[%s9296_s18 + $0x20] sm:$0xff] }
 0x548   : > { %2858 = vmatprep.subr.mxu1 %v7654_v3 }
 0x549   : > { %2859 = vmatpush1.msra.mxu1 %v2318_v52  ;;  %v2974_v52 = vld [vmem:[%s9296_s18 + $0x18] sm:$0xff] }
 0x54a   : > { %2860 = vmatprep.subr.mxu1 %v7654_v3 }
 0x54b   : > { %2861 = vmatpush1.msra.mxu1 %v2317_v53  ;;  %v2973_v53 = vld [vmem:[%s9296_s18 + $0x10] sm:$0xff] }
 0x54c   : > { %2862 = vmatprep.subr.mxu1 %v7654_v3 }
 0x54d   : > { %2863 = vmatpush1.msra.mxu1 %v2316_v54  ;;  %v3010_v54 = vpop.permute.xlu0 %3009 }
 0x54e   : > { %2864 = vmatprep.subr.mxu1 %v7654_v3 }
 0x54f   : > { %2865 = vmatpush1.msra.mxu1 %v2315_v55 }
 0x550   : > { %2866 = vmatprep.subr.mxu1 %v7654_v3 }
 0x551   : > { %2867 = vmatpush1.msra.mxu1 %v2314_v56 }
 0x552   : > { %2868 = vmatprep.subr.mxu1 %v7654_v3 }
 0x553   : > { %2869 = vmatpush1.msra.mxu1 %v2313_v57 }
 0x554   : > { %2870 = vmatprep.subr.mxu1 %v7654_v3 }
 0x555   : > { %2871 = vmatpush1.msra.mxu1 %v2312_v58 }
 0x556   : > { %2872 = vmatprep.subr.mxu1 %v7654_v3 }
 0x557   : > { %2873 = vmatpush1.msra.mxu1 %v2311_v59  ;;  %v2965_v59 = vld [vmem:[%s9297_s0] sm:$0xff] }
 0x558   : > { %2874 = vmatprep.subr.mxu1 %v7654_v3 }
 0x559   : > { %2875 = vmatpush1.msra.mxu1 %v2310_v60  ;;  %v2966_v60 = vld [vmem:[%s9297_s0 + $0x8] sm:$0xff] }
 0x55a   : > { %2876 = vmatprep.subr.mxu1 %v7654_v3 }
 0x55b   : > { %2877 = vmatpush1.msra.mxu1 %v2309_v61  ;;  %v2994_v61 = vld [vmem:[%s9296_s18 + $0xb8] sm:$0x3] }
 0x55c   : > { %2878 = vmatprep.subr.mxu1 %v7654_v3 }
 0x55d   : > { %2879 = vmatpush1.msra.mxu1 %v2308_v62  ;;  %v2993_v62 = vld [vmem:[%s9296_s18 + $0xb0] sm:$0xff] }
 0x55e   : > { %2896 = vmatprep.subr.mxu1 %v7654_v3 }
 0x55f   : > { %2897 = vmatpush2.msra.mxu1 %v2331_v63  ;;  %v2992_v63 = vld [vmem:[%s9296_s18 + $0xa8] sm:$0xff] }
 0x560   : > { %2898 = vmatprep.subr.mxu1 %v7654_v3 }
 0x561   : > { %2899 = vmatpush2.msra.mxu1 %v2330_v1  ;;  %v2991_v1 = vld [vmem:[%s9296_s18 + $0xa0] sm:$0xff] }
 0x562   : > { %2900 = vmatprep.subr.mxu1 %v7654_v3 }
 0x563   : > { %2901 = vmatpush2.msra.mxu1 %v2329_v2  ;;  %v2990_v2 = vld [vmem:[%s9296_s18 + $0x98] sm:$0xff] }
 0x564   : > { %2902 = vmatprep.subr.mxu1 %v7654_v3 }
 0x565   : > { %2903 = vmatpush2.msra.mxu1 %v2328_v4  ;;  %v2989_v4 = vld [vmem:[%s9296_s18 + $0x90] sm:$0xff] }
 0x566   : > { %2904 = vmatprep.subr.mxu1 %v7654_v3 }
 0x567   : > { %2905 = vmatpush2.msra.mxu1 %v2327_v5  ;;  %v2988_v5 = vld [vmem:[%s9296_s18 + $0x88] sm:$0xff] }
 0x568   : > { %2906 = vmatprep.subr.mxu1 %v7654_v3 }
 0x569   : > { %2907 = vmatpush2.msra.mxu1 %v2326_v6  ;;  %v2987_v6 = vld [vmem:[%s9296_s18 + $0x80] sm:$0xff] }
 0x56a   : > { %2908 = vmatprep.subr.mxu1 %v7654_v3 }
 0x56b   : > { %2909 = vmatpush2.msra.mxu1 %v2325_v7  ;;  %v2986_v7 = vld [vmem:[%s9296_s18 + $0x78] sm:$0xff] }
 0x56c   : > { %2910 = vmatprep.subr.mxu1 %v7654_v3 }
 0x56d   : > { %2911 = vmatpush2.msra.mxu1 %v2324_v19  ;;  %v2985_v19 = vld [vmem:[%s9296_s18 + $0x70] sm:$0xff] }
 0x56e   : > { %7220 = vmatprep.subr.mxu1 %v7654_v3 }
 0x5ee   : > { %v2750_v8 = vpop.f32.mrf.mxu0 }
 0x5f0   : > { %v2752_v9 = vpop.f32.mrf.mxu0 }
 0x5f1   : > { %v2984_v9 = vld [vmem:[%s9296_s18 + $0x68] sm:$0xff] }
 0x5f2   : > { %v2755_v10 = vpop.f32.mrf.mxu0 }
 0x5f4   : > { %v2757_v11 = vpop.f32.mrf.mxu0 }
 0x5f5   : > { %v2983_v11 = vld [vmem:[%s9296_s18 + $0x60] sm:$0xff] }
 0x5f6   : > { %v2669_v12 = vpop.f32.mrf.mxu1 }
 0x5f7   : > { %v2751_v13 = vadd.f32 %v2750_v8, %v2669_v12  ;;  %v2972_v8 = vld [vmem:[%s9296_s18 + $0x8] sm:$0xff] }
 0x5f8   : > { %v2671_v14 = vpop.f32.mrf.mxu1 }
 0x5fa   : > { %v2674_v15 = vpop.f32.mrf.mxu1 }
 0x5fb   : > { %v2756_v20 = vadd.f32 %v2755_v10, %v2674_v15  ;;  %v2971_v10 = vld [vmem:[%s9296_s18] sm:$0xff] }
 0x5fc   : > { %v2676_v16 = vpop.f32.mrf.mxu1 }
 0x5fd   : > { %v3006_v16 = vld [vmem:[%s9296_s18 + $0x118] sm:$0x3] }
 0x5fe   : > { %v2831_v17 = vpop.f32.mrf.mxu1 }
 0x600   : > { %v2833_v18 = vpop.f32.mrf.mxu1 }
 0x601   : > { %6919 = vmatprep.mubr.msk.f32.mxu1 %vm2596_vm5, %v2833_v18  ;;  %v3004_v18 = vld [vmem:[%s9296_s18 + $0x108] sm:$0xff] }
 0x602   : > { %v2837_v21 = vpop.f32.mrf.mxu1  ;;  %2913 = vmatmul.mubr.f32.vlgmr.msra.gmra.mxu1 %v2831_v17  ;;  %v3005_v17 = vld [vmem:[%s9296_s18 + $0x110] sm:$0xff] }
 0x603   : > { %7221 = vmatpush3.msk.msra.mxu1 %vm3236_vm7, %v2982_v44  ;;  %v3566_v44 = vld [vmem:[%s9298_s26 + $0x10] sm:$0xff] }
 0x604   : > { %v2839_v22 = vpop.f32.mrf.mxu1  ;;  %7222 = vmatprep.subr.mxu1 %v7654_v3 }
 0x605   : > { %6920 = vmatprep.mubr.msk.f32.mxu1 %vm2596_vm5, %v2839_v22  ;;  %7223 = vmatpush3.msra.mxu1 %v2981_v45  ;;  %v3002_v22 = vld [vmem:[%s9296_s18 + $0xf8] sm:$0xff]  ;;  %v3565_v45 = vld [vmem:[%s9298_s26 + $0x8] sm:$0xff] }
 0x606   : > { %2918 = vmatmul.mubr.f32.gmra.mxu1 %v2837_v21  ;;  %7224 = vmatprep.subr.mxu1 %v7654_v3  ;;  %v3003_v21 = vld [vmem:[%s9296_s18 + $0x100] sm:$0xff] }
 0x607   : > { %7244 = vmatprep.mubr.msk.f32.mxu1 %vm7656_vm6, %v7654_v3  ;;  %7225 = vmatpush3.msra.mxu1 %v2980_v46  ;;  %v3564_v46 = vld [vmem:[%s9298_s26] sm:$0xff] }
 0x608   : > { %7226 = vmatprep.subr.mxu1 %v7654_v3 }
 0x609   : > { %7227 = vmatpush3.msra.mxu1 %v2979_v47 }
 0x60a   : > { %7228 = vmatprep.subr.mxu1 %v7654_v3 }
 0x60b   : > { %7229 = vmatpush3.msra.mxu1 %v2978_v48 }
 0x60c   : > { %7230 = vmatprep.subr.mxu1 %v7654_v3 }
 0x60d   : > { %7231 = vmatpush3.msra.mxu1 %v2977_v49  ;;  %v3539_v49 = vpop.permute.xlu1 %3538 }
 0x60e   : > { %7232 = vmatprep.subr.mxu1 %v7654_v3 }
 0x60f   : > { %7233 = vmatpush3.msra.mxu1 %v2976_v50 }
 0x610   : > { %7234 = vmatprep.subr.mxu1 %v7654_v3 }
 0x611   : > { %7235 = vmatpush3.msra.mxu1 %v2975_v51 }
 0x612   : > { %7236 = vmatprep.subr.mxu1 %v7654_v3 }
 0x613   : > { %7237 = vmatpush3.msra.mxu1 %v2974_v52 }
 0x614   : > { %7238 = vmatprep.subr.mxu1 %v7654_v3 }
 0x615   : > { %7239 = vmatpush3.msra.mxu1 %v2973_v53  ;;  %v3546_v53 = vpop.permute.xlu0 %3545 }
 0x616   : > { %7240 = vmatprep.subr.mxu1 %v7654_v3 }
 0x617   : > { %7241 = vmatpush3.msra.mxu1 %v2972_v8  ;;  %v3562_v8 = vld [vmem:[%s9299_s1 + $0x38] sm:$0xff] }
 0x618   : > { %7242 = vmatprep.subr.mxu1 %v7654_v3 }
 0x619   : > { %7243 = vmatpush3.msra.mxu1 %v2971_v10 }
 0x6c2   : > { %v2914_v24 = vpop.f32.mrf.mxu1 }
 0x6c3   : > { %v2923_v25 = vadd.f32 %v2914_v24, %v2751_v13  ;;  %v3000_v24 = vld [vmem:[%s9296_s18 + $0xe8] sm:$0xff] }
 0x6c4   : > { %v2916_v27 = vpop.f32.mrf.mxu1 }
 0x6c5   : > { %v2935_v28 = vadd.f32 %v2928_v26, %v2923_v25  ;;  %v2999_v25 = vld [vmem:[%s9296_s18 + $0xe0] sm:$0xff]  ;;  %v2998_v26 = vld [vmem:[%s9296_s18 + $0xd8] sm:$0xff]  ;;  %v2997_v27 = vld [vmem:[%s9296_s18 + $0xd0] sm:$0xff] }
 0x6c6   : > { %v2919_v29 = vpop.f32.mrf.mxu1 }
 0x6c7   : > { %v2924_v30 = vadd.f32 %v2919_v29, %v2756_v20  ;;  %v2937_v33 = vmax.f32 %v2935_v28, 0.0  ;;  %v2967_v20 = vld [vmem:[%s9297_s0 + $0x10] sm:$0xff]  ;;  %v2996_v28 = vld [vmem:[%s9296_s18 + $0xc8] sm:$0xff]  ;;  %v2995_v29 = vld [vmem:[%s9296_s18 + $0xc0] sm:$0xff] }
 0x6c8   : > { %v2921_v32 = vpop.f32.mrf.mxu1 }
 0x6c9   : > { %v2936_v34 = vadd.f32 %v2933_v23, %v2924_v30  ;;  %v2949_v37 = vmul.f32 %v2942_v35, %v2937_v33  ;;  %v3001_v23 = vld [vmem:[%s9296_s18 + $0xf0] sm:$0xff]  ;;  %v3573_v30 = vld [vmem:[%s9298_s26 + $0x48] sm:$0x3f]  ;;  %v3571_v32 = vld [vmem:[%s9298_s26 + $0x38] sm:$0xff] }
 0x6ca   : > { %7279 = vmatprep.subr.msk.mxu1 %vm3608_vm9, %v3573_v30 }
 0x6cb   : > { %v2938_v36 = vmax.f32 %v2936_v34, 0.0  ;;  %v2961_v42 = vadd.f32 %v2954_v41, %v2949_v37  ;;  %v3569_v41 = vld [vmem:[%s9298_s26 + $0x28] sm:$0xff] }
 0x6cd   : > { %v2950_v38 = vmul.f32 %v2947_v31, %v2938_v36  ;;  %v3572_v31 = vld [vmem:[%s9298_s26 + $0x40] sm:$0xff] }
 0x6cf   : > { %v2962_v40 = vadd.f32 %v2959_v39, %v2950_v38 }
 0x6d1   : > { %7177 = vmatpush3.msra.mxu0 %v2962_v40  ;;  %v3570_v40 = vld [vmem:[%s9298_s26 + $0x30] sm:$0xff] }
 0x6d2   : > { %7178 = vmatprep.subr.mxu0 %v7654_v3 }
 0x6d3   : > { %7179 = vmatpush3.msra.mxu0 %v2961_v42  ;;  %v3568_v42 = vld [vmem:[%s9298_s26 + $0x20] sm:$0xff] }
 0x6d4   : > { %7181 = vmatmul.mubr.msk.f32.vlgmr.msra.gmra.mxu0 %vm2429_vm4, %v2963_v43  ;;  %7183 = vmatprep.subr.mxu0 %v7654_v3  ;;  %v3567_v43 = vld [vmem:[%s9298_s26 + $0x18] sm:$0xff] }
 0x6d5   : > { %7185 = vmatprep.mubr.msk.f32.mxu0 %vm7656_vm6, %v7654_v3 }
 0x794   : > { %v3081_v55 = vpop.f32.mrf.mxu0 }
 0x795   : > { %v3082_v56 = vadd.f32 %v3081_v55, %v3010_v54  ;;  %v3552_v55 = vpop.permute.xlu1 %3551 }
 0x796   : > { %v7182_v57 = vpop.f32.mrf.mxu0 }
 0x797   : > { %v3085_v58 = vmax.f32 %v3082_v56, 0.0  ;;  %v3555_v56 = vld [vmem:[%s9299_s1] sm:$0xff]  ;;  %v3556_v57 = vld [vmem:[%s9299_s1 + $0x8] sm:$0xff] }
 0x799   : > { %7184 = vmatpush3.msra.mxu0 %v3085_v58 }
 0x79a   : > { %7186 = vmatmul.mubr.msk.f32.vlgmr.msra.gmra.mxu0 %vm1755_vm2, %v2965_v59  ;;  %7188 = vmatprep.subr.mxu0 %v7654_v3  ;;  %v3557_v59 = vld [vmem:[%s9299_s1 + $0x10] sm:$0xff] }
 0x79b   : > { %7189 = vmatpush3.msra.mxu0 %v3085_v58  ;;  %7190 = vmatprep.mubr.msk.f32.mxu0 %vm7656_vm6, %v7654_v3 }
 0x79c   : > { %7193 = vmatprep.subr.mxu0 %v7654_v3 }
 0x79e   : > { %7191 = vmatmul.mubr.msk.f32.vlgmr.msra.gmra.mxu0 %vm1755_vm2, %v2966_v60 }
 0x79f   : > { %7194 = vmatpush3.msk.msra.mxu0 %vm3236_vm7, %v2994_v61  ;;  %7217 = vmatprep.mubr.msk.f32.mxu0 %vm7656_vm6, %v7654_v3 }
 0x7a0   : > { %7195 = vmatprep.subr.mxu0 %v7654_v3 }
 0x7a1   : > { %7196 = vmatpush3.msra.mxu0 %v2993_v62 }
 0x7a2   : > { %7197 = vmatprep.subr.mxu0 %v7654_v3 }
 0x7a3   : > { %7198 = vmatpush3.msra.mxu0 %v2992_v63  ;;  %v3558_v63 = vld [vmem:[%s9299_s1 + $0x18] sm:$0xff] }
 0x7a4   : > { %7199 = vmatprep.subr.mxu0 %v7654_v3 }
 0x7a5   : > { %7200 = vmatpush3.msra.mxu0 %v2991_v1  ;;  %v3559_v1 = vld [vmem:[%s9299_s1 + $0x20] sm:$0xff] }
 0x7a6   : > { %7201 = vmatprep.subr.mxu0 %v7654_v3 }
 0x7a7   : > { %7202 = vmatpush3.msra.mxu0 %v2990_v2 }
 0x7a8   : > { %7203 = vmatprep.subr.mxu0 %v7654_v3 }
 0x7a9   : > { %7204 = vmatpush3.msra.mxu0 %v2989_v4 }
 0x7aa   : > { %7205 = vmatprep.subr.mxu0 %v7654_v3 }
 0x7ab   : > { %7206 = vmatpush3.msra.mxu0 %v2988_v5  ;;  %v3560_v5 = vld [vmem:[%s9299_s1 + $0x28] sm:$0xff] }
 0x7ac   : > { %7207 = vmatprep.subr.mxu0 %v7654_v3 }
 0x7ad   : > { %7208 = vmatpush3.msra.mxu0 %v2987_v6  ;;  %v3561_v6 = vld [vmem:[%s9299_s1 + $0x30] sm:$0xff] }
 0x7ae   : > { %7209 = vmatprep.subr.mxu0 %v7654_v3 }
 0x7af   : > { %7210 = vmatpush3.msra.mxu0 %v2986_v7 }
 0x7b0   : > { %7211 = vmatprep.subr.mxu0 %v7654_v3 }
 0x7b1   : > { %7212 = vmatpush3.msra.mxu0 %v2985_v19 }
 0x7b2   : > { %7213 = vmatprep.subr.mxu0 %v7654_v3 }
 0x7b3   : > { %7214 = vmatpush3.msra.mxu0 %v2984_v9 }
 0x7b4   : > { %7215 = vmatprep.subr.mxu0 %v7654_v3 }
 0x7b5   : > { %7216 = vmatpush3.msra.mxu0 %v2983_v11 }
 0x7b6   : > { %7247 = vmatprep.subr.mxu0 %v7654_v3 }
 0x85a   : > { %v3155_v12 = vpop.f32.mrf.mxu0 }
 0x85b   : > { %7245 = vmatmul.mubr.msk.f32.vlgmr.msra.gmra.mxu1 %vm3232_vm8, %v3155_v12 }
 0x85c   : > { %v7187_v13 = vpop.f32.mrf.mxu0  ;;  %7280 = vmatpush3.msk.msra.mxu1 %vm3608_vm9, %v3573_v30 }
 0x85d   : > { %7281 = vmatprep.subr.mxu1 %v3572_v31 }
 0x85e   : > { %v3228_v14 = vpop.f32.mrf.mxu0  ;;  %7282 = vmatpush3.msra.mxu1 %v3572_v31 }
 0x85f   : > { %7218 = vmatmul.mubr.msk.f32.vlgmr.msra.gmra.mxu0 %vm3232_vm8, %v3228_v14  ;;  %7283 = vmatprep.subr.mxu1 %v3571_v32 }
 0x860   : > { %7248 = vmatpush3.msra.mxu0 %v3085_v58  ;;  %7249 = vmatprep.mubr.msk.f32.mxu0 %vm7656_vm6, %v7654_v3  ;;  %v7192_v15 = vpop.f32.mrf.mxu0 }
 0x861   : > { %7252 = vmatprep.subr.mxu0 %v7654_v3  ;;  %7284 = vmatpush3.msra.mxu1 %v3571_v32 }
 0x862   : > { %7285 = vmatprep.subr.mxu1 %v3570_v40 }
 0x863   : > { %7250 = vmatmul.mubr.msk.f32.vlgmr.msra.gmra.mxu0 %vm1755_vm2, %v2967_v20  ;;  %7286 = vmatpush3.msra.mxu1 %v3570_v40 }
 0x864   : > { %7253 = vmatpush3.msk.msra.mxu0 %vm3236_vm7, %v3006_v16  ;;  %7276 = vmatprep.mubr.msk.f32.mxu0 %vm7656_vm6, %v7654_v3 }
 0x865   : > { %7254 = vmatprep.subr.mxu0 %v7654_v3  ;;  %7287 = vmatprep.subr.mxu1 %v3569_v41 }
 0x866   : > { %7255 = vmatpush3.msra.mxu0 %v3005_v17  ;;  %7288 = vmatpush3.msra.mxu1 %v3569_v41  ;;  %v3563_v17 = vld [vmem:[%s9300_s2] sm:$0xff] }
 0x867   : > { %7256 = vmatprep.subr.mxu0 %v7654_v3  ;;  %7289 = vmatprep.subr.mxu1 %v3568_v42 }
 0x868   : > { %7257 = vmatpush3.msra.mxu0 %v3004_v18  ;;  %7290 = vmatpush3.msra.mxu1 %v3568_v42  ;;  %v3720_v18 = vpop.permute.xlu0 %3719 }
 0x869   : > { %7258 = vmatprep.subr.mxu0 %v7654_v3  ;;  %7291 = vmatprep.subr.mxu1 %v3567_v43 }
 0x86a   : > { %7259 = vmatpush3.msra.mxu0 %v3003_v21  ;;  %7292 = vmatpush3.msra.mxu1 %v3567_v43 }
 0x86b   : > { %7260 = vmatprep.subr.mxu0 %v7654_v3  ;;  %7293 = vmatprep.subr.mxu1 %v3566_v44 }
 0x86c   : > { %7261 = vmatpush3.msra.mxu0 %v3002_v22  ;;  %7294 = vmatpush3.msra.mxu1 %v3566_v44 }
 0x86d   : > { %7262 = vmatprep.subr.mxu0 %v7654_v3  ;;  %7295 = vmatprep.subr.mxu1 %v3565_v45 }
 0x86e   : > { %7263 = vmatpush3.msra.mxu0 %v3001_v23  ;;  %7296 = vmatpush3.msra.mxu1 %v3565_v45 }
 0x86f   : > { %7264 = vmatprep.subr.mxu0 %v7654_v3  ;;  %7297 = vmatprep.subr.mxu1 %v3564_v46 }
 0x870   : > { %7265 = vmatpush3.msra.mxu0 %v3000_v24  ;;  %7298 = vmatpush3.msra.mxu1 %v3564_v46 }
 0x871   : > { %7266 = vmatprep.subr.mxu0 %v7654_v3 }
 0x872   : > { %7267 = vmatpush3.msra.mxu0 %v2999_v25 }
 0x873   : > { %7268 = vmatprep.subr.mxu0 %v7654_v3 }
 0x874   : > { %7269 = vmatpush3.msra.mxu0 %v2998_v26 }
 0x875   : > { %7270 = vmatprep.subr.mxu0 %v7654_v3 }
 0x876   : > { %7271 = vmatpush3.msra.mxu0 %v2997_v27 }
 0x877   : > { %7272 = vmatprep.subr.mxu0 %v7654_v3 }
 0x878   : > { %7273 = vmatpush3.msra.mxu0 %v2996_v28 }
 0x879   : > { %7274 = vmatprep.subr.mxu0 %v7654_v3 }
 0x87a   : > { %7275 = vmatpush3.msra.mxu0 %v2995_v29 }
 0x87b   : > { %7311 = vmatprep.subr.mxu0 %v7654_v3 }
 0x91b   : > { %v3382_v33 = vpop.f32.mrf.mxu1 }
 0x91d   : > { %v7246_v34 = vpop.f32.mrf.mxu1 }
 0x91f   : > { %v3306_v35 = vpop.f32.mrf.mxu0 }
 0x920   : > { %v3383_v36 = vadd.f32 %v3382_v33, %v3306_v35 }
 0x921   : > { %v7219_v37 = vpop.f32.mrf.mxu0 }
 0x923   : > { %v3455_v38 = vpop.f32.mrf.mxu0 }
 0x924   : > { %7277 = vmatmul.mubr.msk.f32.vlgmr.msra.gmra.mxu0 %vm3232_vm8, %v3455_v38 }
 0x925   : > { %v7251_v39 = vpop.f32.mrf.mxu0  ;;  %7327 = vmatprep.mubr.msk.f32.mxu0 %vm7656_vm6, %v7654_v3 }
 0x9e4   : > { %v3531_v47 = vpop.f32.mrf.mxu0 }
 0x9e5   : > { %v3535_v48 = vadd.f32 %v3531_v47, %v3383_v36 }
 0x9e6   : > { %v7278_v50 = vpop.f32.mrf.mxu0 }
 0x9e7   : > { %v3541_v51 = vadd.f32 %v3539_v49, %v3535_v48 }
 0x9e9   : > { %v3542_v52 = vmax.f32 %v3541_v51, 0.0 }
 0x9eb   : > { %v3548_v54 = vmul.f32 %v3546_v53, %v3542_v52 }
 0x9ed   : > { %v3554_v58 = vadd.f32 %v3552_v55, %v3548_v54 }
 0x9ef   : > { %v3575_v60 = vmul.f32 %v3555_v56, %v3554_v58  ;;  %v3576_v61 = vmul.f32 %v3556_v57, %v3554_v58  ;;  %v3577_v62 = vmul.f32 %v3557_v59, %v3554_v58  ;;  %v3578_v2 = vmul.f32 %v3558_v63, %v3554_v58 }
 0x9f0   : > { %v3579_v4 = vmul.f32 %v3559_v1, %v3554_v58  ;;  %v3580_v7 = vmul.f32 %v3560_v5, %v3554_v58  ;;  %v3581_v19 = vmul.f32 %v3561_v6, %v3554_v58  ;;  %v3582_v9 = vmul.f32 %v3562_v8, %v3554_v58 }
 0x9f1   : > { %7299 = vmatprep.mubr.msk.f32.mxu1 %vm3583_vm10, %v3575_v60 }
 0x9f2   : > { %7300 = vmatmul.mubr.msk.f32.vlgmr.msra.gmra.mxu1 %vm3583_vm10, %v3576_v61 }
 0x9f3   : > { %7302 = vmatprep.mubr.msk.f32.mxu1 %vm3583_vm10, %v3577_v62 }
 0x9f6   : > { %7303 = vmatmul.mubr.msk.f32.gmra.mxu1 %vm3583_vm10, %v3578_v2 }
 0x9f7   : > { %7305 = vmatprep.mubr.msk.f32.mxu1 %vm3583_vm10, %v3579_v4 }
 0x9fa   : > { %7306 = vmatmul.mubr.msk.f32.gmra.mxu1 %vm3583_vm10, %v3580_v7 }
 0x9fb   : > { %7308 = vmatprep.mubr.msk.f32.mxu1 %vm3583_vm10, %v3581_v19 }
 0x9fe   : > { %7309 = vmatmul.mubr.msk.f32.gmra.mxu1 %vm3583_vm10, %v3582_v9 }
 0xab2   : > { %v7301_v10 = vpop.f32.mrf.mxu1 }
 0xab4   : > { %v3678_v11 = vpop.f32.mrf.mxu1 }
 0xab6   : > { %v7304_v12 = vpop.f32.mrf.mxu1 }
 0xab8   : > { %v3688_v13 = vpop.f32.mrf.mxu1 }
 0xaba   : > { %v7307_v14 = vpop.f32.mrf.mxu1 }
 0xabc   : > { %v3698_v15 = vpop.f32.mrf.mxu1 }
 0xabe   : > { %v7310_v20 = vpop.f32.mrf.mxu1 }
 0xabf   : > { %7312 = vmatpush3.msra.mxu0 %v7310_v20 }
 0xac0   : > { %v3708_v16 = vpop.f32.mrf.mxu1  ;;  %7313 = vmatprep.subr.mxu0 %v7654_v3 }
 0xac1   : > { %7314 = vmatpush3.msra.mxu0 %v3708_v16 }
 0xac2   : > { %7315 = vmatprep.subr.mxu0 %v7654_v3 }
 0xac3   : > { %7316 = vmatpush3.msra.mxu0 %v7307_v14 }
 0xac4   : > { %7317 = vmatprep.subr.mxu0 %v7654_v3 }
 0xac5   : > { %7318 = vmatpush3.msra.mxu0 %v3698_v15 }
 0xac6   : > { %7319 = vmatprep.subr.mxu0 %v7654_v3 }
 0xac7   : > { %7320 = vmatpush3.msra.mxu0 %v7304_v12 }
 0xac8   : > { %7321 = vmatprep.subr.mxu0 %v7654_v3 }
 0xac9   : > { %7322 = vmatpush3.msra.mxu0 %v3688_v13 }
 0xaca   : > { %7323 = vmatprep.subr.mxu0 %v7654_v3 }
 0xacb   : > { %7324 = vmatpush3.msra.mxu0 %v7301_v10 }
 0xacc   : > { %7325 = vmatprep.subr.mxu0 %v7654_v3 }
 0xacd   : > { %7326 = vmatpush3.msra.mxu0 %v3678_v11 }
 0xace   : > { %7328 = vmatmul.mubr.msk.f32.vlgmr.msra.gmra.mxu0 %vm2596_vm5, %v3563_v17 }
 0xb8e   : > { %v3791_v21 = vpop.f32.mrf.mxu0 }
 0xb8f   : > { %v3792_v22 = vadd.f32 %v3791_v21, %v3720_v18 }
 0xb90   : > { %v7329_v23 = vpop.f32.mrf.mxu0 }
 0xb91   : > { %3796 = vst.msk [vmem:[%s7941_s28] sm:$0xff] %vm3795_vm11, %v3792_v22 }
 0xb92 PF: > { %p6941_p5 = scmp.ne.s32.totalorder %s7931_s23, 1 }
 0xb93   : > { %s9301_s7 = sld [smem:[#allocation19_spill]] (!%p6941_p5) }
 0xb94   : > { %3800 = sbr.rel (%p6941_p5) target bundleno = 6221 (0x184d), region = 232  ;;  %s9302_s16 = sld [smem:[#allocation18_spill]] (!%p6941_p5) }
 0xb95   : > { %s9303_s2 = sld [smem:[#allocation24_spill]] (!%p6941_p5) }
 0xb96   : > { %s9304_s0 = sld [smem:[#allocation21_spill]] (!%p6941_p5) }
 0xb97   : > { %s9305_s23 = sld [smem:[#allocation26_spill]] (!%p6941_p5) }
 0xb98   : > { %s9309_s1 = sld [smem:[#allocation33_spill]] (!%p6941_p5) }
 0xb99   : > { %v3971_v3 = vcombine.high %v7937_v0, %v7937_v0  ;;  %vm3976_vm12 = vcmask 1043456   ;;  %v3802_v24 = vld [vmem:[%s9301_s7] sm:$0xff]  ;;  %v7657_v25 = vmov 0.0   ;;  %vm3972_vm13 = vcmask 31744   ;;  %s9306_s7 = sld [smem:[#allocation28_spill]] }
 0xb9a   : > { %4045 = vmatprep.mubr.f32.mxu0 %v7657_v25  ;;  %v3801_v26 = vld [vmem:[%s9302_s16] sm:$0xff]  ;;  %v7658_v27 = vmov 0   ;;  %s9308_s16 = sld [smem:[#allocation30_spill]]  ;;  %vm4054_vm14 = vcmask 64512   ;;  %vm4203_vm15 = vcmask 621568   ;;  %vm4780_vm0 = vcmask 130048  }
 0xb9b   : > { %6942 = vmatprep.subr.msk.mxu0 %vm3976_vm12, %v3971_v3  ;;  %7593 = vset.pattern.permute.xlu0 %v7658_v27  ;;  %v3892_v28 = vld [vmem:[%s9303_s2 + $0x298] sm:$0xff]  ;;  %v3891_v29 = vld [vmem:[%s9303_s2 + $0x290] sm:$0xff]  ;;  %v3890_v31 = vld [vmem:[%s9303_s2 + $0x288] sm:$0xff]  ;;  %s9310_s3 = sld [smem:[#allocation36_spill]]  ;;  %vm4947_vm1 = vcmask 523264   ;;  %vm7659_vm2 = vmmov 0  }
 0xb9c   : > { %6943 = vmatpush1.msk.msra.mxu0 %vm3976_vm12, %v7937_v0  ;;  %3967 = vperm.xlu0 %7593, %v3802_v24   ;;  %v3806_v30 = vld [vmem:[%s9304_s0] sm:$0xff]  ;;  %v3888_v33 = vld [vmem:[%s9303_s2 + $0x278] sm:$0xff]  ;;  %v3887_v0 = vld [vmem:[%s9303_s2 + $0x270] sm:$0xff]  ;;  %s9307_s0 = sld [smem:[#allocation29_spill]]  ;;  %vm5936_vm3 = vcmask 687104   ;;  %vm6605_vm4 = vcmask 1045504  }
 0xb9d   : > { %6944 = vmatmul.mubr.msk.f32.vlgmr.msra.gmra.mxu0 %vm3972_vm13, %v3801_v26  ;;  %4213 = vmatprep.subr.mxu1 %v3892_v28  ;;  %v3889_v32 = vld [vmem:[%s9303_s2 + $0x280] sm:$0xff]  ;;  %v3886_v34 = vld [vmem:[%s9303_s2 + $0x268] sm:$0xff]  ;;  %v3884_v37 = vld [vmem:[%s9303_s2 + $0x258] sm:$0xff]  ;;  %s9314_s4 = sld [smem:[#allocation35_spill]]  ;;  %vm6580_vm5 = vcmask 244736   ;;  %vm6792_vm6 = vcmask 48128  }
 0xb9e   : > { %4214 = vmatpush1.msra.mxu1 %v3891_v29  ;;  %4122 = vmatprep.mubr.f32.mxu0 %v7657_v25  ;;  %v4546_v35 = vld [vmem:[%s9305_s23 + $0x8] sm:$0xff]  ;;  %v3885_v36 = vld [vmem:[%s9303_s2 + $0x260] sm:$0xff]  ;;  %v3883_v38 = vld [vmem:[%s9303_s2 + $0x250] sm:$0xff]  ;;  %s9315_s5 = sld [smem:[#allocation37_spill]] }
 0xb9f   : > { %4215 = vmatprep.subr.mxu1 %v3890_v31  ;;  %7594 = vset.pattern.permute.xlu1 %v7658_v27  ;;  %v3882_v39 = vld [vmem:[%s9303_s2 + $0x248] sm:$0xff]  ;;  %v3881_v41 = vld [vmem:[%s9303_s2 + $0x240] sm:$0xff]  ;;  %v3880_v42 = vld [vmem:[%s9303_s2 + $0x238] sm:$0xff]  ;;  %s9316_s6 = sld [smem:[#allocation31_spill]] }
 0xba0   : > { %4522 = vperm.xlu0 %7593, %v3806_v30   ;;  %4216 = vmatpush1.msra.mxu1 %v3889_v32  ;;  %v4558_v40 = vld [vmem:[%s9306_s7 + $0x8] sm:$0xff]  ;;  %v3879_v43 = vld [vmem:[%s9303_s2 + $0x230] sm:$0xff]  ;;  %v3877_v46 = vld [vmem:[%s9303_s2 + $0x220] sm:$0xff] }
 0xba1   : > { %4217 = vmatprep.subr.mxu1 %v3888_v33  ;;  %v3878_v44 = vld [vmem:[%s9303_s2 + $0x228] sm:$0xff]  ;;  %v3876_v47 = vld [vmem:[%s9303_s2 + $0x218] sm:$0xff]  ;;  %v3875_v48 = vld [vmem:[%s9303_s2 + $0x210] sm:$0xff] }
 0xba2   : > { %4218 = vmatpush1.msra.mxu1 %v3887_v0  ;;  %v4560_v45 = vld [vmem:[%s9307_s0 + $0x8] sm:$0xff]  ;;  %v3873_v51 = vld [vmem:[%s9303_s2 + $0x200] sm:$0xff]  ;;  %v3872_v52 = vld [vmem:[%s9303_s2 + $0x1f8] sm:$0xff] }
 0xba3   : > { %4219 = vmatprep.subr.mxu1 %v3886_v34  ;;  %v3874_v49 = vld [vmem:[%s9303_s2 + $0x208] sm:$0xff]  ;;  %v3871_v53 = vld [vmem:[%s9303_s2 + $0x1f0] sm:$0xff]  ;;  %v5647_v55 = vld [vmem:[%s9309_s1] sm:$0xff]  ;;  %s9312_s1 = sld [smem:[#allocation22_spill]] }
 0xba4   : > { %4690 = vperm.xlu0 %7593, %v4546_v35   ;;  %4220 = vmatpush1.msra.mxu1 %v3885_v36  ;;  %v4562_v50 = vld [vmem:[%s9308_s16 + $0x8] sm:$0xff]  ;;  %v3869_v56 = vld [vmem:[%s9303_s2 + $0x1e0] sm:$0xff]  ;;  %v3868_v57 = vld [vmem:[%s9303_s2 + $0x1d8] sm:$0xff] }
 0xba5   : > { %4221 = vmatprep.subr.mxu1 %v3884_v37  ;;  %v3870_v54 = vld [vmem:[%s9303_s2 + $0x1e8] sm:$0xff]  ;;  %v3867_v58 = vld [vmem:[%s9303_s2 + $0x1d0] sm:$0xff]  ;;  %v5654_v60 = vld [vmem:[%s9310_s3] sm:$0xff]  ;;  %s9311_s3 = sld [smem:[#allocation20_spill]] }
 0xba6   : > { %4222 = vmatpush1.msra.mxu1 %v3883_v38  ;;  %v3866_v59 = vld [vmem:[%s9303_s2 + $0x1c8] sm:$0xff]  ;;  %v3865_v61 = vld [vmem:[%s9303_s2 + $0x1c0] sm:$0xff]  ;;  %v3864_v62 = vld [vmem:[%s9303_s2 + $0x1b8] sm:$0xff] }
 0xba7   : > { %4223 = vmatprep.subr.mxu1 %v3882_v39  ;;  %v3863_v63 = vld [vmem:[%s9303_s2 + $0x1b0] sm:$0xff]  ;;  %v3862_v1 = vld [vmem:[%s9303_s2 + $0x1a8] sm:$0xff]  ;;  %v6571_v2 = vld [vmem:[%s7918_s8] sm:$0xff] }
 0xba8   : > { %5615 = vperm.xlu0 %7593, %v4558_v40   ;;  %4224 = vmatpush1.msra.mxu1 %v3881_v41  ;;  %v3861_v4 = vld [vmem:[%s9303_s2 + $0x1a0] sm:$0xff]  ;;  %v3912_v5 = vld [vmem:[%s9303_s2 + $0x338] sm:$0xf]  ;;  %v3911_v6 = vld [vmem:[%s9303_s2 + $0x330] sm:$0xf] }
 0xba9   : > { %4225 = vmatprep.subr.mxu1 %v3880_v42  ;;  %v3910_v7 = vld [vmem:[%s9303_s2 + $0x328] sm:$0xff]  ;;  %v3909_v19 = vld [vmem:[%s9303_s2 + $0x320] sm:$0xff]  ;;  %v3908_v8 = vld [vmem:[%s9303_s2 + $0x318] sm:$0xff] }
 0xbaa   : > { %4226 = vmatpush1.msra.mxu1 %v3879_v43  ;;  %v3907_v9 = vld [vmem:[%s9303_s2 + $0x310] sm:$0xff]  ;;  %v3906_v10 = vld [vmem:[%s9303_s2 + $0x308] sm:$0xff]  ;;  %v3905_v11 = vld [vmem:[%s9303_s2 + $0x300] sm:$0xff] }
 0xbab   : > { %4227 = vmatprep.subr.mxu1 %v3878_v44  ;;  %v3904_v12 = vld [vmem:[%s9303_s2 + $0x2f8] sm:$0xff]  ;;  %v3903_v13 = vld [vmem:[%s9303_s2 + $0x2f0] sm:$0xff]  ;;  %v3902_v14 = vld [vmem:[%s9303_s2 + $0x2e8] sm:$0xff] }
 0xbac   : > { %5629 = vperm.xlu0 %7593, %v4560_v45   ;;  %4228 = vmatpush1.msra.mxu1 %v3877_v46  ;;  %v3901_v15 = vld [vmem:[%s9303_s2 + $0x2e0] sm:$0xff]  ;;  %v3900_v20 = vld [vmem:[%s9303_s2 + $0x2d8] sm:$0xff]  ;;  %v3899_v16 = vld [vmem:[%s9303_s2 + $0x2d0] sm:$0xff] }
 0xbad   : > { %4229 = vmatprep.subr.mxu1 %v3876_v47  ;;  %v3898_v17 = vld [vmem:[%s9303_s2 + $0x2c8] sm:$0xff]  ;;  %v3897_v18 = vld [vmem:[%s9303_s2 + $0x2c0] sm:$0xff]  ;;  %v3896_v21 = vld [vmem:[%s9303_s2 + $0x2b8] sm:$0xff] }
 0xbae   : > { %4230 = vmatpush1.msra.mxu1 %v3875_v48  ;;  %v3895_v22 = vld [vmem:[%s9303_s2 + $0x2b0] sm:$0xff]  ;;  %v3894_v23 = vld [vmem:[%s9303_s2 + $0x2a8] sm:$0xff]  ;;  %v3893_v3 = vld [vmem:[%s9303_s2 + $0x2a0] sm:$0xff] }
 0xbaf   : > { %4231 = vmatprep.subr.mxu1 %v3874_v49  ;;  %v3803_v32 = vld [vmem:[%s9311_s3] sm:$0xff]  ;;  %v3840_v33 = vld [vmem:[%s9303_s2 + $0xf8] sm:$0xff]  ;;  %v3804_v0 = vld [vmem:[%s9311_s3 + $0x8] sm:$0xff] }
 0xbb0   : > { %5641 = vperm.xlu0 %7593, %v4562_v50   ;;  %4232 = vmatpush1.msra.mxu1 %v3873_v51  ;;  %v3839_v34 = vld [vmem:[%s9303_s2 + $0xf0] sm:$0xff]  ;;  %v3838_v35 = vld [vmem:[%s9303_s2 + $0xe8] sm:$0xff]  ;;  %v3837_v36 = vld [vmem:[%s9303_s2 + $0xe0] sm:$0xff] }
 0xbb1   : > { %4233 = vmatprep.subr.mxu1 %v3872_v52  ;;  %v3836_v37 = vld [vmem:[%s9303_s2 + $0xd8] sm:$0xff]  ;;  %v3835_v38 = vld [vmem:[%s9303_s2 + $0xd0] sm:$0xff]  ;;  %v3834_v39 = vld [vmem:[%s9303_s2 + $0xc8] sm:$0xff] }
 0xbb2   : > { %4234 = vmatpush1.msra.mxu1 %v3871_v53  ;;  %v3833_v40 = vld [vmem:[%s9303_s2 + $0xc0] sm:$0xff]  ;;  %v3832_v41 = vld [vmem:[%s9303_s2 + $0xb8] sm:$0xff]  ;;  %v3831_v42 = vld [vmem:[%s9303_s2 + $0xb0] sm:$0xff] }
 0xbb3   : > { %4235 = vmatprep.subr.mxu1 %v3870_v54  ;;  %v3830_v43 = vld [vmem:[%s9303_s2 + $0xa8] sm:$0xff]  ;;  %v3829_v44 = vld [vmem:[%s9303_s2 + $0xa0] sm:$0xff]  ;;  %v3828_v45 = vld [vmem:[%s9303_s2 + $0x98] sm:$0xff] }
 0xbb4   : > { %5713 = vperm.xlu0 %7593, %v5647_v55   ;;  %4236 = vmatpush1.msra.mxu1 %v3869_v56  ;;  %v3827_v46 = vld [vmem:[%s9303_s2 + $0x90] sm:$0xff]  ;;  %v3826_v47 = vld [vmem:[%s9303_s2 + $0x88] sm:$0xff]  ;;  %v3825_v48 = vld [vmem:[%s9303_s2 + $0x80] sm:$0xff] }
 0xbb5   : > { %4237 = vmatprep.subr.mxu1 %v3868_v57  ;;  %v3824_v49 = vld [vmem:[%s9303_s2 + $0x78] sm:$0xff]  ;;  %v3823_v50 = vld [vmem:[%s9303_s2 + $0x70] sm:$0xff]  ;;  %v3822_v51 = vld [vmem:[%s9303_s2 + $0x68] sm:$0xff] }
 0xbb6   : > { %4238 = vmatpush1.msra.mxu1 %v3867_v58  ;;  %v3821_v52 = vld [vmem:[%s9303_s2 + $0x60] sm:$0xff]  ;;  %v3820_v53 = vld [vmem:[%s9303_s2 + $0x58] sm:$0xff]  ;;  %v3819_v54 = vld [vmem:[%s9303_s2 + $0x50] sm:$0xff] }
 0xbb7   : > { %4239 = vmatprep.subr.mxu1 %v3866_v59  ;;  %v3818_v55 = vld [vmem:[%s9303_s2 + $0x48] sm:$0xff]  ;;  %v3817_v56 = vld [vmem:[%s9303_s2 + $0x40] sm:$0xff]  ;;  %v3816_v57 = vld [vmem:[%s9303_s2 + $0x38] sm:$0xff] }
 0xbb8   : > { %6548 = vperm.xlu0 %7593, %v5654_v60   ;;  %4240 = vmatpush1.msra.mxu1 %v3865_v61  ;;  %v3815_v58 = vld [vmem:[%s9303_s2 + $0x30] sm:$0xff]  ;;  %v3814_v59 = vld [vmem:[%s9303_s2 + $0x28] sm:$0xff]  ;;  %v3813_v60 = vld [vmem:[%s9303_s2 + $0x20] sm:$0xff] }
 0xbb9   : > { %4241 = vmatprep.subr.mxu1 %v3864_v62  ;;  %v3812_v61 = vld [vmem:[%s9303_s2 + $0x18] sm:$0xff]  ;;  %v3811_v62 = vld [vmem:[%s9303_s2 + $0x10] sm:$0xff] }
 0xbba   : > { %4242 = vmatpush1.msra.mxu1 %v3863_v63  ;;  %v3810_v63 = vld [vmem:[%s9303_s2 + $0x8] sm:$0xff] }
 0xbbb   : > { %4243 = vmatprep.subr.mxu1 %v3862_v1  ;;  %v3809_v1 = vld [vmem:[%s9303_s2] sm:$0xff] }
 0xbbc   : > { %6716 = vperm.xlu0 %7593, %v6571_v2   ;;  %4244 = vmatpush1.msra.mxu1 %v3861_v4  ;;  %v3860_v2 = vld [vmem:[%s9303_s2 + $0x198] sm:$0xf]  ;;  %v3859_v4 = vld [vmem:[%s9303_s2 + $0x190] sm:$0xf] }
 0xbbd   : > { %6947 = vmatprep.subr.msk.mxu1 %vm3976_vm12, %v3912_v5  ;;  %v3858_v5 = vld [vmem:[%s9303_s2 + $0x188] sm:$0xff] }
 0xbbe   : > { %6948 = vmatpush2.msk.msra.mxu1 %vm3976_vm12, %v3911_v6  ;;  %v3857_v6 = vld [vmem:[%s9303_s2 + $0x180] sm:$0xff] }
 0xbbf   : > { %4259 = vmatprep.subr.mxu1 %v3910_v7  ;;  %v3856_v7 = vld [vmem:[%s9303_s2 + $0x178] sm:$0xff] }
 0xbc0   : > { %4260 = vmatpush2.msra.mxu1 %v3909_v19  ;;  %v3855_v19 = vld [vmem:[%s9303_s2 + $0x170] sm:$0xff] }
 0xbc1   : > { %4261 = vmatprep.subr.mxu1 %v3908_v8  ;;  %v3854_v8 = vld [vmem:[%s9303_s2 + $0x168] sm:$0xff] }
 0xbc2   : > { %4262 = vmatpush2.msra.mxu1 %v3907_v9  ;;  %v3853_v9 = vld [vmem:[%s9303_s2 + $0x160] sm:$0xff] }
 0xbc3   : > { %4263 = vmatprep.subr.mxu1 %v3906_v10  ;;  %v3852_v10 = vld [vmem:[%s9303_s2 + $0x158] sm:$0xff] }
 0xbc4   : > { %4264 = vmatpush2.msra.mxu1 %v3905_v11  ;;  %v3851_v11 = vld [vmem:[%s9303_s2 + $0x150] sm:$0xff] }
 0xbc5   : > { %4265 = vmatprep.subr.mxu1 %v3904_v12  ;;  %v3850_v12 = vld [vmem:[%s9303_s2 + $0x148] sm:$0xff] }
 0xbc6   : > { %4266 = vmatpush2.msra.mxu1 %v3903_v13  ;;  %v3849_v13 = vld [vmem:[%s9303_s2 + $0x140] sm:$0xff] }
 0xbc7   : > { %4267 = vmatprep.subr.mxu1 %v3902_v14  ;;  %v3848_v14 = vld [vmem:[%s9303_s2 + $0x138] sm:$0xff] }
 0xbc8   : > { %4268 = vmatpush2.msra.mxu1 %v3901_v15  ;;  %v3847_v15 = vld [vmem:[%s9303_s2 + $0x130] sm:$0xff] }
 0xbc9   : > { %4269 = vmatprep.subr.mxu1 %v3900_v20  ;;  %v3846_v20 = vld [vmem:[%s9303_s2 + $0x128] sm:$0xff] }
 0xbca   : > { %4270 = vmatpush2.msra.mxu1 %v3899_v16  ;;  %v3845_v16 = vld [vmem:[%s9303_s2 + $0x120] sm:$0xff] }
 0xbcb   : > { %4271 = vmatprep.subr.mxu1 %v3898_v17  ;;  %v3844_v17 = vld [vmem:[%s9303_s2 + $0x118] sm:$0xff] }
 0xbcc   : > { %4272 = vmatpush2.msra.mxu1 %v3897_v18  ;;  %v3843_v18 = vld [vmem:[%s9303_s2 + $0x110] sm:$0xff] }
 0xbcd   : > { %4273 = vmatprep.subr.mxu1 %v3896_v21  ;;  %v3842_v21 = vld [vmem:[%s9303_s2 + $0x108] sm:$0xff] }
 0xbce   : > { %4274 = vmatpush2.msra.mxu1 %v3895_v22  ;;  %v3841_v22 = vld [vmem:[%s9303_s2 + $0x100] sm:$0xff] }
 0xbcf   : > { %4275 = vmatprep.subr.mxu1 %v3894_v23  ;;  %v3944_v23 = vld [vmem:[%s9303_s2 + $0x438] sm:$0xff] }
 0xbd0   : > { %4276 = vmatpush2.msra.mxu1 %v3893_v3 }
 0xc17   : > { %v3968_v26 = vpop.permute.xlu0 %3967 }
 0xc5d   : > { %v4047_v24 = vpop.f32.mrf.mxu0 }
 0xc5e   : > { %v4048_v27 = vadd.f32 %v4047_v24, %v3968_v26 }
 0xc5f   : > { %v4049_v28 = vpop.f32.mrf.mxu0 }
 0xc60   : > { %v4050_v29 = vadd.f32 %v4049_v28, %v3968_v26  ;;  %v8562_v31 = vmax.f32 %v4048_v27, 0.0  ;;  %v3943_v26 = vld [vmem:[%s9303_s2 + $0x430] sm:$0xff]  ;;  %v3942_v27 = vld [vmem:[%s9303_s2 + $0x428] sm:$0xff] }
 0xc62   : > { %v4053_v30 = vmax.f32 %v4050_v29, 0.0  ;;  %v3941_v29 = vld [vmem:[%s9303_s2 + $0x420] sm:$0xff] }
 0xc64   : > { %4088 = vmatprep.subr.mxu0 %v4053_v30  ;;  %4397 = vmatprep.subr.mxu1 %v4053_v30 }
 0xc65   : > { %4089 = vmatpush1.msra.mxu0 %v8562_v31 }
 0xc66   : > { %6945 = vmatmul.mubr.msk.f32.vlgmr.msra.gmra.mxu0 %vm4054_vm14, %v3803_v32  ;;  %4162 = vmatprep.subr.mxu0 %v4053_v30  ;;  %v3940_v30 = vld [vmem:[%s9303_s2 + $0x418] sm:$0xff] }
 0xc67   : > { %4163 = vmatpush1.msra.mxu0 %v8562_v31  ;;  %4196 = vmatprep.mubr.f32.mxu0 %v7657_v25 }
 0xc68   : > { %4293 = vmatprep.subr.mxu0 %v3840_v33  ;;  %v3939_v33 = vld [vmem:[%s9303_s2 + $0x410] sm:$0xff] }
 0xc6a   : > { %6946 = vmatmul.mubr.msk.f32.vlgmr.msra.gmra.mxu0 %vm4054_vm14, %v3804_v0  ;;  %v3938_v0 = vld [vmem:[%s9303_s2 + $0x408] sm:$0xff] }
 0xc6b   : > { %4294 = vmatpush1.msra.mxu0 %v3839_v34  ;;  %v3805_v34 = vld [vmem:[%s9311_s3 + $0x10] sm:$0xff]  ;;  %s9313_s3 = sld [smem:[#allocation23_spill]] }
 0xc6c   : > { %4295 = vmatprep.subr.mxu0 %v3838_v35  ;;  %v3937_v35 = vld [vmem:[%s9303_s2 + $0x400] sm:$0xff] }
 0xc6d   : > { %4296 = vmatpush1.msra.mxu0 %v3837_v36  ;;  %v3936_v36 = vld [vmem:[%s9303_s2 + $0x3f8] sm:$0xff] }
 0xc6e   : > { %4297 = vmatprep.subr.mxu0 %v3836_v37  ;;  %v3935_v37 = vld [vmem:[%s9303_s2 + $0x3f0] sm:$0xff] }
 0xc6f   : > { %4298 = vmatpush1.msra.mxu0 %v3835_v38  ;;  %v3934_v38 = vld [vmem:[%s9303_s2 + $0x3e8] sm:$0xff] }
 0xc70   : > { %4299 = vmatprep.subr.mxu0 %v3834_v39  ;;  %v3932_v39 = vld [vmem:[%s9303_s2 + $0x3d8] sm:$0xff] }
 0xc71   : > { %4300 = vmatpush1.msra.mxu0 %v3833_v40  ;;  %v3931_v40 = vld [vmem:[%s9303_s2 + $0x3d0] sm:$0xff] }
 0xc72   : > { %4301 = vmatprep.subr.mxu0 %v3832_v41  ;;  %v3930_v41 = vld [vmem:[%s9303_s2 + $0x3c8] sm:$0xff] }
 0xc73   : > { %4302 = vmatpush1.msra.mxu0 %v3831_v42  ;;  %v3929_v42 = vld [vmem:[%s9303_s2 + $0x3c0] sm:$0xff] }
 0xc74   : > { %4303 = vmatprep.subr.mxu0 %v3830_v43  ;;  %v3928_v43 = vld [vmem:[%s9303_s2 + $0x3b8] sm:$0xff] }
 0xc75   : > { %4304 = vmatpush1.msra.mxu0 %v3829_v44  ;;  %v3927_v44 = vld [vmem:[%s9303_s2 + $0x3b0] sm:$0xff] }
 0xc76   : > { %4305 = vmatprep.subr.mxu0 %v3828_v45  ;;  %v3926_v45 = vld [vmem:[%s9303_s2 + $0x3a8] sm:$0xff] }
 0xc77   : > { %4306 = vmatpush1.msra.mxu0 %v3827_v46  ;;  %v3925_v46 = vld [vmem:[%s9303_s2 + $0x3a0] sm:$0xff] }
 0xc78   : > { %4307 = vmatprep.subr.mxu0 %v3826_v47  ;;  %v3924_v47 = vld [vmem:[%s9303_s2 + $0x398] sm:$0xff] }
 0xc79   : > { %4308 = vmatpush1.msra.mxu0 %v3825_v48  ;;  %v3923_v48 = vld [vmem:[%s9303_s2 + $0x390] sm:$0xff] }
 0xc7a   : > { %4309 = vmatprep.subr.mxu0 %v3824_v49  ;;  %v3922_v49 = vld [vmem:[%s9303_s2 + $0x388] sm:$0xff] }
 0xc7b   : > { %4310 = vmatpush1.msra.mxu0 %v3823_v50  ;;  %v3921_v50 = vld [vmem:[%s9303_s2 + $0x380] sm:$0xff] }
 0xc7c   : > { %4311 = vmatprep.subr.mxu0 %v3822_v51  ;;  %v3920_v51 = vld [vmem:[%s9303_s2 + $0x378] sm:$0xff] }
 0xc7d   : > { %4312 = vmatpush1.msra.mxu0 %v3821_v52  ;;  %v3919_v52 = vld [vmem:[%s9303_s2 + $0x370] sm:$0xff] }
 0xc7e   : > { %4313 = vmatprep.subr.mxu0 %v3820_v53  ;;  %v3918_v53 = vld [vmem:[%s9303_s2 + $0x368] sm:$0xff] }
 0xc7f   : > { %4314 = vmatpush1.msra.mxu0 %v3819_v54  ;;  %v3917_v54 = vld [vmem:[%s9303_s2 + $0x360] sm:$0xff] }
 0xc80   : > { %4315 = vmatprep.subr.mxu0 %v3818_v55  ;;  %v3916_v55 = vld [vmem:[%s9303_s2 + $0x358] sm:$0xff] }
 0xc81   : > { %4316 = vmatpush1.msra.mxu0 %v3817_v56  ;;  %v3915_v56 = vld [vmem:[%s9303_s2 + $0x350] sm:$0xff] }
 0xc82   : > { %4317 = vmatprep.subr.mxu0 %v3816_v57  ;;  %v3914_v57 = vld [vmem:[%s9303_s2 + $0x348] sm:$0xff] }
 0xc83   : > { %4318 = vmatpush1.msra.mxu0 %v3815_v58  ;;  %v3913_v58 = vld [vmem:[%s9303_s2 + $0x340] sm:$0xff] }
 0xc84   : > { %4319 = vmatprep.subr.mxu0 %v3814_v59  ;;  %v3964_v59 = vld [vmem:[%s9303_s2 + $0x4d8] sm:$0xf] }
 0xc85   : > { %4320 = vmatpush1.msra.mxu0 %v3813_v60  ;;  %v3963_v60 = vld [vmem:[%s9303_s2 + $0x4d0] sm:$0xf] }
 0xc86   : > { %4321 = vmatprep.subr.mxu0 %v3812_v61  ;;  %v3962_v61 = vld [vmem:[%s9303_s2 + $0x4c8] sm:$0xff] }
 0xc87   : > { %4322 = vmatpush1.msra.mxu0 %v3811_v62  ;;  %v3961_v62 = vld [vmem:[%s9303_s2 + $0x4c0] sm:$0xff] }
 0xc88   : > { %4323 = vmatprep.subr.mxu0 %v3810_v63  ;;  %v3960_v63 = vld [vmem:[%s9303_s2 + $0x4b8] sm:$0xff] }
 0xc89   : > { %4324 = vmatpush1.msra.mxu0 %v3809_v1  ;;  %v3959_v1 = vld [vmem:[%s9303_s2 + $0x4b0] sm:$0xff] }
 0xc8a   : > { %6950 = vmatprep.subr.msk.mxu0 %vm3976_vm12, %v3860_v2  ;;  %v3958_v2 = vld [vmem:[%s9303_s2 + $0x4a8] sm:$0xff] }
 0xc8b   : > { %6951 = vmatpush2.msk.msra.mxu0 %vm3976_vm12, %v3859_v4  ;;  %v3957_v4 = vld [vmem:[%s9303_s2 + $0x4a0] sm:$0xff] }
 0xc8c   : > { %4339 = vmatprep.subr.mxu0 %v3858_v5  ;;  %v3956_v5 = vld [vmem:[%s9303_s2 + $0x498] sm:$0xff] }
 0xc8d   : > { %4340 = vmatpush2.msra.mxu0 %v3857_v6  ;;  %v3955_v6 = vld [vmem:[%s9303_s2 + $0x490] sm:$0xff] }
 0xc8e   : > { %4341 = vmatprep.subr.mxu0 %v3856_v7  ;;  %v3954_v7 = vld [vmem:[%s9303_s2 + $0x488] sm:$0xff] }
 0xc8f   : > { %4342 = vmatpush2.msra.mxu0 %v3855_v19  ;;  %v3953_v19 = vld [vmem:[%s9303_s2 + $0x480] sm:$0xff] }
 0xc90   : > { %4343 = vmatprep.subr.mxu0 %v3854_v8  ;;  %v3952_v8 = vld [vmem:[%s9303_s2 + $0x478] sm:$0xff] }
 0xc91   : > { %4344 = vmatpush2.msra.mxu0 %v3853_v9  ;;  %v3951_v9 = vld [vmem:[%s9303_s2 + $0x470] sm:$0xff] }
 0xc92   : > { %4345 = vmatprep.subr.mxu0 %v3852_v10  ;;  %v3950_v10 = vld [vmem:[%s9303_s2 + $0x468] sm:$0xff] }
 0xc93   : > { %4346 = vmatpush2.msra.mxu0 %v3851_v11  ;;  %v3949_v11 = vld [vmem:[%s9303_s2 + $0x460] sm:$0xff] }
 0xc94   : > { %4347 = vmatprep.subr.mxu0 %v3850_v12  ;;  %v3948_v12 = vld [vmem:[%s9303_s2 + $0x458] sm:$0xff] }
 0xc95   : > { %4348 = vmatpush2.msra.mxu0 %v3849_v13  ;;  %v3947_v13 = vld [vmem:[%s9303_s2 + $0x450] sm:$0xff] }
 0xc96   : > { %4349 = vmatprep.subr.mxu0 %v3848_v14  ;;  %v3946_v14 = vld [vmem:[%s9303_s2 + $0x448] sm:$0xff] }
 0xc97   : > { %4350 = vmatpush2.msra.mxu0 %v3847_v15  ;;  %v3945_v15 = vld [vmem:[%s9303_s2 + $0x440] sm:$0xff] }
 0xc98   : > { %4351 = vmatprep.subr.mxu0 %v3846_v20  ;;  %v3807_v20 = vld [vmem:[%s9312_s1] sm:$0xff]  ;;  %s9320_s1 = sld [smem:[#allocation38_spill]] }
 0xc99   : > { %4352 = vmatpush2.msra.mxu0 %v3845_v16  ;;  %4531 = vperm.xlu1 %7594, %v3807_v20   ;;  %v3808_v16 = vld [vmem:[%s9313_s3] sm:$0xff]  ;;  %s9319_s3 = sld [smem:[#allocation32_spill]] }
 0xc9a   : > { %4353 = vmatprep.subr.mxu0 %v3844_v17  ;;  %v4545_v17 = vld [vmem:[%s9305_s23] sm:$0xff] }
 0xc9b   : > { %4354 = vmatpush2.msra.mxu0 %v3843_v18  ;;  %v4557_v18 = vld [vmem:[%s9306_s7] sm:$0xff] }
 0xc9c   : > { %4355 = vmatprep.subr.mxu0 %v3842_v21  ;;  %v4559_v21 = vld [vmem:[%s9307_s0] sm:$0xff]  ;;  %s9322_s0 = sld [smem:[#allocation39_spill]] }
 0xc9d   : > { %4356 = vmatpush2.msra.mxu0 %v3841_v22  ;;  %4538 = vperm.xlu1 %7594, %v3808_v16   ;;  %v4561_v22 = vld [vmem:[%s9308_s16] sm:$0xff] }
 0xc9e   : > { %4447 = vmatprep.subr.mxu0 %v3944_v23  ;;  %v5653_v23 = vld [vmem:[%s9314_s4] sm:$0xff]  ;;  %s9318_s4 = sld [smem:[#allocation27_spill]] }
 0xca1   : > { %4685 = vperm.xlu1 %7594, %v4545_v17  }
 0xca5   : > { %5610 = vperm.xlu1 %7594, %v4557_v18  }
 0xca9   : > { %5624 = vperm.xlu1 %7594, %v4559_v21  }
 0xcad   : > { %5636 = vperm.xlu1 %7594, %v4561_v22  }
 0xcb1   : > { %6541 = vperm.xlu1 %7594, %v5653_v23  }
 0xd26   : > { %v4124_v3 = vpop.f32.mrf.mxu0 }
 0xd28   : > { %v4126_v24 = vpop.f32.mrf.mxu0 }
 0xd29   : > { %6952 = vmatprep.mubr.msk.f32.mxu0 %vm4203_vm15, %v4126_v24 }
 0xd2a   : > { %v4198_v28 = vpop.f32.mrf.mxu0  ;;  %4358 = vmatmul.mubr.f32.vlgmr.msra.gmra.mxu0 %v4124_v3  ;;  %v5655_v3 = vld [vmem:[%s9315_s5] sm:$0xff]  ;;  %s9317_s5 = sld [smem:[#allocation25_spill]] }
 0xd2b   : > { %4448 = vmatpush1.msra.mxu0 %v3943_v26  ;;  %6554 = vperm.xlu1 %7594, %v5655_v3  }
 0xd2c   : > { %v4200_v32 = vpop.f32.mrf.mxu0  ;;  %4449 = vmatprep.subr.mxu0 %v3942_v27 }
 0xd2d   : > { %6949 = vmatprep.mubr.msk.f32.mxu1 %vm4203_vm15, %v4200_v32  ;;  %4450 = vmatpush1.msra.mxu0 %v3941_v29  ;;  %v4578_v29 = vld [vmem:[%s9316_s6 + $0x78] sm:$0xff]  ;;  %v4576_v32 = vld [vmem:[%s9316_s6 + $0x68] sm:$0xff] }
 0xd2e   : > { %4278 = vmatmul.mubr.f32.vlgmr.msra.gmra.mxu1 %v4198_v28  ;;  %4451 = vmatprep.subr.mxu0 %v3940_v30  ;;  %v4577_v30 = vld [vmem:[%s9316_s6 + $0x70] sm:$0xff] }
 0xd2f   : > { %4398 = vmatpush1.msra.mxu1 %v8562_v31  ;;  %4431 = vmatprep.mubr.f32.mxu1 %v7657_v25  ;;  %v3933_v31 = vld [vmem:[%s9303_s2 + $0x3e0] sm:$0xff] }
 0xd30   : > { %4452 = vmatpush1.msra.mxu0 %v3939_v33  ;;  %v4575_v33 = vld [vmem:[%s9316_s6 + $0x60] sm:$0xff] }
 0xd31   : > { %4453 = vmatprep.subr.mxu0 %v3938_v0  ;;  %v4574_v0 = vld [vmem:[%s9316_s6 + $0x58] sm:$0xff] }
 0xd32   : > { %6953 = vmatmul.mubr.msk.f32.vlgmr.msra.gmra.mxu1 %vm4054_vm14, %v3805_v34  ;;  %4454 = vmatpush1.msra.mxu0 %v3937_v35  ;;  %v4573_v34 = vld [vmem:[%s9316_s6 + $0x50] sm:$0xff]  ;;  %v4572_v35 = vld [vmem:[%s9316_s6 + $0x48] sm:$0xff] }
 0xd33   : > { %4455 = vmatprep.subr.mxu0 %v3936_v36  ;;  %4763 = vmatprep.mubr.f32.mxu1 %v7657_v25  ;;  %v4571_v36 = vld [vmem:[%s9316_s6 + $0x40] sm:$0xff] }
 0xd34   : > { %4456 = vmatpush1.msra.mxu0 %v3935_v37  ;;  %v4570_v37 = vld [vmem:[%s9316_s6 + $0x38] sm:$0xff] }
 0xd35   : > { %4457 = vmatprep.subr.mxu0 %v3934_v38  ;;  %v4569_v38 = vld [vmem:[%s9316_s6 + $0x30] sm:$0xff] }
 0xd36   : > { %4458 = vmatpush1.msra.mxu0 %v3933_v31  ;;  %v4568_v31 = vld [vmem:[%s9316_s6 + $0x28] sm:$0xff] }
 0xd37   : > { %4459 = vmatprep.subr.mxu0 %v3932_v39  ;;  %v4567_v39 = vld [vmem:[%s9316_s6 + $0x20] sm:$0xff] }
 0xd38   : > { %4460 = vmatpush1.msra.mxu0 %v3931_v40  ;;  %v4566_v40 = vld [vmem:[%s9316_s6 + $0x18] sm:$0xff] }
 0xd39   : > { %4461 = vmatprep.subr.mxu0 %v3930_v41  ;;  %v4565_v41 = vld [vmem:[%s9316_s6 + $0x10] sm:$0xff] }
 0xd3a   : > { %4462 = vmatpush1.msra.mxu0 %v3929_v42  ;;  %v4564_v42 = vld [vmem:[%s9316_s6 + $0x8] sm:$0xff] }
 0xd3b   : > { %4463 = vmatprep.subr.mxu0 %v3928_v43  ;;  %v4563_v43 = vld [vmem:[%s9316_s6] sm:$0xff] }
 0xd3c   : > { %4464 = vmatpush1.msra.mxu0 %v3927_v44  ;;  %v4586_v44 = vld [vmem:[%s9316_s6 + $0xb8] sm:$0xff] }
 0xd3d   : > { %4465 = vmatprep.subr.mxu0 %v3926_v45  ;;  %v4585_v45 = vld [vmem:[%s9316_s6 + $0xb0] sm:$0xff] }
 0xd3e   : > { %4466 = vmatpush1.msra.mxu0 %v3925_v46 }
 0xd3f   : > { %4467 = vmatprep.subr.mxu0 %v3924_v47 }
 0xd40   : > { %4468 = vmatpush1.msra.mxu0 %v3923_v48 }
 0xd41   : > { %4469 = vmatprep.subr.mxu0 %v3922_v49 }
 0xd42   : > { %4470 = vmatpush1.msra.mxu0 %v3921_v50 }
 0xd43   : > { %4471 = vmatprep.subr.mxu0 %v3920_v51 }
 0xd44   : > { %4472 = vmatpush1.msra.mxu0 %v3919_v52  ;;  %v4523_v52 = vpop.permute.xlu0 %4522 }
 0xd45   : > { %4473 = vmatprep.subr.mxu0 %v3918_v53 }
 0xd46   : > { %4474 = vmatpush1.msra.mxu0 %v3917_v54 }
 0xd47   : > { %4475 = vmatprep.subr.mxu0 %v3916_v55 }
 0xd48   : > { %4476 = vmatpush1.msra.mxu0 %v3915_v56  ;;  %v4532_v56 = vpop.permute.xlu1 %4531 }
 0xd49   : > { %4477 = vmatprep.subr.mxu0 %v3914_v57 }
 0xd4a   : > { %4478 = vmatpush1.msra.mxu0 %v3913_v58 }
 0xd4b   : > { %6954 = vmatprep.subr.msk.mxu0 %vm3976_vm12, %v3964_v59 }
 0xd4c   : > { %6955 = vmatpush2.msk.msra.mxu0 %vm3976_vm12, %v3963_v60 }
 0xd4d   : > { %4493 = vmatprep.subr.mxu0 %v3962_v61 }
 0xd4e   : > { %4494 = vmatpush2.msra.mxu0 %v3961_v62  ;;  %v4539_v62 = vpop.permute.xlu1 %4538 }
 0xd4f   : > { %4495 = vmatprep.subr.mxu0 %v3960_v63 }
 0xd50   : > { %4496 = vmatpush2.msra.mxu0 %v3959_v1 }
 0xd51   : > { %4497 = vmatprep.subr.mxu0 %v3958_v2  ;;  %v4543_v2 = vld [vmem:[%s9317_s5] sm:$0xff] }
 0xd52   : > { %4498 = vmatpush2.msra.mxu0 %v3957_v4  ;;  %v4544_v4 = vld [vmem:[%s9317_s5 + $0x8] sm:$0xff] }
 0xd53   : > { %4499 = vmatprep.subr.mxu0 %v3956_v5  ;;  %v4584_v5 = vld [vmem:[%s9316_s6 + $0xa8] sm:$0xff] }
 0xd54   : > { %4500 = vmatpush2.msra.mxu0 %v3955_v6  ;;  %v4583_v6 = vld [vmem:[%s9316_s6 + $0xa0] sm:$0xff] }
 0xd55   : > { %4501 = vmatprep.subr.mxu0 %v3954_v7  ;;  %v4582_v7 = vld [vmem:[%s9316_s6 + $0x98] sm:$0xff] }
 0xd56   : > { %4502 = vmatpush2.msra.mxu0 %v3953_v19  ;;  %v4581_v19 = vld [vmem:[%s9316_s6 + $0x90] sm:$0xff] }
 0xd57   : > { %4503 = vmatprep.subr.mxu0 %v3952_v8  ;;  %v4580_v8 = vld [vmem:[%s9316_s6 + $0x88] sm:$0xff] }
 0xd58   : > { %4504 = vmatpush2.msra.mxu0 %v3951_v9  ;;  %v4579_v9 = vld [vmem:[%s9316_s6 + $0x80] sm:$0xff] }
 0xd59   : > { %4505 = vmatprep.subr.mxu0 %v3950_v10 }
 0xd5a   : > { %4506 = vmatpush2.msra.mxu0 %v3949_v11 }
 0xd5b   : > { %4507 = vmatprep.subr.mxu0 %v3948_v12 }
 0xd5c   : > { %4508 = vmatpush2.msra.mxu0 %v3947_v13  ;;  %v4691_v13 = vpop.permute.xlu0 %4690 }
 0xd5d   : > { %4509 = vmatprep.subr.mxu0 %v3946_v14  ;;  %v4686_v14 = vpop.permute.xlu1 %4685 }
 0xd5e   : > { %4510 = vmatpush2.msra.mxu0 %v3945_v15 }
 0xd5f   : > { %5035 = vmatprep.subr.mxu0 %v7657_v25 }
 0xdea   : > { %v4359_v46 = vpop.f32.mrf.mxu0 }
 0xdec   : > { %v4361_v47 = vpop.f32.mrf.mxu0 }
 0xdee   : > { %v4279_v24 = vpop.f32.mrf.mxu1 }
 0xdef   : > { %v4360_v48 = vadd.f32 %v4359_v46, %v4279_v24  ;;  %v4547_v24 = vld [vmem:[%s9318_s4] sm:$0xff]  ;;  %v4608_v46 = vld [vmem:[%s9316_s6 + $0x168] sm:$0xff] }
 0xdf0   : > { %v8695_v26 = vpop.f32.mrf.mxu1 }
 0xdf1   : > { %v4362_v50 = vadd.f32 %v4361_v47, %v8695_v26  ;;  %v4548_v26 = vld [vmem:[%s9318_s4 + $0x8] sm:$0xff]  ;;  %v4607_v47 = vld [vmem:[%s9316_s6 + $0x160] sm:$0xff] }
 0xdf2   : > { %v4433_v27 = vpop.f32.mrf.mxu1 }
 0xdf4   : > { %v4435_v28 = vpop.f32.mrf.mxu1 }
 0xdf5   : > { %6956 = vmatprep.mubr.msk.f32.mxu0 %vm4203_vm15, %v4435_v28  ;;  %v4602_v28 = vld [vmem:[%s9316_s6 + $0x138] sm:$0xff] }
 0xdf6   : > { %4512 = vmatmul.mubr.f32.vlgmr.msra.gmra.mxu0 %v4433_v27  ;;  %v4549_v27 = vld [vmem:[%s9318_s4 + $0x10] sm:$0xff] }
 0xdf7   : > { %5036 = vmatpush1.msra.mxu0 %v4578_v29  ;;  %v4601_v29 = vld [vmem:[%s9316_s6 + $0x130] sm:$0xff] }
 0xdf8   : > { %5037 = vmatprep.subr.mxu0 %v7657_v25 }
 0xdf9   : > { %5038 = vmatpush1.msra.mxu0 %v4577_v30  ;;  %v4550_v30 = vld [vmem:[%s9318_s4 + $0x18] sm:$0xff] }
 0xdfa   : > { %5039 = vmatprep.subr.mxu0 %v7657_v25 }
 0xdfb   : > { %5040 = vmatpush1.msra.mxu0 %v4576_v32  ;;  %v4600_v32 = vld [vmem:[%s9316_s6 + $0x128] sm:$0xff] }
 0xdfc   : > { %5041 = vmatprep.subr.mxu0 %v7657_v25 }
 0xdfd   : > { %5042 = vmatpush1.msra.mxu0 %v4575_v33  ;;  %v4599_v33 = vld [vmem:[%s9316_s6 + $0x120] sm:$0xff] }
 0xdfe   : > { %5043 = vmatprep.subr.mxu0 %v7657_v25 }
 0xdff   : > { %5044 = vmatpush1.msra.mxu0 %v4574_v0  ;;  %v4598_v0 = vld [vmem:[%s9316_s6 + $0x118] sm:$0xff] }
 0xe00   : > { %5045 = vmatprep.subr.mxu0 %v7657_v25 }
 0xe01   : > { %5046 = vmatpush1.msra.mxu0 %v4573_v34  ;;  %v4597_v34 = vld [vmem:[%s9316_s6 + $0x110] sm:$0xff] }
 0xe02   : > { %5047 = vmatprep.subr.mxu0 %v7657_v25 }
 0xe03   : > { %5048 = vmatpush1.msra.mxu0 %v4572_v35  ;;  %v4596_v35 = vld [vmem:[%s9316_s6 + $0x108] sm:$0xff] }
 0xe04   : > { %5049 = vmatprep.subr.mxu0 %v7657_v25 }
 0xe05   : > { %5050 = vmatpush1.msra.mxu0 %v4571_v36  ;;  %v4595_v36 = vld [vmem:[%s9316_s6 + $0x100] sm:$0xff] }
 0xe06   : > { %5051 = vmatprep.subr.mxu0 %v7657_v25 }
 0xe07   : > { %5052 = vmatpush1.msra.mxu0 %v4570_v37  ;;  %v4594_v37 = vld [vmem:[%s9316_s6 + $0xf8] sm:$0xff] }
 0xe08   : > { %5053 = vmatprep.subr.mxu0 %v7657_v25 }
 0xe09   : > { %5054 = vmatpush1.msra.mxu0 %v4569_v38  ;;  %v4593_v38 = vld [vmem:[%s9316_s6 + $0xf0] sm:$0xff] }
 0xe0a   : > { %5055 = vmatprep.subr.mxu0 %v7657_v25 }
 0xe0b   : > { %5056 = vmatpush1.msra.mxu0 %v4568_v31  ;;  %v4592_v31 = vld [vmem:[%s9316_s6 + $0xe8] sm:$0xff] }
 0xe0c   : > { %5057 = vmatprep.subr.mxu0 %v7657_v25 }
 0xe0d   : > { %5058 = vmatpush1.msra.mxu0 %v4567_v39  ;;  %v4591_v39 = vld [vmem:[%s9316_s6 + $0xe0] sm:$0xff] }
 0xe0e   : > { %5059 = vmatprep.subr.mxu0 %v7657_v25 }
 0xe0f   : > { %5060 = vmatpush1.msra.mxu0 %v4566_v40  ;;  %v4590_v40 = vld [vmem:[%s9316_s6 + $0xd8] sm:$0xff] }
 0xe10   : > { %5061 = vmatprep.subr.mxu0 %v7657_v25 }
 0xe11   : > { %5062 = vmatpush1.msra.mxu0 %v4565_v41  ;;  %v4589_v41 = vld [vmem:[%s9316_s6 + $0xd0] sm:$0xff] }
 0xe12   : > { %5063 = vmatprep.subr.mxu0 %v7657_v25 }
 0xe13   : > { %5064 = vmatpush1.msra.mxu0 %v4564_v42  ;;  %v4588_v42 = vld [vmem:[%s9316_s6 + $0xc8] sm:$0xff] }
 0xe14   : > { %5065 = vmatprep.subr.mxu0 %v7657_v25 }
 0xe15   : > { %5066 = vmatpush1.msra.mxu0 %v4563_v43  ;;  %v4587_v43 = vld [vmem:[%s9316_s6 + $0xc0] sm:$0xff] }
 0xe16   : > { %5083 = vmatprep.subr.mxu0 %v7657_v25 }
 0xe17   : > { %5084 = vmatpush2.msra.mxu0 %v4586_v44  ;;  %v4610_v44 = vld [vmem:[%s9316_s6 + $0x178] sm:$0xff] }
 0xe18   : > { %5085 = vmatprep.subr.mxu0 %v7657_v25 }
 0xe19   : > { %5086 = vmatpush2.msra.mxu0 %v4585_v45  ;;  %v4609_v45 = vld [vmem:[%s9316_s6 + $0x170] sm:$0xff] }
 0xe1a   : > { %5087 = vmatprep.subr.mxu0 %v7657_v25 }
 0xe1b   : > { %5088 = vmatpush2.msra.mxu0 %v4584_v5  ;;  %v4625_v5 = vld [vmem:[%s9316_s6 + $0x1f0] sm:$0xff] }
 0xe1c   : > { %5089 = vmatprep.subr.mxu0 %v7657_v25 }
 0xe1d   : > { %5090 = vmatpush2.msra.mxu0 %v4583_v6  ;;  %v4552_v6 = vld [vmem:[%s9318_s4 + $0x28] sm:$0xff] }
 0xe1e   : > { %5091 = vmatprep.subr.mxu0 %v7657_v25 }
 0xe1f   : > { %5092 = vmatpush2.msra.mxu0 %v4582_v7  ;;  %v4624_v7 = vld [vmem:[%s9316_s6 + $0x1e8] sm:$0xff] }
 0xe20   : > { %5093 = vmatprep.subr.mxu0 %v7657_v25 }
 0xe21   : > { %5094 = vmatpush2.msra.mxu0 %v4581_v19  ;;  %v4647_v19 = vld [vmem:[%s9316_s6 + $0x2a0] sm:$0xff] }
 0xe22   : > { %5095 = vmatprep.subr.mxu0 %v7657_v25 }
 0xe23   : > { %5096 = vmatpush2.msra.mxu0 %v4580_v8  ;;  %v4623_v8 = vld [vmem:[%s9316_s6 + $0x1e0] sm:$0xff] }
 0xe24   : > { %5097 = vmatprep.subr.mxu0 %v7657_v25 }
 0xe25   : > { %5098 = vmatpush2.msra.mxu0 %v4579_v9  ;;  %v4646_v9 = vld [vmem:[%s9316_s6 + $0x298] sm:$0xff] }
 0xeb6   : > { %v4513_v49 = vpop.f32.mrf.mxu0 }
 0xeb7   : > { %v4518_v51 = vadd.f32 %v4513_v49, %v4360_v48  ;;  %v4606_v48 = vld [vmem:[%s9316_s6 + $0x158] sm:$0xff]  ;;  %v4605_v49 = vld [vmem:[%s9316_s6 + $0x150] sm:$0xff] }
 0xeb8   : > { %v4515_v53 = vpop.f32.mrf.mxu0 }
 0xeb9   : > { %v4525_v54 = vadd.f32 %v4523_v52, %v4518_v51  ;;  %v4519_v55 = vadd.f32 %v4515_v53, %v4362_v50  ;;  %v4604_v50 = vld [vmem:[%s9316_s6 + $0x148] sm:$0xff]  ;;  %v4603_v51 = vld [vmem:[%s9316_s6 + $0x140] sm:$0xff] }
 0xebb   : > { %v4527_v57 = vmax.f32 %v4525_v54, 0.0  ;;  %v4526_v58 = vadd.f32 %v4523_v52, %v4519_v55 }
 0xebd   : > { %v4528_v59 = vmax.f32 %v4526_v58, 0.0  ;;  %v4534_v60 = vmul.f32 %v4532_v56, %v4527_v57  ;;  %v4553_v57 = vld [vmem:[%s9318_s4 + $0x30] sm:$0xff] }
 0xebf   : > { %v4535_v61 = vmul.f32 %v4532_v56, %v4528_v59  ;;  %v4541_v1 = vadd.f32 %v4539_v62, %v4534_v60  ;;  %v4650_v59 = vld [vmem:[%s9316_s6 + $0x2b8] sm:$0xff] }
 0xec1   : > { %v4542_v63 = vadd.f32 %v4539_v62, %v4535_v61  ;;  %v4554_v62 = vld [vmem:[%s9318_s4 + $0x38] sm:$0xff] }
 0xec3   : > { %4729 = vmatprep.subr.mxu1 %v4542_v63  ;;  %v4649_v63 = vld [vmem:[%s9316_s6 + $0x2b0] sm:$0xff] }
 0xec4   : > { %4730 = vmatpush1.msra.mxu1 %v4541_v1  ;;  %v4551_v1 = vld [vmem:[%s9318_s4 + $0x20] sm:$0xff] }
 0xec5   : > { %6957 = vmatmul.mubr.msk.f32.vlgmr.msra.gmra.mxu1 %vm4054_vm14, %v4543_v2  ;;  %v4626_v2 = vld [vmem:[%s9316_s6 + $0x1f8] sm:$0xff] }
 0xec6   : > { %4769 = vmatprep.mubr.f32.mxu1 %v7657_v25 }
 0xec9   : > { %6958 = vmatmul.mubr.msk.f32.gmra.mxu1 %vm4054_vm14, %v4544_v4  ;;  %v4648_v4 = vld [vmem:[%s9316_s6 + $0x2a8] sm:$0xff] }
 0xeca   : > { %4851 = vmatprep.mubr.f32.mxu1 %v7657_v25 }
 0xf85   : > { %v4765_v10 = vpop.f32.mrf.mxu1 }
 0xf86   : > { %v4766_v18 = vadd.f32 %v4765_v10, %v4686_v14  ;;  %v4622_v10 = vld [vmem:[%s9316_s6 + $0x1d8] sm:$0xff] }
 0xf87   : > { %v4767_v11 = vpop.f32.mrf.mxu1 }
 0xf88   : > { %v4768_v16 = vadd.f32 %v4767_v11, %v4686_v14  ;;  %v8760_v3 = vmax.f32 %v4766_v18, 0.0  ;;  %v4645_v11 = vld [vmem:[%s9316_s6 + $0x290] sm:$0xff]  ;;  %v4620_v14 = vld [vmem:[%s9316_s6 + $0x1c8] sm:$0xff] }
 0xf89   : > { %v4771_v12 = vpop.f32.mrf.mxu1  ;;  %v4641_v18 = vld [vmem:[%s9316_s6 + $0x270] sm:$0xff] }
 0xf8a   : > { %v4772_v15 = vadd.f32 %v4771_v12, %v4691_v13  ;;  %v8756_v23 = vmax.f32 %v4768_v16, 0.0  ;;  %v4621_v12 = vld [vmem:[%s9316_s6 + $0x1d0] sm:$0xff]  ;;  %v4642_v16 = vld [vmem:[%s9316_s6 + $0x278] sm:$0xff] }
 0xf8b   : > { %v4773_v20 = vpop.f32.mrf.mxu1 }
 0xf8c   : > { %v4774_v17 = vadd.f32 %v4773_v20, %v4691_v13  ;;  %v8754_v22 = vmax.f32 %v4772_v15, 0.0  ;;  %v4644_v13 = vld [vmem:[%s9316_s6 + $0x288] sm:$0xff]  ;;  %v4643_v15 = vld [vmem:[%s9316_s6 + $0x280] sm:$0xff] }
 0xf8d   : > { %v4619_v20 = vld [vmem:[%s9316_s6 + $0x1c0] sm:$0xff] }
 0xf8e   : > { %v8752_v21 = vmax.f32 %v4774_v17, 0.0  ;;  %v4618_v17 = vld [vmem:[%s9316_s6 + $0x1b8] sm:$0xff] }
 0xf90   : > { %4815 = vmatprep.subr.mxu1 %v8752_v21  ;;  %5310 = vmatprep.subr.mxu0 %v8752_v21 }
 0xf91   : > { %4816 = vmatpush1.msra.mxu1 %v8754_v22 }
 0xf92   : > { %4817 = vmatprep.subr.mxu1 %v8756_v23 }
 0xf93   : > { %4818 = vmatpush1.msra.mxu1 %v8760_v3 }
 0xf94   : > { %6959 = vmatmul.mubr.msk.f32.vlgmr.msra.gmra.mxu1 %vm4780_vm0, %v4547_v24  ;;  %4898 = vmatprep.subr.mxu1 %v8752_v21  ;;  %v4617_v24 = vld [vmem:[%s9316_s6 + $0x1b0] sm:$0xff] }
 0xf95   : > { %4899 = vmatpush1.msra.mxu1 %v8754_v22  ;;  %4857 = vmatprep.mubr.f32.mxu1 %v7657_v25 }
 0xf96   : > { %4900 = vmatprep.subr.mxu1 %v8756_v23 }
 0xf97   : > { %4901 = vmatpush1.msra.mxu1 %v8760_v3 }
 0xf98   : > { %6960 = vmatmul.mubr.msk.f32.gmra.mxu1 %vm4780_vm0, %v4548_v26  ;;  %4954 = vmatprep.subr.mxu1 %v7657_v25  ;;  %v4640_v26 = vld [vmem:[%s9316_s6 + $0x268] sm:$0xff] }
 0xf99   : > { %4934 = vmatprep.mubr.f32.mxu1 %v7657_v25 }
 0xf9c   : > { %6961 = vmatmul.mubr.msk.f32.vlgmr.msra.gmra.mxu1 %vm4780_vm0, %v4549_v27  ;;  %v4616_v27 = vld [vmem:[%s9316_s6 + $0x1a8] sm:$0xff] }
 0xf9d   : > { %4955 = vmatpush1.msra.mxu1 %v4602_v28  ;;  %4940 = vmatprep.mubr.f32.mxu1 %v7657_v25  ;;  %v4639_v28 = vld [vmem:[%s9316_s6 + $0x260] sm:$0xff] }
 0xf9e   : > { %4956 = vmatprep.subr.mxu1 %v7657_v25 }
 0xf9f   : > { %4957 = vmatpush1.msra.mxu1 %v4601_v29  ;;  %v4615_v29 = vld [vmem:[%s9316_s6 + $0x1a0] sm:$0xff] }
 0xfa0   : > { %4958 = vmatprep.subr.mxu1 %v7657_v25  ;;  %6962 = vmatmul.mubr.msk.f32.gmra.mxu1 %vm4780_vm0, %v4550_v30  ;;  %v4638_v30 = vld [vmem:[%s9316_s6 + $0x258] sm:$0xff] }
 0xfa1   : > { %4959 = vmatpush1.msra.mxu1 %v4600_v32  ;;  %v4614_v32 = vld [vmem:[%s9316_s6 + $0x198] sm:$0xff] }
 0xfa2   : > { %4960 = vmatprep.subr.mxu1 %v7657_v25 }
 0xfa3   : > { %4961 = vmatpush1.msra.mxu1 %v4599_v33  ;;  %v4613_v33 = vld [vmem:[%s9316_s6 + $0x190] sm:$0xff] }
 0xfa4   : > { %4962 = vmatprep.subr.mxu1 %v7657_v25 }
 0xfa5   : > { %4963 = vmatpush1.msra.mxu1 %v4598_v0  ;;  %v4612_v0 = vld [vmem:[%s9316_s6 + $0x188] sm:$0xff] }
 0xfa6   : > { %4964 = vmatprep.subr.mxu1 %v7657_v25 }
 0xfa7   : > { %4965 = vmatpush1.msra.mxu1 %v4597_v34  ;;  %v4611_v34 = vld [vmem:[%s9316_s6 + $0x180] sm:$0xff] }
 0xfa8   : > { %4966 = vmatprep.subr.mxu1 %v7657_v25 }
 0xfa9   : > { %4967 = vmatpush1.msra.mxu1 %v4596_v35  ;;  %v4634_v35 = vld [vmem:[%s9316_s6 + $0x238] sm:$0xff] }
 0xfaa   : > { %4968 = vmatprep.subr.mxu1 %v7657_v25 }
 0xfab   : > { %4969 = vmatpush1.msra.mxu1 %v4595_v36  ;;  %v4633_v36 = vld [vmem:[%s9316_s6 + $0x230] sm:$0xff] }
 0xfac   : > { %4970 = vmatprep.subr.mxu1 %v7657_v25 }
 0xfad   : > { %4971 = vmatpush1.msra.mxu1 %v4594_v37  ;;  %v4632_v37 = vld [vmem:[%s9316_s6 + $0x228] sm:$0xff] }
 0xfae   : > { %4972 = vmatprep.subr.mxu1 %v7657_v25 }
 0xfaf   : > { %4973 = vmatpush1.msra.mxu1 %v4593_v38  ;;  %v4631_v38 = vld [vmem:[%s9316_s6 + $0x220] sm:$0xff] }
 0xfb0   : > { %4974 = vmatprep.subr.mxu1 %v7657_v25 }
 0xfb1   : > { %4975 = vmatpush1.msra.mxu1 %v4592_v31  ;;  %v4630_v31 = vld [vmem:[%s9316_s6 + $0x218] sm:$0xff] }
 0xfb2   : > { %4976 = vmatprep.subr.mxu1 %v7657_v25 }
 0xfb3   : > { %4977 = vmatpush1.msra.mxu1 %v4591_v39  ;;  %v4629_v39 = vld [vmem:[%s9316_s6 + $0x210] sm:$0xff] }
 0xfb4   : > { %4978 = vmatprep.subr.mxu1 %v7657_v25 }
 0xfb5   : > { %4979 = vmatpush1.msra.mxu1 %v4590_v40  ;;  %v4628_v40 = vld [vmem:[%s9316_s6 + $0x208] sm:$0xff] }
 0xfb6   : > { %4980 = vmatprep.subr.mxu1 %v7657_v25 }
 0xfb7   : > { %4981 = vmatpush1.msra.mxu1 %v4589_v41  ;;  %v4627_v41 = vld [vmem:[%s9316_s6 + $0x200] sm:$0xff] }
 0xfb8   : > { %4982 = vmatprep.subr.mxu1 %v7657_v25 }
 0xfb9   : > { %4983 = vmatpush1.msra.mxu1 %v4588_v42  ;;  %v4637_v42 = vld [vmem:[%s9316_s6 + $0x250] sm:$0xff] }
 0xfba   : > { %4984 = vmatprep.subr.mxu1 %v7657_v25 }
 0xfbb   : > { %4985 = vmatpush1.msra.mxu1 %v4587_v43  ;;  %v4636_v43 = vld [vmem:[%s9316_s6 + $0x248] sm:$0xff] }
 0xfbc   : > { %5002 = vmatprep.subr.mxu1 %v7657_v25 }
 0xfbd   : > { %5003 = vmatpush2.msra.mxu1 %v4610_v44  ;;  %v4635_v44 = vld [vmem:[%s9316_s6 + $0x240] sm:$0xff] }
 0xfbe   : > { %5004 = vmatprep.subr.mxu1 %v7657_v25 }
 0xfbf   : > { %5005 = vmatpush2.msra.mxu1 %v4609_v45  ;;  %v4658_v45 = vld [vmem:[%s9316_s6 + $0x2f8] sm:$0xff] }
 0xfc0   : > { %5006 = vmatprep.subr.mxu1 %v7657_v25 }
 0xfc1   : > { %5007 = vmatpush2.msra.mxu1 %v4608_v46  ;;  %v4656_v46 = vld [vmem:[%s9316_s6 + $0x2e8] sm:$0xff] }
 0xfc2   : > { %5008 = vmatprep.subr.mxu1 %v7657_v25 }
 0xfc3   : > { %5009 = vmatpush2.msra.mxu1 %v4607_v47  ;;  %v4655_v47 = vld [vmem:[%s9316_s6 + $0x2e0] sm:$0xff] }
 0xfc4   : > { %5010 = vmatprep.subr.mxu1 %v7657_v25 }
 0xfc5   : > { %5011 = vmatpush2.msra.mxu1 %v4606_v48  ;;  %v4654_v48 = vld [vmem:[%s9316_s6 + $0x2d8] sm:$0xff] }
 0xfc6   : > { %5012 = vmatprep.subr.mxu1 %v7657_v25 }
 0xfc7   : > { %5013 = vmatpush2.msra.mxu1 %v4605_v49  ;;  %v4653_v49 = vld [vmem:[%s9316_s6 + $0x2d0] sm:$0xff] }
 0xfc8   : > { %5014 = vmatprep.subr.mxu1 %v7657_v25 }
 0xfc9   : > { %5015 = vmatpush2.msra.mxu1 %v4604_v50  ;;  %v4652_v50 = vld [vmem:[%s9316_s6 + $0x2c8] sm:$0xff] }
 0xfca   : > { %5016 = vmatprep.subr.mxu1 %v7657_v25 }
 0xfcb   : > { %5017 = vmatpush2.msra.mxu1 %v4603_v51  ;;  %v4651_v51 = vld [vmem:[%s9316_s6 + $0x2c0] sm:$0xff] }
 0xfcc   : > { %5144 = vmatprep.subr.mxu1 %v8752_v21 }
0x1054   : > { %v4853_v52 = vpop.f32.mrf.mxu1 }
0x1056   : > { %v4855_v53 = vpop.f32.mrf.mxu1 }
0x1057   : > { %6965 = vmatprep.mubr.msk.f32.mxu0 %vm4947_vm1, %v4855_v53 }
0x1058   : > { %v4859_v54 = vpop.f32.mrf.mxu1  ;;  %5100 = vmatmul.mubr.f32.vlgmr.msra.gmra.mxu0 %v4853_v52 }
0x1059   : > { %5311 = vmatpush1.msra.mxu0 %v8754_v22 }
0x105a   : > { %5312 = vmatprep.subr.mxu0 %v8756_v23  ;;  %v4861_v55 = vpop.f32.mrf.mxu1 }
0x105b   : > { %5313 = vmatpush1.msra.mxu0 %v8760_v3  ;;  %6966 = vmatprep.mubr.msk.f32.mxu0 %vm4947_vm1, %v4861_v55 }
0x105c   : > { %v4936_v56 = vpop.f32.mrf.mxu1  ;;  %5105 = vmatmul.mubr.f32.gmra.mxu0 %v4859_v54  ;;  %5365 = vmatprep.subr.mxu0 %v7657_v25 }
0x105d   : > { %5346 = vmatprep.mubr.f32.mxu0 %v7657_v25 }
0x105e   : > { %v4938_v58 = vpop.f32.mrf.mxu1 }
0x105f   : > { %6963 = vmatprep.mubr.msk.f32.mxu1 %vm4947_vm1, %v4938_v58 }
0x1060   : > { %v4942_v60 = vpop.f32.mrf.mxu1  ;;  %5019 = vmatmul.mubr.f32.vlgmr.msra.gmra.mxu1 %v4936_v56  ;;  %6971 = vmatmul.mubr.msk.f32.vlgmr.msra.gmra.mxu0 %vm4780_vm0, %v4553_v57 }
0x1061   : > { %5145 = vmatpush1.msra.mxu1 %v8754_v22  ;;  %5352 = vmatprep.mubr.f32.mxu0 %v7657_v25 }
0x1062   : > { %5146 = vmatprep.subr.mxu1 %v8756_v23  ;;  %v4944_v61 = vpop.f32.mrf.mxu1  ;;  %5366 = vmatpush1.msra.mxu0 %v4650_v59 }
0x1063   : > { %5147 = vmatpush1.msra.mxu1 %v8760_v3  ;;  %6964 = vmatprep.mubr.msk.f32.mxu1 %vm4947_vm1, %v4944_v61 }
0x1064   : > { %5024 = vmatmul.mubr.f32.gmra.mxu1 %v4942_v60  ;;  %5199 = vmatprep.subr.mxu1 %v7657_v25 }
0x1065   : > { %5180 = vmatprep.mubr.f32.mxu1 %v7657_v25  ;;  %6972 = vmatmul.mubr.msk.f32.gmra.mxu0 %vm4780_vm0, %v4554_v62 }
0x1066   : > { %5367 = vmatprep.subr.mxu0 %v7657_v25 }
0x1067   : > { %5368 = vmatpush1.msra.mxu0 %v4649_v63 }
0x1068   : > { %6967 = vmatmul.mubr.msk.f32.vlgmr.msra.gmra.mxu1 %vm4780_vm0, %v4551_v1  ;;  %5369 = vmatprep.subr.mxu0 %v7657_v25 }
0x1069   : > { %5200 = vmatpush1.msra.mxu1 %v4626_v2  ;;  %5186 = vmatprep.mubr.f32.mxu1 %v7657_v25 }
0x106a   : > { %5201 = vmatprep.subr.mxu1 %v7657_v25  ;;  %5370 = vmatpush1.msra.mxu0 %v4648_v4 }
0x106b   : > { %5202 = vmatpush1.msra.mxu1 %v4625_v5  ;;  %5371 = vmatprep.subr.mxu0 %v7657_v25 }
0x106c   : > { %5203 = vmatprep.subr.mxu1 %v7657_v25  ;;  %6968 = vmatmul.mubr.msk.f32.gmra.mxu1 %vm4780_vm0, %v4552_v6 }
0x106d   : > { %5204 = vmatpush1.msra.mxu1 %v4624_v7  ;;  %5372 = vmatpush1.msra.mxu0 %v4647_v19  ;;  %v4555_v19 = vld [vmem:[%s9318_s4 + $0x40] sm:$0xff] }
0x106e   : > { %5205 = vmatprep.subr.mxu1 %v7657_v25  ;;  %5373 = vmatprep.subr.mxu0 %v7657_v25 }
0x106f   : > { %5206 = vmatpush1.msra.mxu1 %v4623_v8  ;;  %5374 = vmatpush1.msra.mxu0 %v4646_v9  ;;  %v4674_v8 = vld [vmem:[%s9316_s6 + $0x378] sm:$0xff]  ;;  %v4671_v9 = vld [vmem:[%s9316_s6 + $0x360] sm:$0xff] }
0x1070   : > { %5207 = vmatprep.subr.mxu1 %v7657_v25  ;;  %5375 = vmatprep.subr.mxu0 %v7657_v25 }
0x1071   : > { %5208 = vmatpush1.msra.mxu1 %v4622_v10  ;;  %5376 = vmatpush1.msra.mxu0 %v4645_v11  ;;  %v4670_v10 = vld [vmem:[%s9316_s6 + $0x358] sm:$0xff]  ;;  %v4669_v11 = vld [vmem:[%s9316_s6 + $0x350] sm:$0xff] }
0x1072   : > { %5209 = vmatprep.subr.mxu1 %v7657_v25  ;;  %5377 = vmatprep.subr.mxu0 %v7657_v25 }
0x1073   : > { %5210 = vmatpush1.msra.mxu1 %v4621_v12  ;;  %5378 = vmatpush1.msra.mxu0 %v4644_v13  ;;  %v4668_v12 = vld [vmem:[%s9316_s6 + $0x348] sm:$0xff]  ;;  %v4667_v13 = vld [vmem:[%s9316_s6 + $0x340] sm:$0xff] }
0x1074   : > { %5211 = vmatprep.subr.mxu1 %v7657_v25  ;;  %5379 = vmatprep.subr.mxu0 %v7657_v25 }
0x1075   : > { %5212 = vmatpush1.msra.mxu1 %v4620_v14  ;;  %5380 = vmatpush1.msra.mxu0 %v4643_v15  ;;  %v4666_v14 = vld [vmem:[%s9316_s6 + $0x338] sm:$0xff]  ;;  %v4665_v15 = vld [vmem:[%s9316_s6 + $0x330] sm:$0xff] }
0x1076   : > { %5213 = vmatprep.subr.mxu1 %v7657_v25  ;;  %5381 = vmatprep.subr.mxu0 %v7657_v25 }
0x1077   : > { %5214 = vmatpush1.msra.mxu1 %v4619_v20  ;;  %5382 = vmatpush1.msra.mxu0 %v4642_v16  ;;  %v4664_v20 = vld [vmem:[%s9316_s6 + $0x328] sm:$0xff]  ;;  %v4663_v16 = vld [vmem:[%s9316_s6 + $0x320] sm:$0xff] }
0x1078   : > { %5215 = vmatprep.subr.mxu1 %v7657_v25  ;;  %5383 = vmatprep.subr.mxu0 %v7657_v25 }
0x1079   : > { %5216 = vmatpush1.msra.mxu1 %v4618_v17  ;;  %5384 = vmatpush1.msra.mxu0 %v4641_v18  ;;  %v4662_v17 = vld [vmem:[%s9316_s6 + $0x318] sm:$0xff]  ;;  %v4661_v18 = vld [vmem:[%s9316_s6 + $0x310] sm:$0xff] }
0x107a   : > { %5217 = vmatprep.subr.mxu1 %v7657_v25  ;;  %5385 = vmatprep.subr.mxu0 %v7657_v25 }
0x107b   : > { %5218 = vmatpush1.msra.mxu1 %v4617_v24  ;;  %5386 = vmatpush1.msra.mxu0 %v4640_v26  ;;  %v4660_v24 = vld [vmem:[%s9316_s6 + $0x308] sm:$0xff]  ;;  %v4659_v26 = vld [vmem:[%s9316_s6 + $0x300] sm:$0xff] }
0x107c   : > { %5219 = vmatprep.subr.mxu1 %v7657_v25  ;;  %5387 = vmatprep.subr.mxu0 %v7657_v25 }
0x107d   : > { %5220 = vmatpush1.msra.mxu1 %v4616_v27  ;;  %5388 = vmatpush1.msra.mxu0 %v4639_v28  ;;  %v4682_v27 = vld [vmem:[%s9316_s6 + $0x3b8] sm:$0xff]  ;;  %v4681_v28 = vld [vmem:[%s9316_s6 + $0x3b0] sm:$0xff] }
0x107e   : > { %5221 = vmatprep.subr.mxu1 %v7657_v25  ;;  %5389 = vmatprep.subr.mxu0 %v7657_v25 }
0x107f   : > { %5222 = vmatpush1.msra.mxu1 %v4615_v29  ;;  %5390 = vmatpush1.msra.mxu0 %v4638_v30  ;;  %v4680_v29 = vld [vmem:[%s9316_s6 + $0x3a8] sm:$0xff]  ;;  %v4679_v30 = vld [vmem:[%s9316_s6 + $0x3a0] sm:$0xff] }
0x1080   : > { %5223 = vmatprep.subr.mxu1 %v7657_v25  ;;  %5391 = vmatprep.subr.mxu0 %v7657_v25 }
0x1081   : > { %5224 = vmatpush1.msra.mxu1 %v4614_v32  ;;  %5392 = vmatpush1.msra.mxu0 %v4637_v42  ;;  %v4678_v32 = vld [vmem:[%s9316_s6 + $0x398] sm:$0xff] }
0x1082   : > { %5225 = vmatprep.subr.mxu1 %v7657_v25  ;;  %5393 = vmatprep.subr.mxu0 %v7657_v25 }
0x1083   : > { %5226 = vmatpush1.msra.mxu1 %v4613_v33  ;;  %5394 = vmatpush1.msra.mxu0 %v4636_v43  ;;  %v4677_v33 = vld [vmem:[%s9316_s6 + $0x390] sm:$0xff] }
0x1084   : > { %5227 = vmatprep.subr.mxu1 %v7657_v25  ;;  %5395 = vmatprep.subr.mxu0 %v7657_v25 }
0x1085   : > { %5228 = vmatpush1.msra.mxu1 %v4612_v0  ;;  %5396 = vmatpush1.msra.mxu0 %v4635_v44  ;;  %v4676_v0 = vld [vmem:[%s9316_s6 + $0x388] sm:$0xff] }
0x1086   : > { %5229 = vmatprep.subr.mxu1 %v7657_v25  ;;  %5413 = vmatprep.subr.mxu0 %v7657_v25 }
0x1087   : > { %5230 = vmatpush1.msra.mxu1 %v4611_v34  ;;  %5414 = vmatpush2.msra.mxu0 %v4658_v45  ;;  %v4675_v34 = vld [vmem:[%s9316_s6 + $0x380] sm:$0xff] }
0x1088   : > { %5247 = vmatprep.subr.mxu1 %v7657_v25  ;;  %5415 = vmatprep.subr.mxu0 %v7657_v25 }
0x1089   : > { %5248 = vmatpush2.msra.mxu1 %v4634_v35 }
0x108a   : > { %5249 = vmatprep.subr.mxu1 %v7657_v25 }
0x108b   : > { %5250 = vmatpush2.msra.mxu1 %v4633_v36 }
0x108c   : > { %5251 = vmatprep.subr.mxu1 %v7657_v25 }
0x108d   : > { %5252 = vmatpush2.msra.mxu1 %v4632_v37 }
0x108e   : > { %5253 = vmatprep.subr.mxu1 %v7657_v25 }
0x108f   : > { %5254 = vmatpush2.msra.mxu1 %v4631_v38 }
0x1090   : > { %5255 = vmatprep.subr.mxu1 %v7657_v25 }
0x1091   : > { %5256 = vmatpush2.msra.mxu1 %v4630_v31 }
0x1092   : > { %5257 = vmatprep.subr.mxu1 %v7657_v25 }
0x1093   : > { %5258 = vmatpush2.msra.mxu1 %v4629_v39 }
0x1094   : > { %5259 = vmatprep.subr.mxu1 %v7657_v25 }
0x1095   : > { %5260 = vmatpush2.msra.mxu1 %v4628_v40 }
0x1096   : > { %5261 = vmatprep.subr.mxu1 %v7657_v25 }
0x1097   : > { %5262 = vmatpush2.msra.mxu1 %v4627_v41 }
0x1098   : > { %5476 = vmatprep.subr.mxu1 %v8752_v21  ;;  %v4657_v21 = vld [vmem:[%s9316_s6 + $0x2f0] sm:$0xff] }
0x1099   : > { %5416 = vmatpush2.msra.mxu0 %v4657_v21 }
0x109a   : > { %5417 = vmatprep.subr.mxu0 %v7657_v25 }
0x109b   : > { %5418 = vmatpush2.msra.mxu0 %v4656_v46 }
0x109c   : > { %5419 = vmatprep.subr.mxu0 %v7657_v25 }
0x109d   : > { %5420 = vmatpush2.msra.mxu0 %v4655_v47 }
0x109e   : > { %5421 = vmatprep.subr.mxu0 %v7657_v25 }
0x109f   : > { %5422 = vmatpush2.msra.mxu0 %v4654_v48 }
0x10a0   : > { %5423 = vmatprep.subr.mxu0 %v7657_v25 }
0x10a1   : > { %5424 = vmatpush2.msra.mxu0 %v4653_v49  ;;  %v5616_v49 = vpop.permute.xlu0 %5615 }
0x10a2   : > { %5425 = vmatprep.subr.mxu0 %v7657_v25 }
0x10a3   : > { %5426 = vmatpush2.msra.mxu0 %v4652_v50 }
0x10a4   : > { %5427 = vmatprep.subr.mxu0 %v7657_v25 }
0x10a5   : > { %5428 = vmatpush2.msra.mxu0 %v4651_v51 }
0x10a6   : > { %7330 = vmatprep.subr.mxu0 %v7657_v25 }
0x1118   : > { %v5101_v52 = vpop.f32.mrf.mxu0 }
0x111a   : > { %v5103_v53 = vpop.f32.mrf.mxu0 }
0x111c   : > { %v5106_v54 = vpop.f32.mrf.mxu0 }
0x111e   : > { %v5108_v55 = vpop.f32.mrf.mxu0 }
0x1120   : > { %v5020_v56 = vpop.f32.mrf.mxu1  ;;  %v5348_v57 = vpop.f32.mrf.mxu0 }
0x1121   : > { %v8949_v58 = vadd.f32 %v5101_v52, %v5020_v56  ;;  %v5611_v52 = vpop.permute.xlu1 %5610 }
0x1122   : > { %v5022_v59 = vpop.f32.mrf.mxu1  ;;  %v5350_v60 = vpop.f32.mrf.mxu0 }
0x1123   : > { %6973 = vmatprep.mubr.msk.f32.mxu0 %vm4947_vm1, %v5350_v60 }
0x1124   : > { %v5025_v61 = vpop.f32.mrf.mxu1  ;;  %5430 = vmatmul.mubr.f32.vlgmr.msra.gmra.mxu0 %v5348_v57  ;;  %v5630_v57 = vpop.permute.xlu0 %5629 }
0x1125   : > { %v8952_v62 = vadd.f32 %v5106_v54, %v5025_v61  ;;  %v5354_v63 = vpop.f32.mrf.mxu0  ;;  %v5625_v61 = vpop.permute.xlu1 %5624 }
0x1126   : > { %v5027_v1 = vpop.f32.mrf.mxu1 }
0x1127   : > { %v5356_v2 = vpop.f32.mrf.mxu0 }
0x1128   : > { %v5182_v4 = vpop.f32.mrf.mxu1  ;;  %6974 = vmatprep.mubr.msk.f32.mxu0 %vm4947_vm1, %v5356_v2  ;;  %v5642_v2 = vpop.permute.xlu0 %5641 }
0x1129   : > { %5435 = vmatmul.mubr.f32.gmra.mxu0 %v5354_v63 }
0x112a   : > { %v5184_v5 = vpop.f32.mrf.mxu1  ;;  %7334 = vmatprep.mubr.msk.f32.mxu0 %vm7659_vm2, %v7657_v25 }
0x112b   : > { %6969 = vmatprep.mubr.msk.f32.mxu1 %vm4947_vm1, %v5184_v5  ;;  %v5637_v5 = vpop.permute.xlu1 %5636 }
0x112c   : > { %v5188_v6 = vpop.f32.mrf.mxu1  ;;  %5264 = vmatmul.mubr.f32.vlgmr.msra.gmra.mxu1 %v5182_v4 }
0x112d   : > { %5477 = vmatpush1.msra.mxu1 %v8754_v22  ;;  %v4673_v22 = vld [vmem:[%s9316_s6 + $0x370] sm:$0xff] }
0x112e   : > { %5478 = vmatprep.subr.mxu1 %v8756_v23  ;;  %v5190_v7 = vpop.f32.mrf.mxu1  ;;  %v4556_v23 = vld [vmem:[%s9318_s4 + $0x48] sm:$0xff] }
0x112f   : > { %5479 = vmatpush1.msra.mxu1 %v8760_v3  ;;  %6970 = vmatprep.mubr.msk.f32.mxu1 %vm4947_vm1, %v5190_v7  ;;  %v4672_v3 = vld [vmem:[%s9316_s6 + $0x368] sm:$0xff]  ;;  %v5646_v7 = vld [vmem:[%s9319_s3] sm:$0xff]  ;;  %s9321_s3 = sld [smem:[#allocation34_spill]] }
0x1130   : > { %5269 = vmatmul.mubr.f32.gmra.mxu1 %v5188_v6  ;;  %5531 = vmatprep.subr.mxu1 %v7657_v25 }
0x1131   : > { %5512 = vmatprep.mubr.f32.mxu1 %v7657_v25 }
0x1134   : > { %6975 = vmatmul.mubr.msk.f32.vlgmr.msra.gmra.mxu1 %vm4780_vm0, %v4555_v19  ;;  %v5666_v19 = vld [vmem:[%s9320_s1 + $0x50] sm:$0xf] }
0x1135   : > { %5518 = vmatprep.mubr.f32.mxu1 %v7657_v25  ;;  %5532 = vmatpush1.msra.mxu1 %v4674_v8  ;;  %v5665_v8 = vld [vmem:[%s9320_s1 + $0x48] sm:$0xff] }
0x1136   : > { %5533 = vmatprep.subr.mxu1 %v7657_v25 }
0x1137   : > { %5534 = vmatpush1.msra.mxu1 %v4673_v22  ;;  %v5664_v22 = vld [vmem:[%s9320_s1 + $0x40] sm:$0xff] }
0x1138   : > { %6976 = vmatmul.mubr.msk.f32.gmra.mxu1 %vm4780_vm0, %v4556_v23  ;;  %5535 = vmatprep.subr.mxu1 %v7657_v25  ;;  %v5663_v23 = vld [vmem:[%s9320_s1 + $0x38] sm:$0xff] }
0x1139   : > { %5536 = vmatpush1.msra.mxu1 %v4672_v3  ;;  %v5662_v3 = vld [vmem:[%s9320_s1 + $0x30] sm:$0xff] }
0x113a   : > { %5537 = vmatprep.subr.mxu1 %v7657_v25 }
0x113b   : > { %5538 = vmatpush1.msra.mxu1 %v4671_v9  ;;  %v5661_v9 = vld [vmem:[%s9320_s1 + $0x28] sm:$0xff] }
0x113c   : > { %5539 = vmatprep.subr.mxu1 %v7657_v25 }
0x113d   : > { %5540 = vmatpush1.msra.mxu1 %v4670_v10  ;;  %v5660_v10 = vld [vmem:[%s9320_s1 + $0x20] sm:$0xff] }
0x113e   : > { %5541 = vmatprep.subr.mxu1 %v7657_v25 }
0x113f   : > { %5542 = vmatpush1.msra.mxu1 %v4669_v11  ;;  %v5659_v11 = vld [vmem:[%s9320_s1 + $0x18] sm:$0xff] }
0x1140   : > { %5543 = vmatprep.subr.mxu1 %v7657_v25 }
0x1141   : > { %5544 = vmatpush1.msra.mxu1 %v4668_v12  ;;  %v5658_v12 = vld [vmem:[%s9320_s1 + $0x10] sm:$0xff] }
0x1142   : > { %5545 = vmatprep.subr.mxu1 %v7657_v25 }
0x1143   : > { %5546 = vmatpush1.msra.mxu1 %v4667_v13  ;;  %v5657_v13 = vld [vmem:[%s9320_s1 + $0x8] sm:$0xff] }
0x1144   : > { %5547 = vmatprep.subr.mxu1 %v7657_v25 }
0x1145   : > { %5548 = vmatpush1.msra.mxu1 %v4666_v14  ;;  %v5656_v14 = vld [vmem:[%s9320_s1] sm:$0xff] }
0x1146   : > { %5549 = vmatprep.subr.mxu1 %v7657_v25 }
0x1147   : > { %5550 = vmatpush1.msra.mxu1 %v4665_v15  ;;  %v5714_v15 = vpop.permute.xlu0 %5713 }
0x1148   : > { %5551 = vmatprep.subr.mxu1 %v7657_v25 }
0x1149   : > { %5552 = vmatpush1.msra.mxu1 %v4664_v20 }
0x114a   : > { %5553 = vmatprep.subr.mxu1 %v7657_v25 }
0x114b   : > { %5554 = vmatpush1.msra.mxu1 %v4663_v16 }
0x114c   : > { %5555 = vmatprep.subr.mxu1 %v7657_v25 }
0x114d   : > { %5556 = vmatpush1.msra.mxu1 %v4662_v17 }
0x114e   : > { %5557 = vmatprep.subr.mxu1 %v7657_v25 }
0x114f   : > { %5558 = vmatpush1.msra.mxu1 %v4661_v18 }
0x1150   : > { %5559 = vmatprep.subr.mxu1 %v7657_v25 }
0x1151   : > { %5560 = vmatpush1.msra.mxu1 %v4660_v24  ;;  %v5648_v24 = vld [vmem:[%s9321_s3] sm:$0xff] }
0x1152   : > { %5561 = vmatprep.subr.mxu1 %v7657_v25 }
0x1153   : > { %5562 = vmatpush1.msra.mxu1 %v4659_v26  ;;  %v5649_v26 = vld [vmem:[%s9321_s3 + $0x8] sm:$0xff] }
0x1154   : > { %5579 = vmatprep.subr.mxu1 %v7657_v25 }
0x1155   : > { %5580 = vmatpush2.msra.mxu1 %v4682_v27  ;;  %v5677_v27 = vld [vmem:[%s9320_s1 + $0xa8] sm:$0xf] }
0x1156   : > { %5581 = vmatprep.subr.mxu1 %v7657_v25 }
0x1157   : > { %5582 = vmatpush2.msra.mxu1 %v4681_v28  ;;  %v5676_v28 = vld [vmem:[%s9320_s1 + $0xa0] sm:$0xff] }
0x1158   : > { %5583 = vmatprep.subr.mxu1 %v7657_v25 }
0x1159   : > { %5584 = vmatpush2.msra.mxu1 %v4680_v29  ;;  %v5675_v29 = vld [vmem:[%s9320_s1 + $0x98] sm:$0xff] }
0x115a   : > { %5585 = vmatprep.subr.mxu1 %v7657_v25 }
0x115b   : > { %5586 = vmatpush2.msra.mxu1 %v4679_v30  ;;  %v5674_v30 = vld [vmem:[%s9320_s1 + $0x90] sm:$0xff] }
0x115c   : > { %5587 = vmatprep.subr.mxu1 %v7657_v25 }
0x115d   : > { %5588 = vmatpush2.msra.mxu1 %v4678_v32  ;;  %v5673_v32 = vld [vmem:[%s9320_s1 + $0x88] sm:$0xff] }
0x115e   : > { %5589 = vmatprep.subr.mxu1 %v7657_v25 }
0x115f   : > { %5590 = vmatpush2.msra.mxu1 %v4677_v33  ;;  %v5672_v33 = vld [vmem:[%s9320_s1 + $0x80] sm:$0xff] }
0x1160   : > { %5591 = vmatprep.subr.mxu1 %v7657_v25 }
0x1161   : > { %5592 = vmatpush2.msra.mxu1 %v4676_v0  ;;  %v5671_v0 = vld [vmem:[%s9320_s1 + $0x78] sm:$0xff] }
0x1162   : > { %5593 = vmatprep.subr.mxu1 %v7657_v25 }
0x1163   : > { %5594 = vmatpush2.msra.mxu1 %v4675_v34  ;;  %v5670_v34 = vld [vmem:[%s9320_s1 + $0x70] sm:$0xff] }
0x1164   : > { %7372 = vmatprep.subr.mxu1 %v7657_v25 }
0x11e4   : > { %v5431_v35 = vpop.f32.mrf.mxu0 }
0x11e6   : > { %v5433_v36 = vpop.f32.mrf.mxu0 }
0x11e7   : > { %v5668_v36 = vld [vmem:[%s9320_s1 + $0x60] sm:$0xff] }
0x11e9   : > { %v5436_v37 = vpop.f32.mrf.mxu0 }
0x11eb   : > { %v5438_v38 = vpop.f32.mrf.mxu0 }
0x11ec   : > { %v5265_v31 = vpop.f32.mrf.mxu1 }
0x11ed   : > { %v5274_v39 = vadd.f32 %v5265_v31, %v8949_v58 }
0x11ee   : > { %v5267_v40 = vpop.f32.mrf.mxu1 }
0x11ef   : > { %v5440_v41 = vadd.f32 %v5431_v35, %v5274_v39  ;;  %v5669_v35 = vld [vmem:[%s9320_s1 + $0x68] sm:$0xff]  ;;  %v5651_v39 = vld [vmem:[%s9321_s3 + $0x18] sm:$0xff] }
0x11f0   : > { %v5270_v42 = vpop.f32.mrf.mxu1 }
0x11f1   : > { %v5275_v43 = vadd.f32 %v5270_v42, %v8952_v62 }
0x11f2   : > { %v5272_v44 = vpop.f32.mrf.mxu1 }
0x11f3   : > { %v5441_v45 = vadd.f32 %v5436_v37, %v5275_v43  ;;  %v5667_v37 = vld [vmem:[%s9320_s1 + $0x58] sm:$0xff]  ;;  %v5650_v43 = vld [vmem:[%s9321_s3 + $0x10] sm:$0xff] }
0x11f4   : > { %v5514_v21 = vpop.f32.mrf.mxu1  ;;  %v5698_v44 = vld [vmem:[%s9320_s1 + $0x150] sm:$0xff] }
0x11f6   : > { %v5516_v46 = vpop.f32.mrf.mxu1 }
0x11f7   : > { %6977 = vmatprep.mubr.msk.f32.mxu1 %vm4947_vm1, %v5516_v46  ;;  %v5687_v46 = vld [vmem:[%s9320_s1 + $0xf8] sm:$0xff] }
0x11f8   : > { %v5520_v47 = vpop.f32.mrf.mxu1  ;;  %5596 = vmatmul.mubr.f32.vlgmr.msra.gmra.mxu1 %v5514_v21  ;;  %v5697_v21 = vld [vmem:[%s9320_s1 + $0x148] sm:$0xff] }
0x11f9   : > { %7373 = vmatpush3.msk.msra.mxu1 %vm3976_vm12, %v5666_v19 }
0x11fa   : > { %v5522_v48 = vpop.f32.mrf.mxu1  ;;  %7374 = vmatprep.subr.mxu1 %v7657_v25 }
0x11fb   : > { %6978 = vmatprep.mubr.msk.f32.mxu1 %vm4947_vm1, %v5522_v48  ;;  %7375 = vmatpush3.msra.mxu1 %v5665_v8  ;;  %v5686_v48 = vld [vmem:[%s9320_s1 + $0xf0] sm:$0xff] }
0x11fc   : > { %5601 = vmatmul.mubr.f32.gmra.mxu1 %v5520_v47  ;;  %7376 = vmatprep.subr.mxu1 %v7657_v25  ;;  %v5696_v47 = vld [vmem:[%s9320_s1 + $0x140] sm:$0xff] }
0x11fd   : > { %7394 = vmatprep.mubr.msk.f32.mxu1 %vm7659_vm2, %v7657_v25  ;;  %7377 = vmatpush3.msra.mxu1 %v5664_v22 }
0x11fe   : > { %7378 = vmatprep.subr.mxu1 %v7657_v25 }
0x11ff   : > { %7379 = vmatpush3.msra.mxu1 %v5663_v23  ;;  %v5652_v23 = vld [vmem:[%s9321_s3 + $0x20] sm:$0xff] }
0x1200   : > { %7380 = vmatprep.subr.mxu1 %v7657_v25 }
0x1201   : > { %7381 = vmatpush3.msra.mxu1 %v5662_v3  ;;  %v5710_v3 = vld [vmem:[%s9320_s1 + $0x1b0] sm:$0xf] }
0x1202   : > { %7382 = vmatprep.subr.mxu1 %v7657_v25 }
0x1203   : > { %7383 = vmatpush3.msra.mxu1 %v5661_v9  ;;  %v5709_v9 = vld [vmem:[%s9320_s1 + $0x1a8] sm:$0xff] }
0x1204   : > { %7384 = vmatprep.subr.mxu1 %v7657_v25 }
0x1205   : > { %7385 = vmatpush3.msra.mxu1 %v5660_v10  ;;  %v5708_v10 = vld [vmem:[%s9320_s1 + $0x1a0] sm:$0xff] }
0x1206   : > { %7386 = vmatprep.subr.mxu1 %v7657_v25 }
0x1207   : > { %7387 = vmatpush3.msra.mxu1 %v5659_v11  ;;  %v5707_v11 = vld [vmem:[%s9320_s1 + $0x198] sm:$0xff] }
0x1208   : > { %7388 = vmatprep.subr.mxu1 %v7657_v25 }
0x1209   : > { %7389 = vmatpush3.msra.mxu1 %v5658_v12  ;;  %v5706_v12 = vld [vmem:[%s9320_s1 + $0x190] sm:$0xff] }
0x120a   : > { %7390 = vmatprep.subr.mxu1 %v7657_v25 }
0x120b   : > { %7391 = vmatpush3.msra.mxu1 %v5657_v13  ;;  %v5705_v13 = vld [vmem:[%s9320_s1 + $0x188] sm:$0xff] }
0x120c   : > { %7392 = vmatprep.subr.mxu1 %v7657_v25 }
0x120d   : > { %7393 = vmatpush3.msra.mxu1 %v5656_v14  ;;  %v5704_v14 = vld [vmem:[%s9320_s1 + $0x180] sm:$0xff] }
0x120e   : > { %7427 = vmatprep.subr.mxu1 %v7657_v25 }
0x12b8   : > { %v5597_v50 = vpop.f32.mrf.mxu1 }
0x12b9   : > { %v5606_v51 = vadd.f32 %v5597_v50, %v5440_v41  ;;  %v5699_v41 = vld [vmem:[%s9320_s1 + $0x158] sm:$0xf]  ;;  %v5685_v50 = vld [vmem:[%s9320_s1 + $0xe8] sm:$0xff] }
0x12ba   : > { %v5599_v53 = vpop.f32.mrf.mxu1 }
0x12bb   : > { %v5618_v54 = vadd.f32 %v5611_v52, %v5606_v51  ;;  %v5694_v51 = vld [vmem:[%s9320_s1 + $0x130] sm:$0xff]  ;;  %v5684_v52 = vld [vmem:[%s9320_s1 + $0xe0] sm:$0xff]  ;;  %v5683_v53 = vld [vmem:[%s9320_s1 + $0xd8] sm:$0xff] }
0x12bc   : > { %v5602_v55 = vpop.f32.mrf.mxu1 }
0x12bd   : > { %v5607_v56 = vadd.f32 %v5602_v55, %v5441_v45  ;;  %v5620_v59 = vmax.f32 %v5618_v54, 0.0  ;;  %v5688_v45 = vld [vmem:[%s9320_s1 + $0x100] sm:$0xf]  ;;  %v5682_v54 = vld [vmem:[%s9320_s1 + $0xd0] sm:$0xff]  ;;  %v5681_v55 = vld [vmem:[%s9320_s1 + $0xc8] sm:$0xff] }
0x12be   : > { %v5604_v58 = vpop.f32.mrf.mxu1 }
0x12bf   : > { %v5619_v60 = vadd.f32 %v5616_v49, %v5607_v56  ;;  %v5632_v63 = vmul.f32 %v5625_v61, %v5620_v59  ;;  %v5695_v49 = vld [vmem:[%s9320_s1 + $0x138] sm:$0xff]  ;;  %v5693_v56 = vld [vmem:[%s9320_s1 + $0x128] sm:$0xff]  ;;  %v5692_v58 = vld [vmem:[%s9320_s1 + $0x120] sm:$0xff] }
0x12c0   : > { %v5679_v59 = vld [vmem:[%s9320_s1 + $0xb8] sm:$0xff]  ;;  %v5678_v61 = vld [vmem:[%s9320_s1 + $0xb0] sm:$0xff] }
0x12c1   : > { %v5621_v62 = vmax.f32 %v5619_v60, 0.0  ;;  %v5644_v6 = vadd.f32 %v5637_v5, %v5632_v63  ;;  %v5691_v60 = vld [vmem:[%s9320_s1 + $0x118] sm:$0xff]  ;;  %v5689_v63 = vld [vmem:[%s9320_s1 + $0x108] sm:$0xff] }
0x12c3   : > { %v5633_v1 = vmul.f32 %v5630_v57, %v5621_v62  ;;  %v5680_v57 = vld [vmem:[%s9320_s1 + $0xc0] sm:$0xff]  ;;  %v5690_v62 = vld [vmem:[%s9320_s1 + $0x110] sm:$0xff] }
0x12c5   : > { %v5645_v4 = vadd.f32 %v5642_v2, %v5633_v1 }
0x12c7   : > { %7331 = vmatpush3.msra.mxu0 %v5645_v4 }
0x12c8   : > { %7332 = vmatprep.subr.mxu0 %v7657_v25 }
0x12c9   : > { %7333 = vmatpush3.msra.mxu0 %v5644_v6 }
0x12ca   : > { %7335 = vmatmul.mubr.msk.f32.vlgmr.msra.gmra.mxu0 %vm4780_vm0, %v5646_v7  ;;  %7337 = vmatprep.subr.mxu0 %v7657_v25 }
0x12cb   : > { %7339 = vmatprep.mubr.msk.f32.mxu0 %vm7659_vm2, %v7657_v25 }
0x138a   : > { %v5785_v20 = vpop.f32.mrf.mxu0 }
0x138b   : > { %v5786_v16 = vadd.f32 %v5785_v20, %v5714_v15  ;;  %v5703_v15 = vld [vmem:[%s9320_s1 + $0x178] sm:$0xff]  ;;  %v5702_v20 = vld [vmem:[%s9320_s1 + $0x170] sm:$0xff] }
0x138c   : > { %v7336_v17 = vpop.f32.mrf.mxu0 }
0x138d   : > { %v9052_v18 = vmax.f32 %v5786_v16, 0.0  ;;  %v5701_v16 = vld [vmem:[%s9320_s1 + $0x168] sm:$0xff]  ;;  %v5700_v17 = vld [vmem:[%s9320_s1 + $0x160] sm:$0xff] }
0x138f   : > { %7338 = vmatpush3.msra.mxu0 %v9052_v18 }
0x1390   : > { %7340 = vmatmul.mubr.msk.f32.vlgmr.msra.gmra.mxu0 %vm4054_vm14, %v5648_v24  ;;  %7342 = vmatprep.subr.mxu0 %v7657_v25 }
0x1391   : > { %7343 = vmatpush3.msra.mxu0 %v9052_v18  ;;  %7344 = vmatprep.mubr.msk.f32.mxu0 %vm7659_vm2, %v7657_v25 }
0x1392   : > { %7347 = vmatprep.subr.mxu0 %v7657_v25 }
0x1394   : > { %7345 = vmatmul.mubr.msk.f32.vlgmr.msra.gmra.mxu0 %vm4054_vm14, %v5649_v26 }
0x1395   : > { %7348 = vmatpush3.msk.msra.mxu0 %vm3976_vm12, %v5677_v27  ;;  %7369 = vmatprep.mubr.msk.f32.mxu0 %vm7659_vm2, %v7657_v25 }
0x1396   : > { %7349 = vmatprep.subr.mxu0 %v7657_v25 }
0x1397   : > { %7350 = vmatpush3.msra.mxu0 %v5676_v28 }
0x1398   : > { %7351 = vmatprep.subr.mxu0 %v7657_v25 }
0x1399   : > { %7352 = vmatpush3.msra.mxu0 %v5675_v29 }
0x139a   : > { %7353 = vmatprep.subr.mxu0 %v7657_v25 }
0x139b   : > { %7354 = vmatpush3.msra.mxu0 %v5674_v30 }
0x139c   : > { %7355 = vmatprep.subr.mxu0 %v7657_v25 }
0x139d   : > { %7356 = vmatpush3.msra.mxu0 %v5673_v32 }
0x139e   : > { %7357 = vmatprep.subr.mxu0 %v7657_v25 }
0x139f   : > { %7358 = vmatpush3.msra.mxu0 %v5672_v33  ;;  %v6570_v33 = vld [vmem:[%s7913_s29 + $0x18] sm:$0x3f] }
0x13a0   : > { %7359 = vmatprep.subr.mxu0 %v7657_v25 }
0x13a1   : > { %7360 = vmatpush3.msra.mxu0 %v5671_v0  ;;  %v6569_v0 = vld [vmem:[%s7913_s29 + $0x10] sm:$0xff] }
0x13a2   : > { %7361 = vmatprep.subr.mxu0 %v7657_v25 }
0x13a3   : > { %7362 = vmatpush3.msra.mxu0 %v5670_v34  ;;  %v6568_v34 = vld [vmem:[%s7913_s29 + $0x8] sm:$0xff] }
0x13a4   : > { %7363 = vmatprep.subr.mxu0 %v7657_v25 }
0x13a5   : > { %7364 = vmatpush3.msra.mxu0 %v5669_v35  ;;  %v6567_v35 = vld [vmem:[%s7913_s29] sm:$0xff] }
0x13a6   : > { %7365 = vmatprep.subr.mxu0 %v7657_v25 }
0x13a7   : > { %7366 = vmatpush3.msra.mxu0 %v5668_v36 }
0x13a8   : > { %7367 = vmatprep.subr.mxu0 %v7657_v25 }
0x13a9   : > { %7368 = vmatpush3.msra.mxu0 %v5667_v37 }
0x13aa   : > { %7397 = vmatprep.subr.mxu0 %v7657_v25 }
0x1450   : > { %v5859_v38 = vpop.f32.mrf.mxu0 }
0x1451   : > { %7395 = vmatmul.mubr.msk.f32.vlgmr.msra.gmra.mxu1 %vm5936_vm3, %v5859_v38  ;;  %v6542_v38 = vpop.permute.xlu1 %6541 }
0x1452   : > { %7428 = vmatpush3.msra.mxu1 %v9052_v18  ;;  %v7341_v31 = vpop.f32.mrf.mxu0  ;;  %7429 = vmatprep.mubr.msk.f32.mxu1 %vm7659_vm2, %v7657_v25 }
0x1453   : > { %7432 = vmatprep.subr.mxu1 %v7657_v25 }
0x1454   : > { %v5932_v40 = vpop.f32.mrf.mxu0 }
0x1455   : > { %7370 = vmatmul.mubr.msk.f32.vlgmr.msra.gmra.mxu0 %vm5936_vm3, %v5932_v40  ;;  %7430 = vmatmul.mubr.msk.f32.vlgmr.msra.gmra.mxu1 %vm4054_vm14, %v5651_v39 }
0x1456   : > { %7398 = vmatpush3.msra.mxu0 %v9052_v18  ;;  %v7346_v42 = vpop.f32.mrf.mxu0  ;;  %7399 = vmatprep.mubr.msk.f32.mxu0 %vm7659_vm2, %v7657_v25 }
0x1457   : > { %7402 = vmatprep.subr.mxu0 %v7657_v25  ;;  %7433 = vmatpush3.msk.msra.mxu1 %vm3976_vm12, %v5699_v41  ;;  %v6549_v41 = vpop.permute.xlu0 %6548 }
0x1458   : > { %7434 = vmatprep.subr.mxu1 %v7657_v25  ;;  %7454 = vmatprep.mubr.msk.f32.mxu1 %vm7659_vm2, %v7657_v25 }
0x1459   : > { %7400 = vmatmul.mubr.msk.f32.vlgmr.msra.gmra.mxu0 %vm4054_vm14, %v5650_v43  ;;  %7435 = vmatpush3.msra.mxu1 %v5698_v44  ;;  %v6555_v43 = vpop.permute.xlu1 %6554  ;;  %v6558_v44 = vld [vmem:[%s9322_s0] sm:$0xff] }
0x145a   : > { %7403 = vmatpush3.msk.msra.mxu0 %vm3976_vm12, %v5688_v45  ;;  %7436 = vmatprep.subr.mxu1 %v7657_v25  ;;  %v6559_v45 = vld [vmem:[%s9322_s0 + $0x8] sm:$0xff] }
0x145b   : > { %7404 = vmatprep.subr.mxu0 %v7657_v25  ;;  %7437 = vmatpush3.msra.mxu1 %v5697_v21 }
0x145c   : > { %7405 = vmatpush3.msra.mxu0 %v5687_v46  ;;  %7438 = vmatprep.subr.mxu1 %v7657_v25  ;;  %v6560_v46 = vld [vmem:[%s9322_s0 + $0x10] sm:$0xff] }
0x145d   : > { %7406 = vmatprep.subr.mxu0 %v7657_v25  ;;  %7439 = vmatpush3.msra.mxu1 %v5696_v47 }
0x145e   : > { %7407 = vmatpush3.msra.mxu0 %v5686_v48  ;;  %7440 = vmatprep.subr.mxu1 %v7657_v25 }
0x145f   : > { %7408 = vmatprep.subr.mxu0 %v7657_v25  ;;  %7441 = vmatpush3.msra.mxu1 %v5695_v49 }
0x1460   : > { %7409 = vmatpush3.msra.mxu0 %v5685_v50  ;;  %7442 = vmatprep.subr.mxu1 %v7657_v25  ;;  %v6561_v50 = vld [vmem:[%s9322_s0 + $0x18] sm:$0xff] }
0x1461   : > { %7410 = vmatprep.subr.mxu0 %v7657_v25  ;;  %7443 = vmatpush3.msra.mxu1 %v5694_v51  ;;  %v6562_v51 = vld [vmem:[%s9322_s0 + $0x20] sm:$0xff] }
0x1462   : > { %7411 = vmatpush3.msra.mxu0 %v5684_v52  ;;  %7444 = vmatprep.subr.mxu1 %v7657_v25 }
0x1463   : > { %7412 = vmatprep.subr.mxu0 %v7657_v25  ;;  %7424 = vmatprep.mubr.msk.f32.mxu0 %vm7659_vm2, %v7657_v25 }
0x1464   : > { %7413 = vmatpush3.msra.mxu0 %v5683_v53  ;;  %7445 = vmatpush3.msra.mxu1 %v5693_v56 }
0x1465   : > { %7414 = vmatprep.subr.mxu0 %v7657_v25  ;;  %7446 = vmatprep.subr.mxu1 %v7657_v25 }
0x1466   : > { %7415 = vmatpush3.msra.mxu0 %v5682_v54  ;;  %7447 = vmatpush3.msra.mxu1 %v5692_v58  ;;  %v6563_v54 = vld [vmem:[%s9322_s0 + $0x28] sm:$0xff]  ;;  %v6565_v58 = vld [vmem:[%s9322_s0 + $0x38] sm:$0xff] }
0x1467   : > { %7416 = vmatprep.subr.mxu0 %v7657_v25  ;;  %7448 = vmatprep.subr.mxu1 %v7657_v25 }
0x1468   : > { %7417 = vmatpush3.msra.mxu0 %v5681_v55  ;;  %7449 = vmatpush3.msra.mxu1 %v5691_v60  ;;  %v6564_v55 = vld [vmem:[%s9322_s0 + $0x30] sm:$0xff] }
0x1469   : > { %7418 = vmatprep.subr.mxu0 %v7657_v25  ;;  %7450 = vmatprep.subr.mxu1 %v7657_v25 }
0x146a   : > { %7419 = vmatpush3.msra.mxu0 %v5680_v57  ;;  %7451 = vmatpush3.msra.mxu1 %v5690_v62 }
0x146b   : > { %7420 = vmatprep.subr.mxu0 %v7657_v25  ;;  %7452 = vmatprep.subr.mxu1 %v7657_v25 }
0x146c   : > { %7421 = vmatpush3.msra.mxu0 %v5679_v59  ;;  %7453 = vmatpush3.msra.mxu1 %v5689_v63 }
0x146d   : > { %7422 = vmatprep.subr.mxu0 %v7657_v25  ;;  %7487 = vmatprep.subr.msk.mxu1 %vm6605_vm4, %v6570_v33 }
0x146e   : > { %7423 = vmatpush3.msra.mxu0 %v5678_v61 }
0x146f   : > { %7457 = vmatprep.subr.mxu0 %v7657_v25 }
0x1511   : > { %v6085_v1 = vpop.f32.mrf.mxu1 }
0x1513   : > { %v7396_v2 = vpop.f32.mrf.mxu1 }
0x1515   : > { %v6009_v4 = vpop.f32.mrf.mxu0  ;;  %v6308_v5 = vpop.f32.mrf.mxu1 }
0x1516   : > { %v6086_v6 = vadd.f32 %v6085_v1, %v6009_v4  ;;  %7455 = vmatmul.mubr.msk.f32.vlgmr.msra.gmra.mxu1 %vm5936_vm3, %v6308_v5 }
0x1517   : > { %v7371_v7 = vpop.f32.mrf.mxu0  ;;  %v7431_v19 = vpop.f32.mrf.mxu1  ;;  %7488 = vmatpush3.msk.msra.mxu1 %vm6605_vm4, %v6570_v33 }
0x1518   : > { %7489 = vmatprep.subr.mxu1 %v6569_v0  ;;  %v6717_v7 = vpop.permute.xlu0 %6716 }
0x1519   : > { %v6158_v8 = vpop.f32.mrf.mxu0  ;;  %7490 = vmatpush3.msra.mxu1 %v6569_v0 }
0x151a   : > { %7425 = vmatmul.mubr.msk.f32.vlgmr.msra.gmra.mxu0 %vm5936_vm3, %v6158_v8  ;;  %7491 = vmatprep.subr.mxu1 %v6568_v34 }
0x151b   : > { %7458 = vmatpush3.msra.mxu0 %v9052_v18  ;;  %v7401_v22 = vpop.f32.mrf.mxu0  ;;  %7459 = vmatprep.mubr.msk.f32.mxu0 %vm7659_vm2, %v7657_v25 }
0x151c   : > { %7462 = vmatprep.subr.mxu0 %v7657_v25  ;;  %7492 = vmatpush3.msra.mxu1 %v6568_v34 }
0x151d   : > { %7493 = vmatprep.subr.mxu1 %v6567_v35 }
0x151e   : > { %7460 = vmatmul.mubr.msk.f32.vlgmr.msra.gmra.mxu0 %vm4054_vm14, %v5652_v23  ;;  %7494 = vmatpush3.msra.mxu1 %v6567_v35 }
0x151f   : > { %7463 = vmatpush3.msk.msra.mxu0 %vm3976_vm12, %v5710_v3  ;;  %7484 = vmatprep.mubr.msk.f32.mxu0 %vm7659_vm2, %v7657_v25 }
0x1520   : > { %7464 = vmatprep.subr.mxu0 %v7657_v25  ;;  %7507 = vmatprep.subr.mxu1 %v7657_v25 }
0x1521   : > { %7465 = vmatpush3.msra.mxu0 %v5709_v9 }
0x1522   : > { %7466 = vmatprep.subr.mxu0 %v7657_v25 }
0x1523   : > { %7467 = vmatpush3.msra.mxu0 %v5708_v10 }
0x1524   : > { %7468 = vmatprep.subr.mxu0 %v7657_v25 }
0x1525   : > { %7469 = vmatpush3.msra.mxu0 %v5707_v11 }
0x1526   : > { %7470 = vmatprep.subr.mxu0 %v7657_v25 }
0x1527   : > { %7471 = vmatpush3.msra.mxu0 %v5706_v12 }
0x1528   : > { %7472 = vmatprep.subr.mxu0 %v7657_v25 }
0x1529   : > { %7473 = vmatpush3.msra.mxu0 %v5705_v13 }
0x152a   : > { %7474 = vmatprep.subr.mxu0 %v7657_v25 }
0x152b   : > { %7475 = vmatpush3.msra.mxu0 %v5704_v14 }
0x152c   : > { %7476 = vmatprep.subr.mxu0 %v7657_v25 }
0x152d   : > { %7477 = vmatpush3.msra.mxu0 %v5703_v15 }
0x152e   : > { %7478 = vmatprep.subr.mxu0 %v7657_v25 }
0x152f   : > { %7479 = vmatpush3.msra.mxu0 %v5702_v20 }
0x1530   : > { %7480 = vmatprep.subr.mxu0 %v7657_v25 }
0x1531   : > { %7481 = vmatpush3.msra.mxu0 %v5701_v16 }
0x1532   : > { %7482 = vmatprep.subr.mxu0 %v7657_v25 }
0x1533   : > { %7483 = vmatpush3.msra.mxu0 %v5700_v17 }
0x15d6   : > { %v6384_v18 = vpop.f32.mrf.mxu1 }
0x15d8   : > { %v7456_v24 = vpop.f32.mrf.mxu1 }
0x15da   : > { %v6234_v26 = vpop.f32.mrf.mxu0 }
0x15db   : > { %v6238_v27 = vadd.f32 %v6234_v26, %v6086_v6  ;;  %v6566_v6 = vld [vmem:[%s7908_s12] sm:$0xff] }
0x15dc   : > { %v7426_v28 = vpop.f32.mrf.mxu0 }
0x15dd   : > { %v6388_v29 = vadd.f32 %v6384_v18, %v6238_v27 }
0x15de   : > { %v6458_v30 = vpop.f32.mrf.mxu0 }
0x15df   : > { %7485 = vmatmul.mubr.msk.f32.vlgmr.msra.gmra.mxu0 %vm5936_vm3, %v6458_v30 }
0x15e0   : > { %v7461_v32 = vpop.f32.mrf.mxu0 }
0x169f   : > { %v6534_v36 = vpop.f32.mrf.mxu0 }
0x16a0   : > { %v6538_v37 = vadd.f32 %v6534_v36, %v6388_v29 }
0x16a1   : > { %v7486_v31 = vpop.f32.mrf.mxu0 }
0x16a2   : > { %v6544_v39 = vadd.f32 %v6542_v38, %v6538_v37 }
0x16a4   : > { %v6545_v40 = vmax.f32 %v6544_v39, 0.0 }
0x16a6   : > { %v6551_v42 = vmul.f32 %v6549_v41, %v6545_v40 }
0x16a8   : > { %v6557_v21 = vadd.f32 %v6555_v43, %v6551_v42 }
0x16aa   : > { %v6572_v47 = vmul.f32 %v6558_v44, %v6557_v21  ;;  %v6573_v48 = vmul.f32 %v6559_v45, %v6557_v21  ;;  %v6574_v49 = vmul.f32 %v6560_v46, %v6557_v21  ;;  %v6575_v52 = vmul.f32 %v6561_v50, %v6557_v21 }
0x16ab   : > { %v6576_v53 = vmul.f32 %v6562_v51, %v6557_v21  ;;  %v6577_v56 = vmul.f32 %v6563_v54, %v6557_v21  ;;  %v6578_v57 = vmul.f32 %v6564_v55, %v6557_v21  ;;  %v6579_v59 = vmul.f32 %v6565_v58, %v6557_v21 }
0x16ac   : > { %7495 = vmatprep.mubr.msk.f32.mxu1 %vm6580_vm5, %v6572_v47 }
0x16ad   : > { %7496 = vmatmul.mubr.msk.f32.vlgmr.msra.gmra.mxu1 %vm6580_vm5, %v6573_v48 }
0x16ae   : > { %7498 = vmatprep.mubr.msk.f32.mxu1 %vm6580_vm5, %v6574_v49 }
0x16b1   : > { %7499 = vmatmul.mubr.msk.f32.gmra.mxu1 %vm6580_vm5, %v6575_v52 }
0x16b2   : > { %7501 = vmatprep.mubr.msk.f32.mxu1 %vm6580_vm5, %v6576_v53 }
0x16b5   : > { %7502 = vmatmul.mubr.msk.f32.gmra.mxu1 %vm6580_vm5, %v6577_v56 }
0x16b6   : > { %7504 = vmatprep.mubr.msk.f32.mxu1 %vm6580_vm5, %v6578_v57 }
0x16b9   : > { %7505 = vmatmul.mubr.msk.f32.gmra.mxu1 %vm6580_vm5, %v6579_v59 }
0x16ba   : > { %7523 = vmatprep.mubr.msk.f32.mxu1 %vm7659_vm2, %v7657_v25 }
0x176d   : > { %v7497_v60 = vpop.f32.mrf.mxu1 }
0x176f   : > { %v6675_v61 = vpop.f32.mrf.mxu1 }
0x1771   : > { %v7500_v62 = vpop.f32.mrf.mxu1 }
0x1773   : > { %v6685_v63 = vpop.f32.mrf.mxu1 }
0x1775   : > { %v7503_v1 = vpop.f32.mrf.mxu1 }
0x1777   : > { %v6695_v2 = vpop.f32.mrf.mxu1 }
0x1779   : > { %v7506_v4 = vpop.f32.mrf.mxu1 }
0x177a   : > { %7508 = vmatpush3.msra.mxu1 %v7506_v4 }
0x177b   : > { %v6705_v5 = vpop.f32.mrf.mxu1  ;;  %7509 = vmatprep.subr.mxu1 %v7657_v25 }
0x177c   : > { %7510 = vmatpush3.msra.mxu1 %v6705_v5 }
0x177d   : > { %7511 = vmatprep.subr.mxu1 %v7657_v25 }
0x177e   : > { %7512 = vmatpush3.msra.mxu1 %v7503_v1 }
0x177f   : > { %7513 = vmatprep.subr.mxu1 %v7657_v25 }
0x1780   : > { %7514 = vmatpush3.msra.mxu1 %v6695_v2 }
0x1781   : > { %7515 = vmatprep.subr.mxu1 %v7657_v25 }
0x1782   : > { %7516 = vmatpush3.msra.mxu1 %v7500_v62 }
0x1783   : > { %7517 = vmatprep.subr.mxu1 %v7657_v25 }
0x1784   : > { %7518 = vmatpush3.msra.mxu1 %v6685_v63 }
0x1785   : > { %7519 = vmatprep.subr.mxu1 %v7657_v25 }
0x1786   : > { %7520 = vmatpush3.msra.mxu1 %v7497_v60 }
0x1787   : > { %7521 = vmatprep.subr.mxu1 %v7657_v25 }
0x1788   : > { %7522 = vmatpush3.msra.mxu1 %v6675_v61 }
0x1789   : > { %7524 = vmatmul.mubr.msk.f32.vlgmr.msra.gmra.mxu1 %vm4947_vm1, %v6566_v6 }
0x1849   : > { %v6788_v19 = vpop.f32.mrf.mxu1 }
0x184a   : > { %v6789_v8 = vadd.f32 %v6788_v19, %v6717_v7 }
0x184b   : > { %v7525_v22 = vpop.f32.mrf.mxu1 }
0x184c   : > { %6793 = vst.msk [vmem:[%s7941_s28] sm:$0xff] %vm6792_vm6, %v6789_v8 }
0x184d PF: > { %s113_s22 = sadd.s32 1, %s7601_s22  }
0x184e   : > { %p110_p6 = scmp.ge.s32.totalorder %s113_s22, 4  }
0x1850   :  { %112 = sbr.rel (!%p110_p6) target bundleno = 98 (0x62), region = 310 }

</bundles_post_ra>
